<compile_context>
chip_gen: v6e
topology: v6e:2x2x1
jax: 0.10.0
libtpu: 0.0.40
codegen_flags: <defaults>
</compile_context>

<pallas_src>
import functools

import jax
import jax.numpy as jnp
from jax.experimental import pallas as pl
from jax.experimental.pallas import tpu as pltpu


# ----------------------------------------------------------------------------
# One-time probe: how to express  y[:, p] = x[:, (p + off) % L]  on this chip.
# pltpu.roll is expected to match jnp.roll (shift moves data toward higher
# lane indices -> sign = -1); probed defensively so a convention difference or
# lowering issue can never silently break the conv tap directions.
# ----------------------------------------------------------------------------
def _probe_kernel(x_ref, o_ref):
    o_ref[...] = pltpu.roll(x_ref[...], 1, axis=1)


@functools.lru_cache(maxsize=None)
def _roll_mode():
    """Returns (use_hw_roll, sign)."""
    x = jnp.arange(8 * 128, dtype=jnp.float32).reshape(8, 128)
    try:
        y = pl.pallas_call(
            _probe_kernel,
            out_shape=jax.ShapeDtypeStruct((8, 128), jnp.float32),
        )(x)
        if bool(jnp.array_equal(y, jnp.roll(x, 1, axis=1))):
            return True, -1
        if bool(jnp.array_equal(y, jnp.roll(x, -1, axis=1))):
            return True, 1
    except Exception:
        pass
    return False, 0          # fall back to the (known-good) slice+concat roll


# ----------------------------------------------------------------------------
# Fused kernel
# ----------------------------------------------------------------------------
def _expanding_block_kernel(*refs, offsets, use_hw_roll, roll_sign, has_pe):
    if has_pe:
        m_ref, pe_ref, ff_ref, ct_ref, wt_ref, wc_ref, b_ref, o_ref = refs
    else:
        m_ref, ff_ref, ct_ref, wc_ref, b_ref, o_ref = refs

    f32, bf16 = jnp.float32, jnp.bfloat16
    CENTER = 4                       # tap (dy, dx) == (0, 0): mask is all-ones

    def tap_shift(x, off):
        """y[:, p] = x[:, (p + off) % L]; cross-image wrap is masked out."""
        L = x.shape[1]
        if off % L == 0:
            return x
        if use_hw_roll:              # XLU rotate (vector-extended slot)
            return pltpu.roll(x, (roll_sign * off) % L, axis=1)
        s = off % L                  # fallback: slice + concat
        return jnp.concatenate([x[:, s:], x[:, :s]], axis=1)

    def conv(terms, bias, relu):
        """3x3 / stride-1 / pad-1 conv as 9 direct matmuls accumulated in f32.

        terms: list of (x (Cin, L) f32, weight_getter: tap -> (Cout, Cin) bf16)
        (multiple terms == channel-concatenated input with a Cin-split weight,
        so the concat never materialises).
        """
        acc = None
        for t, off in enumerate(offsets):
            mask = None if t == CENTER else m_ref[t:t + 1, :]   # (1, L) f32
            for x, w_of in terms:
                v = tap_shift(x, off)
                if mask is not None:
                    v = v * mask                                # f32 elementwise
                r = jnp.dot(w_of(t), v.astype(bf16),            # bf16 MXU operands
                            preferred_element_type=f32)         # f32 accumulation
                acc = r if acc is None else acc + r
        acc = acc + bias
        return jnp.maximum(acc, 0.0) if relu else acc

    ff = ff_ref[...]                                            # (ni, L) f32
    contr = ct_ref[...]                                         # (ni, L) f32

    if has_pe:
        # ConvTranspose2d(2ni->ni, k=3, s=2, p=1, out_pad=1) == 3x3/s1/p1 conv
        # (flipped, in/out-swapped weight) of the zero-dilated input, which is
        # prepared wrapper-side (layout plumbing only - no scatter matrix).
        x12 = conv([(pe_ref[...], lambda t: wt_ref[t])], b_ref[0], relu=False)
    else:
        x12 = ff

    # conv1 on cat([ff, x12], dim=1): weight split along Cin, one accumulator.
    x1 = conv([(ff, lambda t: wc_ref[0, t]),
               (x12, lambda t: wc_ref[1, t])], b_ref[1], relu=True)
    # conv2
    x1 = conv([(x1, lambda t: wc_ref[2, t])], b_ref[2], relu=True)
    # 3-way residual add fused straight into conv3's taps (no HBM round trip)
    x = contr + x1 + x12
    out = conv([(x, lambda t: wc_ref[3, t])], b_ref[3], relu=True)

    o_ref[...] = out.astype(o_ref.dtype)


# ----------------------------------------------------------------------------
# Wrapper
# ----------------------------------------------------------------------------
def expanding_block_forward(params, pe_out, ff, contr, *, batch_per_step=2):
    """pe_out: (N, 2ni, h0, w0) or None; ff, contr: (N, ni, H, W). NCHW in/out."""
    N, ni, H, W = ff.shape
    P = H * W
    # Fuse B images per grid step into the lane axis (widens the matmul RHS);
    # keep >=2 grid steps when possible so both v7x TensorCores stay busy.
    B = max(b for b in range(1, min(batch_per_step, N) + 1) if N % b == 0)
    G = N // B
    L = B * P
    f32 = jnp.float32

    def to_lanes(x):                 # (N, C, h, w) -> (C, N*h*w), batch-major
        n, c, h, w = x.shape
        return jnp.transpose(x, (1, 0, 2, 3)).reshape(c, n * h * w)

    ff_l = to_lanes(ff.astype(f32))
    ct_l = to_lanes(contr.astype(f32))

    # Hoisted per-tap boundary masks (9, B*P): built once here, never rebuilt
    # per grid step; they also cover the cross-image lane-roll wraparound.
    pos = jnp.arange(P, dtype=jnp.int32)
    row, col = pos // W, pos % W
    base = jnp.stack([(row + dy >= 0) & (row + dy < H) &
                      (col + dx >= 0) & (col + dx < W)
                      for dy in (-1, 0, 1) for dx in (-1, 0, 1)]).astype(f32)
    masks = jnp.tile(base, (1, B))                              # (9, L)

    offsets = tuple(dy * W + dx for dy in (-1, 0, 1) for dx in (-1, 0, 1))
    use_hw_roll, roll_sign = _roll_mode()

    wt_taps = params["wt_taps"]      # (9, ni, 2ni)   bf16
    wc_taps = params["wc_taps"]      # (4, 9, ni, ni) bf16
    b_stack = params["b_stack"]      # (4, ni, 1)     f32

    has_pe = pe_out is not None
    if has_pe:
        _, c2, h0, w0 = pe_out.shape
        assert c2 == 2 * ni and H == 2 * h0 and W == 2 * w0
        # zero-dilate pe onto the HxW grid (wrapper-side layout plumbing)
        pe_d = jnp.zeros((N, 2 * ni, H, W), f32).at[:, :, ::2, ::2].set(
            pe_out.astype(f32))
        inputs = (masks, to_lanes(pe_d), ff_l, ct_l, wt_taps, wc_taps, b_stack)
        in_specs = [
            pl.BlockSpec((9, L), lambda g: (0, 0)),
            pl.BlockSpec((2 * ni, L), lambda g: (0, g)),
            pl.BlockSpec((ni, L), lambda g: (0, g)),
            pl.BlockSpec((ni, L), lambda g: (0, g)),
            pl.BlockSpec((9, ni, 2 * ni), lambda g: (0, 0, 0)),
            pl.BlockSpec((4, 9, ni, ni), lambda g: (0, 0, 0, 0)),
            pl.BlockSpec((4, ni, 1), lambda g: (0, 0, 0)),
        ]
    else:
        inputs = (masks, ff_l, ct_l, wc_taps, b_stack)
        in_specs = [
            pl.BlockSpec((9, L), lambda g: (0, 0)),
            pl.BlockSpec((ni, L), lambda g: (0, g)),
            pl.BlockSpec((ni, L), lambda g: (0, g)),
            pl.BlockSpec((4, 9, ni, ni), lambda g: (0, 0, 0, 0)),
            pl.BlockSpec((4, ni, 1), lambda g: (0, 0, 0)),
        ]

    kernel = functools.partial(
        _expanding_block_kernel, offsets=offsets, use_hw_roll=use_hw_roll,
        roll_sign=roll_sign, has_pe=has_pe)

    out_l = pl.pallas_call(
        kernel,
        out_shape=jax.ShapeDtypeStruct((ni, N * P), f32),
        grid_spec=pltpu.PrefetchScalarGridSpec(
            num_scalar_prefetch=0,
            grid=(G,),
            in_specs=in_specs,
            out_specs=pl.BlockSpec((ni, L), lambda g: (0, g)),
        ),
        compiler_params=pltpu.CompilerParams(
            dimension_semantics=("parallel",)),
    )(*inputs)
    # lane-dense (C, N*H*W) -> NCHW
    return jnp.transpose(out_l.reshape(ni, N, H, W), (1, 0, 2, 3))


# ----------------------------------------------------------------------------
# Parameter construction (deterministic, synthetic) + pure-JAX reference
# ----------------------------------------------------------------------------
def init_params(key, ni):
    ks = jax.random.split(key, 8)
    s = 0.1
    f32, bf16 = jnp.float32, jnp.bfloat16

    def q(w):   # round weights through bf16 so kernel & reference share them
        return w.astype(bf16).astype(f32)

    # ConvTranspose2d weight in PyTorch layout (in=2ni, out=ni, 3, 3)
    w_t_pt = q(s * jax.random.normal(ks[0], (2 * ni, ni, 3, 3), f32))
    b_t = s * jax.random.normal(ks[1], (ni,), f32)
    w1 = q(s * jax.random.normal(ks[2], (ni, 2 * ni, 3, 3), f32))
    b1 = s * jax.random.normal(ks[3], (ni,), f32)
    w2 = q(s * jax.random.normal(ks[4], (ni, ni, 3, 3), f32))
    b2 = s * jax.random.normal(ks[5], (ni,), f32)
    w3 = q(s * jax.random.normal(ks[6], (ni, ni, 3, 3), f32))
    b3 = s * jax.random.normal(ks[7], (ni,), f32)

    def taps(w_oihw):   # (Co, Ci, 3, 3) OIHW -> (9, Co, Ci), t = kh*3 + kw
        co, ci = w_oihw.shape[0], w_oihw.shape[1]
        return jnp.transpose(w_oihw, (2, 3, 0, 1)).reshape(9, co, ci)

    # Equivalent regular-conv weight of the ConvTranspose: swap in/out, flip.
    w_t_eq = jnp.transpose(w_t_pt[:, :, ::-1, ::-1], (1, 0, 2, 3))

    wt_taps = taps(w_t_eq).astype(bf16)                             # (9, ni, 2ni)
    # conv1 acts on cat([ff, x12], dim=1) -> split its weight along Cin.
    wc_taps = jnp.stack([taps(w1[:, :ni]), taps(w1[:, ni:]),
                         taps(w2), taps(w3)], axis=0).astype(bf16)  # (4,9,ni,ni)
    b_stack = jnp.stack([b_t, b1, b2, b3], axis=0)[:, :, None]      # (4, ni, 1)

    raw = dict(w_t_pt=w_t_pt, b_t=b_t, w1=w1, b1=b1, w2=w2, b2=b2, w3=w3, b3=b3)
    return dict(wt_taps=wt_taps, wc_taps=wc_taps, b_stack=b_stack, raw=raw)


def _ref_forward(raw, pe_out, ff, contr):
    """Pure-JAX/XLA reference of the same forward pass (for validation)."""
    dn = ("NCHW", "OIHW", "NCHW")
    hi = jax.lax.Precision.HIGHEST

    def conv(x, w, b, relu=True):
        y = jax.lax.conv_general_dilated(x, w, (1, 1), ((1, 1), (1, 1)),
                                         dimension_numbers=dn, precision=hi)
        y = y + b[None, :, None, None]
        return jnp.maximum(y, 0.0) if relu else y

    if pe_out is not None:
        w_eq = jnp.transpose(raw["w_t_pt"][:, :, ::-1, ::-1], (1, 0, 2, 3))
        x12 = jax.lax.conv_general_dilated(
            pe_out, w_eq, (1, 1), ((1, 2), (1, 2)),
            lhs_dilation=(2, 2), dimension_numbers=dn, precision=hi)
        x12 = x12 + raw["b_t"][None, :, None, None]
    else:
        x12 = ff
    x1 = conv(jnp.concatenate([ff, x12], axis=1), raw["w1"], raw["b1"])
    x1 = conv(x1, raw["w2"], raw["b2"])
    x = contr + x1 + x12
    return conv(x, raw["w3"], raw["b3"])


# ----------------------------------------------------------------------------
if __name__ == "__main__":
    key = jax.random.PRNGKey(0)
    # N=4 lets one grid step fuse B=2 images into the lane axis while still
    # leaving 2 "parallel" grid steps (v7x has 2 TensorCores per chip).
    N, ni, h0, w0 = 4, 4, 8, 8
    H, W = 2 * h0, 2 * w0            # conv-transpose upsamples 8x8 -> 16x16

    k_pe, k_ff, k_ct, k_p = jax.random.split(key, 4)
    pe_out = jax.random.normal(k_pe, (N, 2 * ni, h0, w0), jnp.float32)   # NCHW
    ff = jax.random.normal(k_ff, (N, ni, H, W), jnp.float32)             # NCHW
    contr = jax.random.normal(k_ct, (N, ni, H, W), jnp.float32)          # NCHW
    params = init_params(k_p, ni)

    # Path with pe_out (conv-transpose branch).
    out = jax.block_until_ready(expanding_block_forward(params, pe_out, ff, contr))
    assert out.shape == (N, ni, H, W), out.shape
    ref = _ref_forward(params["raw"], pe_out, ff, contr)
    err = float(jnp.max(jnp.abs(out - ref)))
    # bf16 MXU operands / f32 accumulation across five chained convs.
    assert err < 5e-2, f"pe path mismatch vs XLA reference: max abs err = {err}"

    # Path without pe_out (x1 = x2 = ff).
    out0 = jax.block_until_ready(expanding_block_forward(params, None, ff, contr))
    ref0 = _ref_forward(params["raw"], None, ff, contr)
    err0 = float(jnp.max(jnp.abs(out0 - ref0)))
    assert err0 < 5e-2, f"no-pe path mismatch vs XLA reference: max abs err = {err0}"

    print("KERNEL_OK")
</pallas_src>

<mosaic_0001>
module attributes {stable_mosaic.version = 11 : i64} {
  func.func @_probe_kernel(%arg0: memref<8x128xf32, #tpu.memory_space<vmem>>, %arg1: memref<8x128xf32, #tpu.memory_space<vmem>>) attributes {dimension_semantics = [], scalar_prefetch = 0 : i64, scratch_operands = 0 : i64, tpu.core_type = #tpu.core_type<tc>} {
    %c0 = arith.constant 0 : index
    %c0_0 = arith.constant 0 : index
    %0 = vector.load %arg0[%c0, %c0_0] : memref<8x128xf32, #tpu.memory_space<vmem>>, vector<8x128xf32>
    %c1_i32 = arith.constant 1 : i32
    %1 = tpu.dynamic_rotate %0 by %c1_i32 dim 1 : vector<8x128xf32>, i32 -> vector<8x128xf32>
    %c0_1 = arith.constant 0 : index
    %c0_2 = arith.constant 0 : index
    %2 = vector.load %arg1[%c0_1, %c0_2] : memref<8x128xf32, #tpu.memory_space<vmem>>, vector<8x128xf32>
    tpu.vector_store %arg1[%c0_1, %c0_2], %1 {strides = array<i32>} : memref<8x128xf32, #tpu.memory_space<vmem>>, vector<8x128xf32>,
    return
  }
}

module attributes {stable_mosaic.version = 11 : i64} {
  func.func @_expanding_block_kernel(%arg0: i32, %arg1: memref<9x512xf32, #tpu.memory_space<vmem>>, %arg2: memref<8x512xf32, #tpu.memory_space<vmem>>, %arg3: memref<4x512xf32, #tpu.memory_space<vmem>>, %arg4: memref<4x512xf32, #tpu.memory_space<vmem>>, %arg5: memref<9x4x8xbf16, #tpu.memory_space<vmem>>, %arg6: memref<4x9x4x4xbf16, #tpu.memory_space<vmem>>, %arg7: memref<4x4x1xf32, #tpu.memory_space<vmem>>, %arg8: memref<4x512xf32, #tpu.memory_space<vmem>>) attributes {dimension_semantics = [#tpu.dimension_semantics<parallel>], iteration_bounds = array<i64: 2>, scalar_prefetch = 0 : i64, scratch_operands = 0 : i64, tpu.core_type = #tpu.core_type<tc>, window_params = [{pipeline_mode = #tpu.pipeline_mode<synchronous>, transform_indices = @transform_0, window_bounds = array<i64: 9, 512>}, {transform_indices = @transform_1, window_bounds = array<i64: 8, 512>}, {transform_indices = @transform_2, window_bounds = array<i64: 4, 512>}, {transform_indices = @transform_3, window_bounds = array<i64: 4, 512>}, {pipeline_mode = #tpu.pipeline_mode<synchronous>, transform_indices = @transform_4, window_bounds = array<i64: 9, 4, 8>}, {pipeline_mode = #tpu.pipeline_mode<synchronous>, transform_indices = @transform_5, window_bounds = array<i64: 4, 9, 4, 4>}, {pipeline_mode = #tpu.pipeline_mode<synchronous>, transform_indices = @transform_6, window_bounds = array<i64: 4, 4, 1>}, {transform_indices = @transform_7, window_bounds = array<i64: 4, 512>}]} {
    %c0 = arith.constant 0 : index
    %c0_0 = arith.constant 0 : index
    %0 = vector.load %arg3[%c0, %c0_0] : memref<4x512xf32, #tpu.memory_space<vmem>>, vector<4x512xf32>
    %c0_1 = arith.constant 0 : index
    %c0_2 = arith.constant 0 : index
    %1 = vector.load %arg4[%c0_1, %c0_2] : memref<4x512xf32, #tpu.memory_space<vmem>>, vector<4x512xf32>
    %c0_3 = arith.constant 0 : index
    %c0_4 = arith.constant 0 : index
    %2 = vector.load %arg2[%c0_3, %c0_4] : memref<8x512xf32, #tpu.memory_space<vmem>>, vector<8x512xf32>
    %c0_5 = arith.constant 0 : index
    %c0_6 = arith.constant 0 : index
    %c0_7 = arith.constant 0 : index
    %3 = vector.load %arg7[%c0_5, %c0_6, %c0_7] : memref<4x4x1xf32, #tpu.memory_space<vmem>>, vector<1x4x1xf32>
    %4 = vector.shape_cast %3 : vector<1x4x1xf32> to vector<4x1xf32>
    %c0_8 = arith.constant 0 : index
    %c0_9 = arith.constant 0 : index
    %5 = vector.load %arg1[%c0_8, %c0_9] : memref<9x512xf32, #tpu.memory_space<vmem>>, vector<1x512xf32>
    %6 = vector.extract_strided_slice %2 {offsets = [0, 495], sizes = [8, 17], strides = [1, 1]} : vector<8x512xf32> to vector<8x17xf32>
    %7 = vector.extract_strided_slice %2 {offsets = [0, 0], sizes = [8, 495], strides = [1, 1]} : vector<8x512xf32> to vector<8x495xf32>
    %8 = tpu.concatenate %6, %7 in 1 : vector<8x17xf32>, vector<8x495xf32> -> vector<8x512xf32>
    %9 = vector.broadcast %5 : vector<1x512xf32> to vector<8x512xf32>
    %10 = arith.mulf %8, %9 : vector<8x512xf32>
    %c0_10 = arith.constant 0 : index
    %c0_11 = arith.constant 0 : index
    %c0_12 = arith.constant 0 : index
    %11 = vector.load %arg5[%c0_10, %c0_11, %c0_12] : memref<9x4x8xbf16, #tpu.memory_space<vmem>>, vector<1x4x8xbf16>
    %12 = vector.shape_cast %11 : vector<1x4x8xbf16> to vector<4x8xbf16>
    %13 = arith.truncf %10 : vector<8x512xf32> to vector<8x512xbf16>
    %cst = arith.constant dense<0.000000e+00> : vector<4x512xf32>
    %14 = tpu.matmul %12, %13, %cst {dimension_numbers = #tpu.dot_dimension_numbers<[1], [0], [0], [1], [0, 0, 1, 1], [], []>} : vector<4x8xbf16>, vector<8x512xbf16>, vector<4x512xf32> -> vector<4x512xf32>
    %c1 = arith.constant 1 : index
    %c0_13 = arith.constant 0 : index
    %15 = vector.load %arg1[%c1, %c0_13] : memref<9x512xf32, #tpu.memory_space<vmem>>, vector<1x512xf32>
    %16 = vector.extract_strided_slice %2 {offsets = [0, 496], sizes = [8, 16], strides = [1, 1]} : vector<8x512xf32> to vector<8x16xf32>
    %17 = vector.extract_strided_slice %2 {offsets = [0, 0], sizes = [8, 496], strides = [1, 1]} : vector<8x512xf32> to vector<8x496xf32>
    %18 = tpu.concatenate %16, %17 in 1 : vector<8x16xf32>, vector<8x496xf32> -> vector<8x512xf32>
    %19 = vector.broadcast %15 : vector<1x512xf32> to vector<8x512xf32>
    %20 = arith.mulf %18, %19 : vector<8x512xf32>
    %c1_14 = arith.constant 1 : index
    %c0_15 = arith.constant 0 : index
    %c0_16 = arith.constant 0 : index
    %21 = vector.load %arg5[%c1_14, %c0_15, %c0_16] : memref<9x4x8xbf16, #tpu.memory_space<vmem>>, vector<1x4x8xbf16>
    %22 = vector.shape_cast %21 : vector<1x4x8xbf16> to vector<4x8xbf16>
    %23 = arith.truncf %20 : vector<8x512xf32> to vector<8x512xbf16>
    %cst_17 = arith.constant dense<0.000000e+00> : vector<4x512xf32>
    %24 = tpu.matmul %22, %23, %cst_17 {dimension_numbers = #tpu.dot_dimension_numbers<[1], [0], [0], [1], [0, 0, 1, 1], [], []>} : vector<4x8xbf16>, vector<8x512xbf16>, vector<4x512xf32> -> vector<4x512xf32>
    %25 = arith.addf %14, %24 : vector<4x512xf32>
    %c2 = arith.constant 2 : index
    %c0_18 = arith.constant 0 : index
    %26 = vector.load %arg1[%c2, %c0_18] : memref<9x512xf32, #tpu.memory_space<vmem>>, vector<1x512xf32>
    %27 = vector.extract_strided_slice %2 {offsets = [0, 497], sizes = [8, 15], strides = [1, 1]} : vector<8x512xf32> to vector<8x15xf32>
    %28 = vector.extract_strided_slice %2 {offsets = [0, 0], sizes = [8, 497], strides = [1, 1]} : vector<8x512xf32> to vector<8x497xf32>
    %29 = tpu.concatenate %27, %28 in 1 : vector<8x15xf32>, vector<8x497xf32> -> vector<8x512xf32>
    %30 = vector.broadcast %26 : vector<1x512xf32> to vector<8x512xf32>
    %31 = arith.mulf %29, %30 : vector<8x512xf32>
    %c2_19 = arith.constant 2 : index
    %c0_20 = arith.constant 0 : index
    %c0_21 = arith.constant 0 : index
    %32 = vector.load %arg5[%c2_19, %c0_20, %c0_21] : memref<9x4x8xbf16, #tpu.memory_space<vmem>>, vector<1x4x8xbf16>
    %33 = vector.shape_cast %32 : vector<1x4x8xbf16> to vector<4x8xbf16>
    %34 = arith.truncf %31 : vector<8x512xf32> to vector<8x512xbf16>
    %cst_22 = arith.constant dense<0.000000e+00> : vector<4x512xf32>
    %35 = tpu.matmul %33, %34, %cst_22 {dimension_numbers = #tpu.dot_dimension_numbers<[1], [0], [0], [1], [0, 0, 1, 1], [], []>} : vector<4x8xbf16>, vector<8x512xbf16>, vector<4x512xf32> -> vector<4x512xf32>
    %36 = arith.addf %25, %35 : vector<4x512xf32>
    %c3 = arith.constant 3 : index
    %c0_23 = arith.constant 0 : index
    %37 = vector.load %arg1[%c3, %c0_23] : memref<9x512xf32, #tpu.memory_space<vmem>>, vector<1x512xf32>
    %38 = vector.extract_strided_slice %2 {offsets = [0, 511], sizes = [8, 1], strides = [1, 1]} : vector<8x512xf32> to vector<8x1xf32>
    %39 = vector.extract_strided_slice %2 {offsets = [0, 0], sizes = [8, 511], strides = [1, 1]} : vector<8x512xf32> to vector<8x511xf32>
    %40 = tpu.concatenate %38, %39 in 1 : vector<8x1xf32>, vector<8x511xf32> -> vector<8x512xf32>
    %41 = vector.broadcast %37 : vector<1x512xf32> to vector<8x512xf32>
    %42 = arith.mulf %40, %41 : vector<8x512xf32>
    %c3_24 = arith.constant 3 : index
    %c0_25 = arith.constant 0 : index
    %c0_26 = arith.constant 0 : index
    %43 = vector.load %arg5[%c3_24, %c0_25, %c0_26] : memref<9x4x8xbf16, #tpu.memory_space<vmem>>, vector<1x4x8xbf16>
    %44 = vector.shape_cast %43 : vector<1x4x8xbf16> to vector<4x8xbf16>
    %45 = arith.truncf %42 : vector<8x512xf32> to vector<8x512xbf16>
    %cst_27 = arith.constant dense<0.000000e+00> : vector<4x512xf32>
    %46 = tpu.matmul %44, %45, %cst_27 {dimension_numbers = #tpu.dot_dimension_numbers<[1], [0], [0], [1], [0, 0, 1, 1], [], []>} : vector<4x8xbf16>, vector<8x512xbf16>, vector<4x512xf32> -> vector<4x512xf32>
    %47 = arith.addf %36, %46 : vector<4x512xf32>
    %c4 = arith.constant 4 : index
    %c0_28 = arith.constant 0 : index
    %c0_29 = arith.constant 0 : index
    %48 = vector.load %arg5[%c4, %c0_28, %c0_29] : memref<9x4x8xbf16, #tpu.memory_space<vmem>>, vector<1x4x8xbf16>
    %49 = vector.shape_cast %48 : vector<1x4x8xbf16> to vector<4x8xbf16>
    %50 = arith.truncf %2 : vector<8x512xf32> to vector<8x512xbf16>
    %cst_30 = arith.constant dense<0.000000e+00> : vector<4x512xf32>
    %51 = tpu.matmul %49, %50, %cst_30 {dimension_numbers = #tpu.dot_dimension_numbers<[1], [0], [0], [1], [0, 0, 1, 1], [], []>} : vector<4x8xbf16>, vector<8x512xbf16>, vector<4x512xf32> -> vector<4x512xf32>
    %52 = arith.addf %47, %51 : vector<4x512xf32>
    %c5 = arith.constant 5 : index
    %c0_31 = arith.constant 0 : index
    %53 = vector.load %arg1[%c5, %c0_31] : memref<9x512xf32, #tpu.memory_space<vmem>>, vector<1x512xf32>
    %54 = vector.extract_strided_slice %2 {offsets = [0, 1], sizes = [8, 511], strides = [1, 1]} : vector<8x512xf32> to vector<8x511xf32>
    %55 = vector.extract_strided_slice %2 {offsets = [0, 0], sizes = [8, 1], strides = [1, 1]} : vector<8x512xf32> to vector<8x1xf32>
    %56 = tpu.concatenate %54, %55 in 1 : vector<8x511xf32>, vector<8x1xf32> -> vector<8x512xf32>
    %57 = vector.broadcast %53 : vector<1x512xf32> to vector<8x512xf32>
    %58 = arith.mulf %56, %57 : vector<8x512xf32>
    %c5_32 = arith.constant 5 : index
    %c0_33 = arith.constant 0 : index
    %c0_34 = arith.constant 0 : index
    %59 = vector.load %arg5[%c5_32, %c0_33, %c0_34] : memref<9x4x8xbf16, #tpu.memory_space<vmem>>, vector<1x4x8xbf16>
    %60 = vector.shape_cast %59 : vector<1x4x8xbf16> to vector<4x8xbf16>
    %61 = arith.truncf %58 : vector<8x512xf32> to vector<8x512xbf16>
    %cst_35 = arith.constant dense<0.000000e+00> : vector<4x512xf32>
    %62 = tpu.matmul %60, %61, %cst_35 {dimension_numbers = #tpu.dot_dimension_numbers<[1], [0], [0], [1], [0, 0, 1, 1], [], []>} : vector<4x8xbf16>, vector<8x512xbf16>, vector<4x512xf32> -> vector<4x512xf32>
    %63 = arith.addf %52, %62 : vector<4x512xf32>
    %c6 = arith.constant 6 : index
    %c0_36 = arith.constant 0 : index
    %64 = vector.load %arg1[%c6, %c0_36] : memref<9x512xf32, #tpu.memory_space<vmem>>, vector<1x512xf32>
    %65 = vector.extract_strided_slice %2 {offsets = [0, 15], sizes = [8, 497], strides = [1, 1]} : vector<8x512xf32> to vector<8x497xf32>
    %66 = vector.extract_strided_slice %2 {offsets = [0, 0], sizes = [8, 15], strides = [1, 1]} : vector<8x512xf32> to vector<8x15xf32>
    %67 = tpu.concatenate %65, %66 in 1 : vector<8x497xf32>, vector<8x15xf32> -> vector<8x512xf32>
    %68 = vector.broadcast %64 : vector<1x512xf32> to vector<8x512xf32>
    %69 = arith.mulf %67, %68 : vector<8x512xf32>
    %c6_37 = arith.constant 6 : index
    %c0_38 = arith.constant 0 : index
    %c0_39 = arith.constant 0 : index
    %70 = vector.load %arg5[%c6_37, %c0_38, %c0_39] : memref<9x4x8xbf16, #tpu.memory_space<vmem>>, vector<1x4x8xbf16>
    %71 = vector.shape_cast %70 : vector<1x4x8xbf16> to vector<4x8xbf16>
    %72 = arith.truncf %69 : vector<8x512xf32> to vector<8x512xbf16>
    %cst_40 = arith.constant dense<0.000000e+00> : vector<4x512xf32>
    %73 = tpu.matmul %71, %72, %cst_40 {dimension_numbers = #tpu.dot_dimension_numbers<[1], [0], [0], [1], [0, 0, 1, 1], [], []>} : vector<4x8xbf16>, vector<8x512xbf16>, vector<4x512xf32> -> vector<4x512xf32>
    %74 = arith.addf %63, %73 : vector<4x512xf32>
    %c7 = arith.constant 7 : index
    %c0_41 = arith.constant 0 : index
    %75 = vector.load %arg1[%c7, %c0_41] : memref<9x512xf32, #tpu.memory_space<vmem>>, vector<1x512xf32>
    %76 = vector.extract_strided_slice %2 {offsets = [0, 16], sizes = [8, 496], strides = [1, 1]} : vector<8x512xf32> to vector<8x496xf32>
    %77 = vector.extract_strided_slice %2 {offsets = [0, 0], sizes = [8, 16], strides = [1, 1]} : vector<8x512xf32> to vector<8x16xf32>
    %78 = tpu.concatenate %76, %77 in 1 : vector<8x496xf32>, vector<8x16xf32> -> vector<8x512xf32>
    %79 = vector.broadcast %75 : vector<1x512xf32> to vector<8x512xf32>
    %80 = arith.mulf %78, %79 : vector<8x512xf32>
    %c7_42 = arith.constant 7 : index
    %c0_43 = arith.constant 0 : index
    %c0_44 = arith.constant 0 : index
    %81 = vector.load %arg5[%c7_42, %c0_43, %c0_44] : memref<9x4x8xbf16, #tpu.memory_space<vmem>>, vector<1x4x8xbf16>
    %82 = vector.shape_cast %81 : vector<1x4x8xbf16> to vector<4x8xbf16>
    %83 = arith.truncf %80 : vector<8x512xf32> to vector<8x512xbf16>
    %cst_45 = arith.constant dense<0.000000e+00> : vector<4x512xf32>
    %84 = tpu.matmul %82, %83, %cst_45 {dimension_numbers = #tpu.dot_dimension_numbers<[1], [0], [0], [1], [0, 0, 1, 1], [], []>} : vector<4x8xbf16>, vector<8x512xbf16>, vector<4x512xf32> -> vector<4x512xf32>
    %85 = arith.addf %74, %84 : vector<4x512xf32>
    %c8 = arith.constant 8 : index
    %c0_46 = arith.constant 0 : index
    %86 = vector.load %arg1[%c8, %c0_46] : memref<9x512xf32, #tpu.memory_space<vmem>>, vector<1x512xf32>
    %87 = vector.extract_strided_slice %2 {offsets = [0, 17], sizes = [8, 495], strides = [1, 1]} : vector<8x512xf32> to vector<8x495xf32>
    %88 = vector.extract_strided_slice %2 {offsets = [0, 0], sizes = [8, 17], strides = [1, 1]} : vector<8x512xf32> to vector<8x17xf32>
    %89 = tpu.concatenate %87, %88 in 1 : vector<8x495xf32>, vector<8x17xf32> -> vector<8x512xf32>
    %90 = vector.broadcast %86 : vector<1x512xf32> to vector<8x512xf32>
    %91 = arith.mulf %89, %90 : vector<8x512xf32>
    %c8_47 = arith.constant 8 : index
    %c0_48 = arith.constant 0 : index
    %c0_49 = arith.constant 0 : index
    %92 = vector.load %arg5[%c8_47, %c0_48, %c0_49] : memref<9x4x8xbf16, #tpu.memory_space<vmem>>, vector<1x4x8xbf16>
    %93 = vector.shape_cast %92 : vector<1x4x8xbf16> to vector<4x8xbf16>
    %94 = arith.truncf %91 : vector<8x512xf32> to vector<8x512xbf16>
    %cst_50 = arith.constant dense<0.000000e+00> : vector<4x512xf32>
    %95 = tpu.matmul %93, %94, %cst_50 {dimension_numbers = #tpu.dot_dimension_numbers<[1], [0], [0], [1], [0, 0, 1, 1], [], []>} : vector<4x8xbf16>, vector<8x512xbf16>, vector<4x512xf32> -> vector<4x512xf32>
    %96 = arith.addf %85, %95 : vector<4x512xf32>
    %97 = vector.broadcast %4 : vector<4x1xf32> to vector<4x512xf32>
    %98 = arith.addf %96, %97 : vector<4x512xf32>
    %c1_51 = arith.constant 1 : index
    %c0_52 = arith.constant 0 : index
    %c0_53 = arith.constant 0 : index
    %99 = vector.load %arg7[%c1_51, %c0_52, %c0_53] : memref<4x4x1xf32, #tpu.memory_space<vmem>>, vector<1x4x1xf32>
    %100 = vector.shape_cast %99 : vector<1x4x1xf32> to vector<4x1xf32>
    %c0_54 = arith.constant 0 : index
    %c0_55 = arith.constant 0 : index
    %101 = vector.load %arg1[%c0_54, %c0_55] : memref<9x512xf32, #tpu.memory_space<vmem>>, vector<1x512xf32>
    %102 = vector.extract_strided_slice %0 {offsets = [0, 495], sizes = [4, 17], strides = [1, 1]} : vector<4x512xf32> to vector<4x17xf32>
    %103 = vector.extract_strided_slice %0 {offsets = [0, 0], sizes = [4, 495], strides = [1, 1]} : vector<4x512xf32> to vector<4x495xf32>
    %104 = tpu.concatenate %102, %103 in 1 : vector<4x17xf32>, vector<4x495xf32> -> vector<4x512xf32>
    %105 = vector.broadcast %101 : vector<1x512xf32> to vector<4x512xf32>
    %106 = arith.mulf %104, %105 : vector<4x512xf32>
    %c0_56 = arith.constant 0 : index
    %c0_57 = arith.constant 0 : index
    %c0_58 = arith.constant 0 : index
    %c0_59 = arith.constant 0 : index
    %107 = vector.load %arg6[%c0_56, %c0_57, %c0_58, %c0_59] : memref<4x9x4x4xbf16, #tpu.memory_space<vmem>>, vector<1x1x4x4xbf16>
    %108 = vector.shape_cast %107 : vector<1x1x4x4xbf16> to vector<4x4xbf16>
    %109 = arith.truncf %106 : vector<4x512xf32> to vector<4x512xbf16>
    %cst_60 = arith.constant dense<0.000000e+00> : vector<4x512xf32>
    %110 = tpu.matmul %108, %109, %cst_60 {dimension_numbers = #tpu.dot_dimension_numbers<[1], [0], [0], [1], [0, 0, 1, 1], [], []>} : vector<4x4xbf16>, vector<4x512xbf16>, vector<4x512xf32> -> vector<4x512xf32>
    %111 = vector.extract_strided_slice %98 {offsets = [0, 495], sizes = [4, 17], strides = [1, 1]} : vector<4x512xf32> to vector<4x17xf32>
    %112 = vector.extract_strided_slice %98 {offsets = [0, 0], sizes = [4, 495], strides = [1, 1]} : vector<4x512xf32> to vector<4x495xf32>
    %113 = tpu.concatenate %111, %112 in 1 : vector<4x17xf32>, vector<4x495xf32> -> vector<4x512xf32>
    %114 = vector.broadcast %101 : vector<1x512xf32> to vector<4x512xf32>
    %115 = arith.mulf %113, %114 : vector<4x512xf32>
    %c1_61 = arith.constant 1 : index
    %c0_62 = arith.constant 0 : index
    %c0_63 = arith.constant 0 : index
    %c0_64 = arith.constant 0 : index
    %116 = vector.load %arg6[%c1_61, %c0_62, %c0_63, %c0_64] : memref<4x9x4x4xbf16, #tpu.memory_space<vmem>>, vector<1x1x4x4xbf16>
    %117 = vector.shape_cast %116 : vector<1x1x4x4xbf16> to vector<4x4xbf16>
    %118 = arith.truncf %115 : vector<4x512xf32> to vector<4x512xbf16>
    %cst_65 = arith.constant dense<0.000000e+00> : vector<4x512xf32>
    %119 = tpu.matmul %117, %118, %cst_65 {dimension_numbers = #tpu.dot_dimension_numbers<[1], [0], [0], [1], [0, 0, 1, 1], [], []>} : vector<4x4xbf16>, vector<4x512xbf16>, vector<4x512xf32> -> vector<4x512xf32>
    %120 = arith.addf %110, %119 : vector<4x512xf32>
    %c1_66 = arith.constant 1 : index
    %c0_67 = arith.constant 0 : index
    %121 = vector.load %arg1[%c1_66, %c0_67] : memref<9x512xf32, #tpu.memory_space<vmem>>, vector<1x512xf32>
    %122 = vector.extract_strided_slice %0 {offsets = [0, 496], sizes = [4, 16], strides = [1, 1]} : vector<4x512xf32> to vector<4x16xf32>
    %123 = vector.extract_strided_slice %0 {offsets = [0, 0], sizes = [4, 496], strides = [1, 1]} : vector<4x512xf32> to vector<4x496xf32>
    %124 = tpu.concatenate %122, %123 in 1 : vector<4x16xf32>, vector<4x496xf32> -> vector<4x512xf32>
    %125 = vector.broadcast %121 : vector<1x512xf32> to vector<4x512xf32>
    %126 = arith.mulf %124, %125 : vector<4x512xf32>
    %c0_68 = arith.constant 0 : index
    %c1_69 = arith.constant 1 : index
    %c0_70 = arith.constant 0 : index
    %c0_71 = arith.constant 0 : index
    %127 = vector.load %arg6[%c0_68, %c1_69, %c0_70, %c0_71] : memref<4x9x4x4xbf16, #tpu.memory_space<vmem>>, vector<1x1x4x4xbf16>
    %128 = vector.shape_cast %127 : vector<1x1x4x4xbf16> to vector<4x4xbf16>
    %129 = arith.truncf %126 : vector<4x512xf32> to vector<4x512xbf16>
    %cst_72 = arith.constant dense<0.000000e+00> : vector<4x512xf32>
    %130 = tpu.matmul %128, %129, %cst_72 {dimension_numbers = #tpu.dot_dimension_numbers<[1], [0], [0], [1], [0, 0, 1, 1], [], []>} : vector<4x4xbf16>, vector<4x512xbf16>, vector<4x512xf32> -> vector<4x512xf32>
    %131 = arith.addf %120, %130 : vector<4x512xf32>
    %132 = vector.extract_strided_slice %98 {offsets = [0, 496], sizes = [4, 16], strides = [1, 1]} : vector<4x512xf32> to vector<4x16xf32>
    %133 = vector.extract_strided_slice %98 {offsets = [0, 0], sizes = [4, 496], strides = [1, 1]} : vector<4x512xf32> to vector<4x496xf32>
    %134 = tpu.concatenate %132, %133 in 1 : vector<4x16xf32>, vector<4x496xf32> -> vector<4x512xf32>
    %135 = vector.broadcast %121 : vector<1x512xf32> to vector<4x512xf32>
    %136 = arith.mulf %134, %135 : vector<4x512xf32>
    %c1_73 = arith.constant 1 : index
    %c1_74 = arith.constant 1 : index
    %c0_75 = arith.constant 0 : index
    %c0_76 = arith.constant 0 : index
    %137 = vector.load %arg6[%c1_73, %c1_74, %c0_75, %c0_76] : memref<4x9x4x4xbf16, #tpu.memory_space<vmem>>, vector<1x1x4x4xbf16>
    %138 = vector.shape_cast %137 : vector<1x1x4x4xbf16> to vector<4x4xbf16>
    %139 = arith.truncf %136 : vector<4x512xf32> to vector<4x512xbf16>
    %cst_77 = arith.constant dense<0.000000e+00> : vector<4x512xf32>
    %140 = tpu.matmul %138, %139, %cst_77 {dimension_numbers = #tpu.dot_dimension_numbers<[1], [0], [0], [1], [0, 0, 1, 1], [], []>} : vector<4x4xbf16>, vector<4x512xbf16>, vector<4x512xf32> -> vector<4x512xf32>
    %141 = arith.addf %131, %140 : vector<4x512xf32>
    %c2_78 = arith.constant 2 : index
    %c0_79 = arith.constant 0 : index
    %142 = vector.load %arg1[%c2_78, %c0_79] : memref<9x512xf32, #tpu.memory_space<vmem>>, vector<1x512xf32>
    %143 = vector.extract_strided_slice %0 {offsets = [0, 497], sizes = [4, 15], strides = [1, 1]} : vector<4x512xf32> to vector<4x15xf32>
    %144 = vector.extract_strided_slice %0 {offsets = [0, 0], sizes = [4, 497], strides = [1, 1]} : vector<4x512xf32> to vector<4x497xf32>
    %145 = tpu.concatenate %143, %144 in 1 : vector<4x15xf32>, vector<4x497xf32> -> vector<4x512xf32>
    %146 = vector.broadcast %142 : vector<1x512xf32> to vector<4x512xf32>
    %147 = arith.mulf %145, %146 : vector<4x512xf32>
    %c0_80 = arith.constant 0 : index
    %c2_81 = arith.constant 2 : index
    %c0_82 = arith.constant 0 : index
    %c0_83 = arith.constant 0 : index
    %148 = vector.load %arg6[%c0_80, %c2_81, %c0_82, %c0_83] : memref<4x9x4x4xbf16, #tpu.memory_space<vmem>>, vector<1x1x4x4xbf16>
    %149 = vector.shape_cast %148 : vector<1x1x4x4xbf16> to vector<4x4xbf16>
    %150 = arith.truncf %147 : vector<4x512xf32> to vector<4x512xbf16>
    %cst_84 = arith.constant dense<0.000000e+00> : vector<4x512xf32>
    %151 = tpu.matmul %149, %150, %cst_84 {dimension_numbers = #tpu.dot_dimension_numbers<[1], [0], [0], [1], [0, 0, 1, 1], [], []>} : vector<4x4xbf16>, vector<4x512xbf16>, vector<4x512xf32> -> vector<4x512xf32>
    %152 = arith.addf %141, %151 : vector<4x512xf32>
    %153 = vector.extract_strided_slice %98 {offsets = [0, 497], sizes = [4, 15], strides = [1, 1]} : vector<4x512xf32> to vector<4x15xf32>
    %154 = vector.extract_strided_slice %98 {offsets = [0, 0], sizes = [4, 497], strides = [1, 1]} : vector<4x512xf32> to vector<4x497xf32>
    %155 = tpu.concatenate %153, %154 in 1 : vector<4x15xf32>, vector<4x497xf32> -> vector<4x512xf32>
    %156 = vector.broadcast %142 : vector<1x512xf32> to vector<4x512xf32>
    %157 = arith.mulf %155, %156 : vector<4x512xf32>
    %c1_85 = arith.constant 1 : index
    %c2_86 = arith.constant 2 : index
    %c0_87 = arith.constant 0 : index
    %c0_88 = arith.constant 0 : index
    %158 = vector.load %arg6[%c1_85, %c2_86, %c0_87, %c0_88] : memref<4x9x4x4xbf16, #tpu.memory_space<vmem>>, vector<1x1x4x4xbf16>
    %159 = vector.shape_cast %158 : vector<1x1x4x4xbf16> to vector<4x4xbf16>
    %160 = arith.truncf %157 : vector<4x512xf32> to vector<4x512xbf16>
    %cst_89 = arith.constant dense<0.000000e+00> : vector<4x512xf32>
    %161 = tpu.matmul %159, %160, %cst_89 {dimension_numbers = #tpu.dot_dimension_numbers<[1], [0], [0], [1], [0, 0, 1, 1], [], []>} : vector<4x4xbf16>, vector<4x512xbf16>, vector<4x512xf32> -> vector<4x512xf32>
    %162 = arith.addf %152, %161 : vector<4x512xf32>
    %c3_90 = arith.constant 3 : index
    %c0_91 = arith.constant 0 : index
    %163 = vector.load %arg1[%c3_90, %c0_91] : memref<9x512xf32, #tpu.memory_space<vmem>>, vector<1x512xf32>
    %164 = vector.extract_strided_slice %0 {offsets = [0, 511], sizes = [4, 1], strides = [1, 1]} : vector<4x512xf32> to vector<4x1xf32>
    %165 = vector.extract_strided_slice %0 {offsets = [0, 0], sizes = [4, 511], strides = [1, 1]} : vector<4x512xf32> to vector<4x511xf32>
    %166 = tpu.concatenate %164, %165 in 1 : vector<4x1xf32>, vector<4x511xf32> -> vector<4x512xf32>
    %167 = vector.broadcast %163 : vector<1x512xf32> to vector<4x512xf32>
    %168 = arith.mulf %166, %167 : vector<4x512xf32>
    %c0_92 = arith.constant 0 : index
    %c3_93 = arith.constant 3 : index
    %c0_94 = arith.constant 0 : index
    %c0_95 = arith.constant 0 : index
    %169 = vector.load %arg6[%c0_92, %c3_93, %c0_94, %c0_95] : memref<4x9x4x4xbf16, #tpu.memory_space<vmem>>, vector<1x1x4x4xbf16>
    %170 = vector.shape_cast %169 : vector<1x1x4x4xbf16> to vector<4x4xbf16>
    %171 = arith.truncf %168 : vector<4x512xf32> to vector<4x512xbf16>
    %cst_96 = arith.constant dense<0.000000e+00> : vector<4x512xf32>
    %172 = tpu.matmul %170, %171, %cst_96 {dimension_numbers = #tpu.dot_dimension_numbers<[1], [0], [0], [1], [0, 0, 1, 1], [], []>} : vector<4x4xbf16>, vector<4x512xbf16>, vector<4x512xf32> -> vector<4x512xf32>
    %173 = arith.addf %162, %172 : vector<4x512xf32>
    %174 = vector.extract_strided_slice %98 {offsets = [0, 511], sizes = [4, 1], strides = [1, 1]} : vector<4x512xf32> to vector<4x1xf32>
    %175 = vector.extract_strided_slice %98 {offsets = [0, 0], sizes = [4, 511], strides = [1, 1]} : vector<4x512xf32> to vector<4x511xf32>
    %176 = tpu.concatenate %174, %175 in 1 : vector<4x1xf32>, vector<4x511xf32> -> vector<4x512xf32>
    %177 = vector.broadcast %163 : vector<1x512xf32> to vector<4x512xf32>
    %178 = arith.mulf %176, %177 : vector<4x512xf32>
    %c1_97 = arith.constant 1 : index
    %c3_98 = arith.constant 3 : index
    %c0_99 = arith.constant 0 : index
    %c0_100 = arith.constant 0 : index
    %179 = vector.load %arg6[%c1_97, %c3_98, %c0_99, %c0_100] : memref<4x9x4x4xbf16, #tpu.memory_space<vmem>>, vector<1x1x4x4xbf16>
    %180 = vector.shape_cast %179 : vector<1x1x4x4xbf16> to vector<4x4xbf16>
    %181 = arith.truncf %178 : vector<4x512xf32> to vector<4x512xbf16>
    %cst_101 = arith.constant dense<0.000000e+00> : vector<4x512xf32>
    %182 = tpu.matmul %180, %181, %cst_101 {dimension_numbers = #tpu.dot_dimension_numbers<[1], [0], [0], [1], [0, 0, 1, 1], [], []>} : vector<4x4xbf16>, vector<4x512xbf16>, vector<4x512xf32> -> vector<4x512xf32>
    %183 = arith.addf %173, %182 : vector<4x512xf32>
    %c0_102 = arith.constant 0 : index
    %c4_103 = arith.constant 4 : index
    %c0_104 = arith.constant 0 : index
    %c0_105 = arith.constant 0 : index
    %184 = vector.load %arg6[%c0_102, %c4_103, %c0_104, %c0_105] : memref<4x9x4x4xbf16, #tpu.memory_space<vmem>>, vector<1x1x4x4xbf16>
    %185 = vector.shape_cast %184 : vector<1x1x4x4xbf16> to vector<4x4xbf16>
    %186 = arith.truncf %0 : vector<4x512xf32> to vector<4x512xbf16>
    %cst_106 = arith.constant dense<0.000000e+00> : vector<4x512xf32>
    %187 = tpu.matmul %185, %186, %cst_106 {dimension_numbers = #tpu.dot_dimension_numbers<[1], [0], [0], [1], [0, 0, 1, 1], [], []>} : vector<4x4xbf16>, vector<4x512xbf16>, vector<4x512xf32> -> vector<4x512xf32>
    %188 = arith.addf %183, %187 : vector<4x512xf32>
    %c1_107 = arith.constant 1 : index
    %c4_108 = arith.constant 4 : index
    %c0_109 = arith.constant 0 : index
    %c0_110 = arith.constant 0 : index
    %189 = vector.load %arg6[%c1_107, %c4_108, %c0_109, %c0_110] : memref<4x9x4x4xbf16, #tpu.memory_space<vmem>>, vector<1x1x4x4xbf16>
    %190 = vector.shape_cast %189 : vector<1x1x4x4xbf16> to vector<4x4xbf16>
    %191 = arith.truncf %98 : vector<4x512xf32> to vector<4x512xbf16>
    %cst_111 = arith.constant dense<0.000000e+00> : vector<4x512xf32>
    %192 = tpu.matmul %190, %191, %cst_111 {dimension_numbers = #tpu.dot_dimension_numbers<[1], [0], [0], [1], [0, 0, 1, 1], [], []>} : vector<4x4xbf16>, vector<4x512xbf16>, vector<4x512xf32> -> vector<4x512xf32>
    %193 = arith.addf %188, %192 : vector<4x512xf32>
    %c5_112 = arith.constant 5 : index
    %c0_113 = arith.constant 0 : index
    %194 = vector.load %arg1[%c5_112, %c0_113] : memref<9x512xf32, #tpu.memory_space<vmem>>, vector<1x512xf32>
    %195 = vector.extract_strided_slice %0 {offsets = [0, 1], sizes = [4, 511], strides = [1, 1]} : vector<4x512xf32> to vector<4x511xf32>
    %196 = vector.extract_strided_slice %0 {offsets = [0, 0], sizes = [4, 1], strides = [1, 1]} : vector<4x512xf32> to vector<4x1xf32>
    %197 = tpu.concatenate %195, %196 in 1 : vector<4x511xf32>, vector<4x1xf32> -> vector<4x512xf32>
    %198 = vector.broadcast %194 : vector<1x512xf32> to vector<4x512xf32>
    %199 = arith.mulf %197, %198 : vector<4x512xf32>
    %c0_114 = arith.constant 0 : index
    %c5_115 = arith.constant 5 : index
    %c0_116 = arith.constant 0 : index
    %c0_117 = arith.constant 0 : index
    %200 = vector.load %arg6[%c0_114, %c5_115, %c0_116, %c0_117] : memref<4x9x4x4xbf16, #tpu.memory_space<vmem>>, vector<1x1x4x4xbf16>
    %201 = vector.shape_cast %200 : vector<1x1x4x4xbf16> to vector<4x4xbf16>
    %202 = arith.truncf %199 : vector<4x512xf32> to vector<4x512xbf16>
    %cst_118 = arith.constant dense<0.000000e+00> : vector<4x512xf32>
    %203 = tpu.matmul %201, %202, %cst_118 {dimension_numbers = #tpu.dot_dimension_numbers<[1], [0], [0], [1], [0, 0, 1, 1], [], []>} : vector<4x4xbf16>, vector<4x512xbf16>, vector<4x512xf32> -> vector<4x512xf32>
    %204 = arith.addf %193, %203 : vector<4x512xf32>
    %205 = vector.extract_strided_slice %98 {offsets = [0, 1], sizes = [4, 511], strides = [1, 1]} : vector<4x512xf32> to vector<4x511xf32>
    %206 = vector.extract_strided_slice %98 {offsets = [0, 0], sizes = [4, 1], strides = [1, 1]} : vector<4x512xf32> to vector<4x1xf32>
    %207 = tpu.concatenate %205, %206 in 1 : vector<4x511xf32>, vector<4x1xf32> -> vector<4x512xf32>
    %208 = vector.broadcast %194 : vector<1x512xf32> to vector<4x512xf32>
    %209 = arith.mulf %207, %208 : vector<4x512xf32>
    %c1_119 = arith.constant 1 : index
    %c5_120 = arith.constant 5 : index
    %c0_121 = arith.constant 0 : index
    %c0_122 = arith.constant 0 : index
    %210 = vector.load %arg6[%c1_119, %c5_120, %c0_121, %c0_122] : memref<4x9x4x4xbf16, #tpu.memory_space<vmem>>, vector<1x1x4x4xbf16>
    %211 = vector.shape_cast %210 : vector<1x1x4x4xbf16> to vector<4x4xbf16>
    %212 = arith.truncf %209 : vector<4x512xf32> to vector<4x512xbf16>
    %cst_123 = arith.constant dense<0.000000e+00> : vector<4x512xf32>
    %213 = tpu.matmul %211, %212, %cst_123 {dimension_numbers = #tpu.dot_dimension_numbers<[1], [0], [0], [1], [0, 0, 1, 1], [], []>} : vector<4x4xbf16>, vector<4x512xbf16>, vector<4x512xf32> -> vector<4x512xf32>
    %214 = arith.addf %204, %213 : vector<4x512xf32>
    %c6_124 = arith.constant 6 : index
    %c0_125 = arith.constant 0 : index
    %215 = vector.load %arg1[%c6_124, %c0_125] : memref<9x512xf32, #tpu.memory_space<vmem>>, vector<1x512xf32>
    %216 = vector.extract_strided_slice %0 {offsets = [0, 15], sizes = [4, 497], strides = [1, 1]} : vector<4x512xf32> to vector<4x497xf32>
    %217 = vector.extract_strided_slice %0 {offsets = [0, 0], sizes = [4, 15], strides = [1, 1]} : vector<4x512xf32> to vector<4x15xf32>
    %218 = tpu.concatenate %216, %217 in 1 : vector<4x497xf32>, vector<4x15xf32> -> vector<4x512xf32>
    %219 = vector.broadcast %215 : vector<1x512xf32> to vector<4x512xf32>
    %220 = arith.mulf %218, %219 : vector<4x512xf32>
    %c0_126 = arith.constant 0 : index
    %c6_127 = arith.constant 6 : index
    %c0_128 = arith.constant 0 : index
    %c0_129 = arith.constant 0 : index
    %221 = vector.load %arg6[%c0_126, %c6_127, %c0_128, %c0_129] : memref<4x9x4x4xbf16, #tpu.memory_space<vmem>>, vector<1x1x4x4xbf16>
    %222 = vector.shape_cast %221 : vector<1x1x4x4xbf16> to vector<4x4xbf16>
    %223 = arith.truncf %220 : vector<4x512xf32> to vector<4x512xbf16>
    %cst_130 = arith.constant dense<0.000000e+00> : vector<4x512xf32>
    %224 = tpu.matmul %222, %223, %cst_130 {dimension_numbers = #tpu.dot_dimension_numbers<[1], [0], [0], [1], [0, 0, 1, 1], [], []>} : vector<4x4xbf16>, vector<4x512xbf16>, vector<4x512xf32> -> vector<4x512xf32>
    %225 = arith.addf %214, %224 : vector<4x512xf32>
    %226 = vector.extract_strided_slice %98 {offsets = [0, 15], sizes = [4, 497], strides = [1, 1]} : vector<4x512xf32> to vector<4x497xf32>
    %227 = vector.extract_strided_slice %98 {offsets = [0, 0], sizes = [4, 15], strides = [1, 1]} : vector<4x512xf32> to vector<4x15xf32>
    %228 = tpu.concatenate %226, %227 in 1 : vector<4x497xf32>, vector<4x15xf32> -> vector<4x512xf32>
    %229 = vector.broadcast %215 : vector<1x512xf32> to vector<4x512xf32>
    %230 = arith.mulf %228, %229 : vector<4x512xf32>
    %c1_131 = arith.constant 1 : index
    %c6_132 = arith.constant 6 : index
    %c0_133 = arith.constant 0 : index
    %c0_134 = arith.constant 0 : index
    %231 = vector.load %arg6[%c1_131, %c6_132, %c0_133, %c0_134] : memref<4x9x4x4xbf16, #tpu.memory_space<vmem>>, vector<1x1x4x4xbf16>
    %232 = vector.shape_cast %231 : vector<1x1x4x4xbf16> to vector<4x4xbf16>
    %233 = arith.truncf %230 : vector<4x512xf32> to vector<4x512xbf16>
    %cst_135 = arith.constant dense<0.000000e+00> : vector<4x512xf32>
    %234 = tpu.matmul %232, %233, %cst_135 {dimension_numbers = #tpu.dot_dimension_numbers<[1], [0], [0], [1], [0, 0, 1, 1], [], []>} : vector<4x4xbf16>, vector<4x512xbf16>, vector<4x512xf32> -> vector<4x512xf32>
    %235 = arith.addf %225, %234 : vector<4x512xf32>
    %c7_136 = arith.constant 7 : index
    %c0_137 = arith.constant 0 : index
    %236 = vector.load %arg1[%c7_136, %c0_137] : memref<9x512xf32, #tpu.memory_space<vmem>>, vector<1x512xf32>
    %237 = vector.extract_strided_slice %0 {offsets = [0, 16], sizes = [4, 496], strides = [1, 1]} : vector<4x512xf32> to vector<4x496xf32>
    %238 = vector.extract_strided_slice %0 {offsets = [0, 0], sizes = [4, 16], strides = [1, 1]} : vector<4x512xf32> to vector<4x16xf32>
    %239 = tpu.concatenate %237, %238 in 1 : vector<4x496xf32>, vector<4x16xf32> -> vector<4x512xf32>
    %240 = vector.broadcast %236 : vector<1x512xf32> to vector<4x512xf32>
    %241 = arith.mulf %239, %240 : vector<4x512xf32>
    %c0_138 = arith.constant 0 : index
    %c7_139 = arith.constant 7 : index
    %c0_140 = arith.constant 0 : index
    %c0_141 = arith.constant 0 : index
    %242 = vector.load %arg6[%c0_138, %c7_139, %c0_140, %c0_141] : memref<4x9x4x4xbf16, #tpu.memory_space<vmem>>, vector<1x1x4x4xbf16>
    %243 = vector.shape_cast %242 : vector<1x1x4x4xbf16> to vector<4x4xbf16>
    %244 = arith.truncf %241 : vector<4x512xf32> to vector<4x512xbf16>
    %cst_142 = arith.constant dense<0.000000e+00> : vector<4x512xf32>
    %245 = tpu.matmul %243, %244, %cst_142 {dimension_numbers = #tpu.dot_dimension_numbers<[1], [0], [0], [1], [0, 0, 1, 1], [], []>} : vector<4x4xbf16>, vector<4x512xbf16>, vector<4x512xf32> -> vector<4x512xf32>
    %246 = arith.addf %235, %245 : vector<4x512xf32>
    %247 = vector.extract_strided_slice %98 {offsets = [0, 16], sizes = [4, 496], strides = [1, 1]} : vector<4x512xf32> to vector<4x496xf32>
    %248 = vector.extract_strided_slice %98 {offsets = [0, 0], sizes = [4, 16], strides = [1, 1]} : vector<4x512xf32> to vector<4x16xf32>
    %249 = tpu.concatenate %247, %248 in 1 : vector<4x496xf32>, vector<4x16xf32> -> vector<4x512xf32>
    %250 = vector.broadcast %236 : vector<1x512xf32> to vector<4x512xf32>
    %251 = arith.mulf %249, %250 : vector<4x512xf32>
    %c1_143 = arith.constant 1 : index
    %c7_144 = arith.constant 7 : index
    %c0_145 = arith.constant 0 : index
    %c0_146 = arith.constant 0 : index
    %252 = vector.load %arg6[%c1_143, %c7_144, %c0_145, %c0_146] : memref<4x9x4x4xbf16, #tpu.memory_space<vmem>>, vector<1x1x4x4xbf16>
    %253 = vector.shape_cast %252 : vector<1x1x4x4xbf16> to vector<4x4xbf16>
    %254 = arith.truncf %251 : vector<4x512xf32> to vector<4x512xbf16>
    %cst_147 = arith.constant dense<0.000000e+00> : vector<4x512xf32>
    %255 = tpu.matmul %253, %254, %cst_147 {dimension_numbers = #tpu.dot_dimension_numbers<[1], [0], [0], [1], [0, 0, 1, 1], [], []>} : vector<4x4xbf16>, vector<4x512xbf16>, vector<4x512xf32> -> vector<4x512xf32>
    %256 = arith.addf %246, %255 : vector<4x512xf32>
    %c8_148 = arith.constant 8 : index
    %c0_149 = arith.constant 0 : index
    %257 = vector.load %arg1[%c8_148, %c0_149] : memref<9x512xf32, #tpu.memory_space<vmem>>, vector<1x512xf32>
    %258 = vector.extract_strided_slice %0 {offsets = [0, 17], sizes = [4, 495], strides = [1, 1]} : vector<4x512xf32> to vector<4x495xf32>
    %259 = vector.extract_strided_slice %0 {offsets = [0, 0], sizes = [4, 17], strides = [1, 1]} : vector<4x512xf32> to vector<4x17xf32>
    %260 = tpu.concatenate %258, %259 in 1 : vector<4x495xf32>, vector<4x17xf32> -> vector<4x512xf32>
    %261 = vector.broadcast %257 : vector<1x512xf32> to vector<4x512xf32>
    %262 = arith.mulf %260, %261 : vector<4x512xf32>
    %c0_150 = arith.constant 0 : index
    %c8_151 = arith.constant 8 : index
    %c0_152 = arith.constant 0 : index
    %c0_153 = arith.constant 0 : index
    %263 = vector.load %arg6[%c0_150, %c8_151, %c0_152, %c0_153] : memref<4x9x4x4xbf16, #tpu.memory_space<vmem>>, vector<1x1x4x4xbf16>
    %264 = vector.shape_cast %263 : vector<1x1x4x4xbf16> to vector<4x4xbf16>
    %265 = arith.truncf %262 : vector<4x512xf32> to vector<4x512xbf16>
    %cst_154 = arith.constant dense<0.000000e+00> : vector<4x512xf32>
    %266 = tpu.matmul %264, %265, %cst_154 {dimension_numbers = #tpu.dot_dimension_numbers<[1], [0], [0], [1], [0, 0, 1, 1], [], []>} : vector<4x4xbf16>, vector<4x512xbf16>, vector<4x512xf32> -> vector<4x512xf32>
    %267 = arith.addf %256, %266 : vector<4x512xf32>
    %268 = vector.extract_strided_slice %98 {offsets = [0, 17], sizes = [4, 495], strides = [1, 1]} : vector<4x512xf32> to vector<4x495xf32>
    %269 = vector.extract_strided_slice %98 {offsets = [0, 0], sizes = [4, 17], strides = [1, 1]} : vector<4x512xf32> to vector<4x17xf32>
    %270 = tpu.concatenate %268, %269 in 1 : vector<4x495xf32>, vector<4x17xf32> -> vector<4x512xf32>
    %271 = vector.broadcast %257 : vector<1x512xf32> to vector<4x512xf32>
    %272 = arith.mulf %270, %271 : vector<4x512xf32>
    %c1_155 = arith.constant 1 : index
    %c8_156 = arith.constant 8 : index
    %c0_157 = arith.constant 0 : index
    %c0_158 = arith.constant 0 : index
    %273 = vector.load %arg6[%c1_155, %c8_156, %c0_157, %c0_158] : memref<4x9x4x4xbf16, #tpu.memory_space<vmem>>, vector<1x1x4x4xbf16>
    %274 = vector.shape_cast %273 : vector<1x1x4x4xbf16> to vector<4x4xbf16>
    %275 = arith.truncf %272 : vector<4x512xf32> to vector<4x512xbf16>
    %cst_159 = arith.constant dense<0.000000e+00> : vector<4x512xf32>
    %276 = tpu.matmul %274, %275, %cst_159 {dimension_numbers = #tpu.dot_dimension_numbers<[1], [0], [0], [1], [0, 0, 1, 1], [], []>} : vector<4x4xbf16>, vector<4x512xbf16>, vector<4x512xf32> -> vector<4x512xf32>
    %277 = arith.addf %267, %276 : vector<4x512xf32>
    %278 = vector.broadcast %100 : vector<4x1xf32> to vector<4x512xf32>
    %279 = arith.addf %277, %278 : vector<4x512xf32>
    %cst_160 = arith.constant 0.000000e+00 : f32
    %280 = vector.broadcast %cst_160 : f32 to vector<4x512xf32>
    %281 = arith.maximumf %279, %280 : vector<4x512xf32>
    %c2_161 = arith.constant 2 : index
    %c0_162 = arith.constant 0 : index
    %c0_163 = arith.constant 0 : index
    %282 = vector.load %arg7[%c2_161, %c0_162, %c0_163] : memref<4x4x1xf32, #tpu.memory_space<vmem>>, vector<1x4x1xf32>
    %283 = vector.shape_cast %282 : vector<1x4x1xf32> to vector<4x1xf32>
    %c0_164 = arith.constant 0 : index
    %c0_165 = arith.constant 0 : index
    %284 = vector.load %arg1[%c0_164, %c0_165] : memref<9x512xf32, #tpu.memory_space<vmem>>, vector<1x512xf32>
    %285 = vector.extract_strided_slice %281 {offsets = [0, 495], sizes = [4, 17], strides = [1, 1]} : vector<4x512xf32> to vector<4x17xf32>
    %286 = vector.extract_strided_slice %281 {offsets = [0, 0], sizes = [4, 495], strides = [1, 1]} : vector<4x512xf32> to vector<4x495xf32>
    %287 = tpu.concatenate %285, %286 in 1 : vector<4x17xf32>, vector<4x495xf32> -> vector<4x512xf32>
    %288 = vector.broadcast %284 : vector<1x512xf32> to vector<4x512xf32>
    %289 = arith.mulf %287, %288 : vector<4x512xf32>
    %c2_166 = arith.constant 2 : index
    %c0_167 = arith.constant 0 : index
    %c0_168 = arith.constant 0 : index
    %c0_169 = arith.constant 0 : index
    %290 = vector.load %arg6[%c2_166, %c0_167, %c0_168, %c0_169] : memref<4x9x4x4xbf16, #tpu.memory_space<vmem>>, vector<1x1x4x4xbf16>
    %291 = vector.shape_cast %290 : vector<1x1x4x4xbf16> to vector<4x4xbf16>
    %292 = arith.truncf %289 : vector<4x512xf32> to vector<4x512xbf16>
    %cst_170 = arith.constant dense<0.000000e+00> : vector<4x512xf32>
    %293 = tpu.matmul %291, %292, %cst_170 {dimension_numbers = #tpu.dot_dimension_numbers<[1], [0], [0], [1], [0, 0, 1, 1], [], []>} : vector<4x4xbf16>, vector<4x512xbf16>, vector<4x512xf32> -> vector<4x512xf32>
    %c1_171 = arith.constant 1 : index
    %c0_172 = arith.constant 0 : index
    %294 = vector.load %arg1[%c1_171, %c0_172] : memref<9x512xf32, #tpu.memory_space<vmem>>, vector<1x512xf32>
    %295 = vector.extract_strided_slice %281 {offsets = [0, 496], sizes = [4, 16], strides = [1, 1]} : vector<4x512xf32> to vector<4x16xf32>
    %296 = vector.extract_strided_slice %281 {offsets = [0, 0], sizes = [4, 496], strides = [1, 1]} : vector<4x512xf32> to vector<4x496xf32>
    %297 = tpu.concatenate %295, %296 in 1 : vector<4x16xf32>, vector<4x496xf32> -> vector<4x512xf32>
    %298 = vector.broadcast %294 : vector<1x512xf32> to vector<4x512xf32>
    %299 = arith.mulf %297, %298 : vector<4x512xf32>
    %c2_173 = arith.constant 2 : index
    %c1_174 = arith.constant 1 : index
    %c0_175 = arith.constant 0 : index
    %c0_176 = arith.constant 0 : index
    %300 = vector.load %arg6[%c2_173, %c1_174, %c0_175, %c0_176] : memref<4x9x4x4xbf16, #tpu.memory_space<vmem>>, vector<1x1x4x4xbf16>
    %301 = vector.shape_cast %300 : vector<1x1x4x4xbf16> to vector<4x4xbf16>
    %302 = arith.truncf %299 : vector<4x512xf32> to vector<4x512xbf16>
    %cst_177 = arith.constant dense<0.000000e+00> : vector<4x512xf32>
    %303 = tpu.matmul %301, %302, %cst_177 {dimension_numbers = #tpu.dot_dimension_numbers<[1], [0], [0], [1], [0, 0, 1, 1], [], []>} : vector<4x4xbf16>, vector<4x512xbf16>, vector<4x512xf32> -> vector<4x512xf32>
    %304 = arith.addf %293, %303 : vector<4x512xf32>
    %c2_178 = arith.constant 2 : index
    %c0_179 = arith.constant 0 : index
    %305 = vector.load %arg1[%c2_178, %c0_179] : memref<9x512xf32, #tpu.memory_space<vmem>>, vector<1x512xf32>
    %306 = vector.extract_strided_slice %281 {offsets = [0, 497], sizes = [4, 15], strides = [1, 1]} : vector<4x512xf32> to vector<4x15xf32>
    %307 = vector.extract_strided_slice %281 {offsets = [0, 0], sizes = [4, 497], strides = [1, 1]} : vector<4x512xf32> to vector<4x497xf32>
    %308 = tpu.concatenate %306, %307 in 1 : vector<4x15xf32>, vector<4x497xf32> -> vector<4x512xf32>
    %309 = vector.broadcast %305 : vector<1x512xf32> to vector<4x512xf32>
    %310 = arith.mulf %308, %309 : vector<4x512xf32>
    %c2_180 = arith.constant 2 : index
    %c2_181 = arith.constant 2 : index
    %c0_182 = arith.constant 0 : index
    %c0_183 = arith.constant 0 : index
    %311 = vector.load %arg6[%c2_180, %c2_181, %c0_182, %c0_183] : memref<4x9x4x4xbf16, #tpu.memory_space<vmem>>, vector<1x1x4x4xbf16>
    %312 = vector.shape_cast %311 : vector<1x1x4x4xbf16> to vector<4x4xbf16>
    %313 = arith.truncf %310 : vector<4x512xf32> to vector<4x512xbf16>
    %cst_184 = arith.constant dense<0.000000e+00> : vector<4x512xf32>
    %314 = tpu.matmul %312, %313, %cst_184 {dimension_numbers = #tpu.dot_dimension_numbers<[1], [0], [0], [1], [0, 0, 1, 1], [], []>} : vector<4x4xbf16>, vector<4x512xbf16>, vector<4x512xf32> -> vector<4x512xf32>
    %315 = arith.addf %304, %314 : vector<4x512xf32>
    %c3_185 = arith.constant 3 : index
    %c0_186 = arith.constant 0 : index
    %316 = vector.load %arg1[%c3_185, %c0_186] : memref<9x512xf32, #tpu.memory_space<vmem>>, vector<1x512xf32>
    %317 = vector.extract_strided_slice %281 {offsets = [0, 511], sizes = [4, 1], strides = [1, 1]} : vector<4x512xf32> to vector<4x1xf32>
    %318 = vector.extract_strided_slice %281 {offsets = [0, 0], sizes = [4, 511], strides = [1, 1]} : vector<4x512xf32> to vector<4x511xf32>
    %319 = tpu.concatenate %317, %318 in 1 : vector<4x1xf32>, vector<4x511xf32> -> vector<4x512xf32>
    %320 = vector.broadcast %316 : vector<1x512xf32> to vector<4x512xf32>
    %321 = arith.mulf %319, %320 : vector<4x512xf32>
    %c2_187 = arith.constant 2 : index
    %c3_188 = arith.constant 3 : index
    %c0_189 = arith.constant 0 : index
    %c0_190 = arith.constant 0 : index
    %322 = vector.load %arg6[%c2_187, %c3_188, %c0_189, %c0_190] : memref<4x9x4x4xbf16, #tpu.memory_space<vmem>>, vector<1x1x4x4xbf16>
    %323 = vector.shape_cast %322 : vector<1x1x4x4xbf16> to vector<4x4xbf16>
    %324 = arith.truncf %321 : vector<4x512xf32> to vector<4x512xbf16>
    %cst_191 = arith.constant dense<0.000000e+00> : vector<4x512xf32>
    %325 = tpu.matmul %323, %324, %cst_191 {dimension_numbers = #tpu.dot_dimension_numbers<[1], [0], [0], [1], [0, 0, 1, 1], [], []>} : vector<4x4xbf16>, vector<4x512xbf16>, vector<4x512xf32> -> vector<4x512xf32>
    %326 = arith.addf %315, %325 : vector<4x512xf32>
    %c2_192 = arith.constant 2 : index
    %c4_193 = arith.constant 4 : index
    %c0_194 = arith.constant 0 : index
    %c0_195 = arith.constant 0 : index
    %327 = vector.load %arg6[%c2_192, %c4_193, %c0_194, %c0_195] : memref<4x9x4x4xbf16, #tpu.memory_space<vmem>>, vector<1x1x4x4xbf16>
    %328 = vector.shape_cast %327 : vector<1x1x4x4xbf16> to vector<4x4xbf16>
    %329 = arith.truncf %281 : vector<4x512xf32> to vector<4x512xbf16>
    %cst_196 = arith.constant dense<0.000000e+00> : vector<4x512xf32>
    %330 = tpu.matmul %328, %329, %cst_196 {dimension_numbers = #tpu.dot_dimension_numbers<[1], [0], [0], [1], [0, 0, 1, 1], [], []>} : vector<4x4xbf16>, vector<4x512xbf16>, vector<4x512xf32> -> vector<4x512xf32>
    %331 = arith.addf %326, %330 : vector<4x512xf32>
    %c5_197 = arith.constant 5 : index
    %c0_198 = arith.constant 0 : index
    %332 = vector.load %arg1[%c5_197, %c0_198] : memref<9x512xf32, #tpu.memory_space<vmem>>, vector<1x512xf32>
    %333 = vector.extract_strided_slice %281 {offsets = [0, 1], sizes = [4, 511], strides = [1, 1]} : vector<4x512xf32> to vector<4x511xf32>
    %334 = vector.extract_strided_slice %281 {offsets = [0, 0], sizes = [4, 1], strides = [1, 1]} : vector<4x512xf32> to vector<4x1xf32>
    %335 = tpu.concatenate %333, %334 in 1 : vector<4x511xf32>, vector<4x1xf32> -> vector<4x512xf32>
    %336 = vector.broadcast %332 : vector<1x512xf32> to vector<4x512xf32>
    %337 = arith.mulf %335, %336 : vector<4x512xf32>
    %c2_199 = arith.constant 2 : index
    %c5_200 = arith.constant 5 : index
    %c0_201 = arith.constant 0 : index
    %c0_202 = arith.constant 0 : index
    %338 = vector.load %arg6[%c2_199, %c5_200, %c0_201, %c0_202] : memref<4x9x4x4xbf16, #tpu.memory_space<vmem>>, vector<1x1x4x4xbf16>
    %339 = vector.shape_cast %338 : vector<1x1x4x4xbf16> to vector<4x4xbf16>
    %340 = arith.truncf %337 : vector<4x512xf32> to vector<4x512xbf16>
    %cst_203 = arith.constant dense<0.000000e+00> : vector<4x512xf32>
    %341 = tpu.matmul %339, %340, %cst_203 {dimension_numbers = #tpu.dot_dimension_numbers<[1], [0], [0], [1], [0, 0, 1, 1], [], []>} : vector<4x4xbf16>, vector<4x512xbf16>, vector<4x512xf32> -> vector<4x512xf32>
    %342 = arith.addf %331, %341 : vector<4x512xf32>
    %c6_204 = arith.constant 6 : index
    %c0_205 = arith.constant 0 : index
    %343 = vector.load %arg1[%c6_204, %c0_205] : memref<9x512xf32, #tpu.memory_space<vmem>>, vector<1x512xf32>
    %344 = vector.extract_strided_slice %281 {offsets = [0, 15], sizes = [4, 497], strides = [1, 1]} : vector<4x512xf32> to vector<4x497xf32>
    %345 = vector.extract_strided_slice %281 {offsets = [0, 0], sizes = [4, 15], strides = [1, 1]} : vector<4x512xf32> to vector<4x15xf32>
    %346 = tpu.concatenate %344, %345 in 1 : vector<4x497xf32>, vector<4x15xf32> -> vector<4x512xf32>
    %347 = vector.broadcast %343 : vector<1x512xf32> to vector<4x512xf32>
    %348 = arith.mulf %346, %347 : vector<4x512xf32>
    %c2_206 = arith.constant 2 : index
    %c6_207 = arith.constant 6 : index
    %c0_208 = arith.constant 0 : index
    %c0_209 = arith.constant 0 : index
    %349 = vector.load %arg6[%c2_206, %c6_207, %c0_208, %c0_209] : memref<4x9x4x4xbf16, #tpu.memory_space<vmem>>, vector<1x1x4x4xbf16>
    %350 = vector.shape_cast %349 : vector<1x1x4x4xbf16> to vector<4x4xbf16>
    %351 = arith.truncf %348 : vector<4x512xf32> to vector<4x512xbf16>
    %cst_210 = arith.constant dense<0.000000e+00> : vector<4x512xf32>
    %352 = tpu.matmul %350, %351, %cst_210 {dimension_numbers = #tpu.dot_dimension_numbers<[1], [0], [0], [1], [0, 0, 1, 1], [], []>} : vector<4x4xbf16>, vector<4x512xbf16>, vector<4x512xf32> -> vector<4x512xf32>
    %353 = arith.addf %342, %352 : vector<4x512xf32>
    %c7_211 = arith.constant 7 : index
    %c0_212 = arith.constant 0 : index
    %354 = vector.load %arg1[%c7_211, %c0_212] : memref<9x512xf32, #tpu.memory_space<vmem>>, vector<1x512xf32>
    %355 = vector.extract_strided_slice %281 {offsets = [0, 16], sizes = [4, 496], strides = [1, 1]} : vector<4x512xf32> to vector<4x496xf32>
    %356 = vector.extract_strided_slice %281 {offsets = [0, 0], sizes = [4, 16], strides = [1, 1]} : vector<4x512xf32> to vector<4x16xf32>
    %357 = tpu.concatenate %355, %356 in 1 : vector<4x496xf32>, vector<4x16xf32> -> vector<4x512xf32>
    %358 = vector.broadcast %354 : vector<1x512xf32> to vector<4x512xf32>
    %359 = arith.mulf %357, %358 : vector<4x512xf32>
    %c2_213 = arith.constant 2 : index
    %c7_214 = arith.constant 7 : index
    %c0_215 = arith.constant 0 : index
    %c0_216 = arith.constant 0 : index
    %360 = vector.load %arg6[%c2_213, %c7_214, %c0_215, %c0_216] : memref<4x9x4x4xbf16, #tpu.memory_space<vmem>>, vector<1x1x4x4xbf16>
    %361 = vector.shape_cast %360 : vector<1x1x4x4xbf16> to vector<4x4xbf16>
    %362 = arith.truncf %359 : vector<4x512xf32> to vector<4x512xbf16>
    %cst_217 = arith.constant dense<0.000000e+00> : vector<4x512xf32>
    %363 = tpu.matmul %361, %362, %cst_217 {dimension_numbers = #tpu.dot_dimension_numbers<[1], [0], [0], [1], [0, 0, 1, 1], [], []>} : vector<4x4xbf16>, vector<4x512xbf16>, vector<4x512xf32> -> vector<4x512xf32>
    %364 = arith.addf %353, %363 : vector<4x512xf32>
    %c8_218 = arith.constant 8 : index
    %c0_219 = arith.constant 0 : index
    %365 = vector.load %arg1[%c8_218, %c0_219] : memref<9x512xf32, #tpu.memory_space<vmem>>, vector<1x512xf32>
    %366 = vector.extract_strided_slice %281 {offsets = [0, 17], sizes = [4, 495], strides = [1, 1]} : vector<4x512xf32> to vector<4x495xf32>
    %367 = vector.extract_strided_slice %281 {offsets = [0, 0], sizes = [4, 17], strides = [1, 1]} : vector<4x512xf32> to vector<4x17xf32>
    %368 = tpu.concatenate %366, %367 in 1 : vector<4x495xf32>, vector<4x17xf32> -> vector<4x512xf32>
    %369 = vector.broadcast %365 : vector<1x512xf32> to vector<4x512xf32>
    %370 = arith.mulf %368, %369 : vector<4x512xf32>
    %c2_220 = arith.constant 2 : index
    %c8_221 = arith.constant 8 : index
    %c0_222 = arith.constant 0 : index
    %c0_223 = arith.constant 0 : index
    %371 = vector.load %arg6[%c2_220, %c8_221, %c0_222, %c0_223] : memref<4x9x4x4xbf16, #tpu.memory_space<vmem>>, vector<1x1x4x4xbf16>
    %372 = vector.shape_cast %371 : vector<1x1x4x4xbf16> to vector<4x4xbf16>
    %373 = arith.truncf %370 : vector<4x512xf32> to vector<4x512xbf16>
    %cst_224 = arith.constant dense<0.000000e+00> : vector<4x512xf32>
    %374 = tpu.matmul %372, %373, %cst_224 {dimension_numbers = #tpu.dot_dimension_numbers<[1], [0], [0], [1], [0, 0, 1, 1], [], []>} : vector<4x4xbf16>, vector<4x512xbf16>, vector<4x512xf32> -> vector<4x512xf32>
    %375 = arith.addf %364, %374 : vector<4x512xf32>
    %376 = vector.broadcast %283 : vector<4x1xf32> to vector<4x512xf32>
    %377 = arith.addf %375, %376 : vector<4x512xf32>
    %cst_225 = arith.constant 0.000000e+00 : f32
    %378 = vector.broadcast %cst_225 : f32 to vector<4x512xf32>
    %379 = arith.maximumf %377, %378 : vector<4x512xf32>
    %380 = arith.addf %1, %379 : vector<4x512xf32>
    %381 = arith.addf %380, %98 : vector<4x512xf32>
    %c3_226 = arith.constant 3 : index
    %c0_227 = arith.constant 0 : index
    %c0_228 = arith.constant 0 : index
    %382 = vector.load %arg7[%c3_226, %c0_227, %c0_228] : memref<4x4x1xf32, #tpu.memory_space<vmem>>, vector<1x4x1xf32>
    %383 = vector.shape_cast %382 : vector<1x4x1xf32> to vector<4x1xf32>
    %c0_229 = arith.constant 0 : index
    %c0_230 = arith.constant 0 : index
    %384 = vector.load %arg1[%c0_229, %c0_230] : memref<9x512xf32, #tpu.memory_space<vmem>>, vector<1x512xf32>
    %385 = vector.extract_strided_slice %381 {offsets = [0, 495], sizes = [4, 17], strides = [1, 1]} : vector<4x512xf32> to vector<4x17xf32>
    %386 = vector.extract_strided_slice %381 {offsets = [0, 0], sizes = [4, 495], strides = [1, 1]} : vector<4x512xf32> to vector<4x495xf32>
    %387 = tpu.concatenate %385, %386 in 1 : vector<4x17xf32>, vector<4x495xf32> -> vector<4x512xf32>
    %388 = vector.broadcast %384 : vector<1x512xf32> to vector<4x512xf32>
    %389 = arith.mulf %387, %388 : vector<4x512xf32>
    %c3_231 = arith.constant 3 : index
    %c0_232 = arith.constant 0 : index
    %c0_233 = arith.constant 0 : index
    %c0_234 = arith.constant 0 : index
    %390 = vector.load %arg6[%c3_231, %c0_232, %c0_233, %c0_234] : memref<4x9x4x4xbf16, #tpu.memory_space<vmem>>, vector<1x1x4x4xbf16>
    %391 = vector.shape_cast %390 : vector<1x1x4x4xbf16> to vector<4x4xbf16>
    %392 = arith.truncf %389 : vector<4x512xf32> to vector<4x512xbf16>
    %cst_235 = arith.constant dense<0.000000e+00> : vector<4x512xf32>
    %393 = tpu.matmul %391, %392, %cst_235 {dimension_numbers = #tpu.dot_dimension_numbers<[1], [0], [0], [1], [0, 0, 1, 1], [], []>} : vector<4x4xbf16>, vector<4x512xbf16>, vector<4x512xf32> -> vector<4x512xf32>
    %c1_236 = arith.constant 1 : index
    %c0_237 = arith.constant 0 : index
    %394 = vector.load %arg1[%c1_236, %c0_237] : memref<9x512xf32, #tpu.memory_space<vmem>>, vector<1x512xf32>
    %395 = vector.extract_strided_slice %381 {offsets = [0, 496], sizes = [4, 16], strides = [1, 1]} : vector<4x512xf32> to vector<4x16xf32>
    %396 = vector.extract_strided_slice %381 {offsets = [0, 0], sizes = [4, 496], strides = [1, 1]} : vector<4x512xf32> to vector<4x496xf32>
    %397 = tpu.concatenate %395, %396 in 1 : vector<4x16xf32>, vector<4x496xf32> -> vector<4x512xf32>
    %398 = vector.broadcast %394 : vector<1x512xf32> to vector<4x512xf32>
    %399 = arith.mulf %397, %398 : vector<4x512xf32>
    %c3_238 = arith.constant 3 : index
    %c1_239 = arith.constant 1 : index
    %c0_240 = arith.constant 0 : index
    %c0_241 = arith.constant 0 : index
    %400 = vector.load %arg6[%c3_238, %c1_239, %c0_240, %c0_241] : memref<4x9x4x4xbf16, #tpu.memory_space<vmem>>, vector<1x1x4x4xbf16>
    %401 = vector.shape_cast %400 : vector<1x1x4x4xbf16> to vector<4x4xbf16>
    %402 = arith.truncf %399 : vector<4x512xf32> to vector<4x512xbf16>
    %cst_242 = arith.constant dense<0.000000e+00> : vector<4x512xf32>
    %403 = tpu.matmul %401, %402, %cst_242 {dimension_numbers = #tpu.dot_dimension_numbers<[1], [0], [0], [1], [0, 0, 1, 1], [], []>} : vector<4x4xbf16>, vector<4x512xbf16>, vector<4x512xf32> -> vector<4x512xf32>
    %404 = arith.addf %393, %403 : vector<4x512xf32>
    %c2_243 = arith.constant 2 : index
    %c0_244 = arith.constant 0 : index
    %405 = vector.load %arg1[%c2_243, %c0_244] : memref<9x512xf32, #tpu.memory_space<vmem>>, vector<1x512xf32>
    %406 = vector.extract_strided_slice %381 {offsets = [0, 497], sizes = [4, 15], strides = [1, 1]} : vector<4x512xf32> to vector<4x15xf32>
    %407 = vector.extract_strided_slice %381 {offsets = [0, 0], sizes = [4, 497], strides = [1, 1]} : vector<4x512xf32> to vector<4x497xf32>
    %408 = tpu.concatenate %406, %407 in 1 : vector<4x15xf32>, vector<4x497xf32> -> vector<4x512xf32>
    %409 = vector.broadcast %405 : vector<1x512xf32> to vector<4x512xf32>
    %410 = arith.mulf %408, %409 : vector<4x512xf32>
    %c3_245 = arith.constant 3 : index
    %c2_246 = arith.constant 2 : index
    %c0_247 = arith.constant 0 : index
    %c0_248 = arith.constant 0 : index
    %411 = vector.load %arg6[%c3_245, %c2_246, %c0_247, %c0_248] : memref<4x9x4x4xbf16, #tpu.memory_space<vmem>>, vector<1x1x4x4xbf16>
    %412 = vector.shape_cast %411 : vector<1x1x4x4xbf16> to vector<4x4xbf16>
    %413 = arith.truncf %410 : vector<4x512xf32> to vector<4x512xbf16>
    %cst_249 = arith.constant dense<0.000000e+00> : vector<4x512xf32>
    %414 = tpu.matmul %412, %413, %cst_249 {dimension_numbers = #tpu.dot_dimension_numbers<[1], [0], [0], [1], [0, 0, 1, 1], [], []>} : vector<4x4xbf16>, vector<4x512xbf16>, vector<4x512xf32> -> vector<4x512xf32>
    %415 = arith.addf %404, %414 : vector<4x512xf32>
    %c3_250 = arith.constant 3 : index
    %c0_251 = arith.constant 0 : index
    %416 = vector.load %arg1[%c3_250, %c0_251] : memref<9x512xf32, #tpu.memory_space<vmem>>, vector<1x512xf32>
    %417 = vector.extract_strided_slice %381 {offsets = [0, 511], sizes = [4, 1], strides = [1, 1]} : vector<4x512xf32> to vector<4x1xf32>
    %418 = vector.extract_strided_slice %381 {offsets = [0, 0], sizes = [4, 511], strides = [1, 1]} : vector<4x512xf32> to vector<4x511xf32>
    %419 = tpu.concatenate %417, %418 in 1 : vector<4x1xf32>, vector<4x511xf32> -> vector<4x512xf32>
    %420 = vector.broadcast %416 : vector<1x512xf32> to vector<4x512xf32>
    %421 = arith.mulf %419, %420 : vector<4x512xf32>
    %c3_252 = arith.constant 3 : index
    %c3_253 = arith.constant 3 : index
    %c0_254 = arith.constant 0 : index
    %c0_255 = arith.constant 0 : index
    %422 = vector.load %arg6[%c3_252, %c3_253, %c0_254, %c0_255] : memref<4x9x4x4xbf16, #tpu.memory_space<vmem>>, vector<1x1x4x4xbf16>
    %423 = vector.shape_cast %422 : vector<1x1x4x4xbf16> to vector<4x4xbf16>
    %424 = arith.truncf %421 : vector<4x512xf32> to vector<4x512xbf16>
    %cst_256 = arith.constant dense<0.000000e+00> : vector<4x512xf32>
    %425 = tpu.matmul %423, %424, %cst_256 {dimension_numbers = #tpu.dot_dimension_numbers<[1], [0], [0], [1], [0, 0, 1, 1], [], []>} : vector<4x4xbf16>, vector<4x512xbf16>, vector<4x512xf32> -> vector<4x512xf32>
    %426 = arith.addf %415, %425 : vector<4x512xf32>
    %c3_257 = arith.constant 3 : index
    %c4_258 = arith.constant 4 : index
    %c0_259 = arith.constant 0 : index
    %c0_260 = arith.constant 0 : index
    %427 = vector.load %arg6[%c3_257, %c4_258, %c0_259, %c0_260] : memref<4x9x4x4xbf16, #tpu.memory_space<vmem>>, vector<1x1x4x4xbf16>
    %428 = vector.shape_cast %427 : vector<1x1x4x4xbf16> to vector<4x4xbf16>
    %429 = arith.truncf %381 : vector<4x512xf32> to vector<4x512xbf16>
    %cst_261 = arith.constant dense<0.000000e+00> : vector<4x512xf32>
    %430 = tpu.matmul %428, %429, %cst_261 {dimension_numbers = #tpu.dot_dimension_numbers<[1], [0], [0], [1], [0, 0, 1, 1], [], []>} : vector<4x4xbf16>, vector<4x512xbf16>, vector<4x512xf32> -> vector<4x512xf32>
    %431 = arith.addf %426, %430 : vector<4x512xf32>
    %c5_262 = arith.constant 5 : index
    %c0_263 = arith.constant 0 : index
    %432 = vector.load %arg1[%c5_262, %c0_263] : memref<9x512xf32, #tpu.memory_space<vmem>>, vector<1x512xf32>
    %433 = vector.extract_strided_slice %381 {offsets = [0, 1], sizes = [4, 511], strides = [1, 1]} : vector<4x512xf32> to vector<4x511xf32>
    %434 = vector.extract_strided_slice %381 {offsets = [0, 0], sizes = [4, 1], strides = [1, 1]} : vector<4x512xf32> to vector<4x1xf32>
    %435 = tpu.concatenate %433, %434 in 1 : vector<4x511xf32>, vector<4x1xf32> -> vector<4x512xf32>
    %436 = vector.broadcast %432 : vector<1x512xf32> to vector<4x512xf32>
    %437 = arith.mulf %435, %436 : vector<4x512xf32>
    %c3_264 = arith.constant 3 : index
    %c5_265 = arith.constant 5 : index
    %c0_266 = arith.constant 0 : index
    %c0_267 = arith.constant 0 : index
    %438 = vector.load %arg6[%c3_264, %c5_265, %c0_266, %c0_267] : memref<4x9x4x4xbf16, #tpu.memory_space<vmem>>, vector<1x1x4x4xbf16>
    %439 = vector.shape_cast %438 : vector<1x1x4x4xbf16> to vector<4x4xbf16>
    %440 = arith.truncf %437 : vector<4x512xf32> to vector<4x512xbf16>
    %cst_268 = arith.constant dense<0.000000e+00> : vector<4x512xf32>
    %441 = tpu.matmul %439, %440, %cst_268 {dimension_numbers = #tpu.dot_dimension_numbers<[1], [0], [0], [1], [0, 0, 1, 1], [], []>} : vector<4x4xbf16>, vector<4x512xbf16>, vector<4x512xf32> -> vector<4x512xf32>
    %442 = arith.addf %431, %441 : vector<4x512xf32>
    %c6_269 = arith.constant 6 : index
    %c0_270 = arith.constant 0 : index
    %443 = vector.load %arg1[%c6_269, %c0_270] : memref<9x512xf32, #tpu.memory_space<vmem>>, vector<1x512xf32>
    %444 = vector.extract_strided_slice %381 {offsets = [0, 15], sizes = [4, 497], strides = [1, 1]} : vector<4x512xf32> to vector<4x497xf32>
    %445 = vector.extract_strided_slice %381 {offsets = [0, 0], sizes = [4, 15], strides = [1, 1]} : vector<4x512xf32> to vector<4x15xf32>
    %446 = tpu.concatenate %444, %445 in 1 : vector<4x497xf32>, vector<4x15xf32> -> vector<4x512xf32>
    %447 = vector.broadcast %443 : vector<1x512xf32> to vector<4x512xf32>
    %448 = arith.mulf %446, %447 : vector<4x512xf32>
    %c3_271 = arith.constant 3 : index
    %c6_272 = arith.constant 6 : index
    %c0_273 = arith.constant 0 : index
    %c0_274 = arith.constant 0 : index
    %449 = vector.load %arg6[%c3_271, %c6_272, %c0_273, %c0_274] : memref<4x9x4x4xbf16, #tpu.memory_space<vmem>>, vector<1x1x4x4xbf16>
    %450 = vector.shape_cast %449 : vector<1x1x4x4xbf16> to vector<4x4xbf16>
    %451 = arith.truncf %448 : vector<4x512xf32> to vector<4x512xbf16>
    %cst_275 = arith.constant dense<0.000000e+00> : vector<4x512xf32>
    %452 = tpu.matmul %450, %451, %cst_275 {dimension_numbers = #tpu.dot_dimension_numbers<[1], [0], [0], [1], [0, 0, 1, 1], [], []>} : vector<4x4xbf16>, vector<4x512xbf16>, vector<4x512xf32> -> vector<4x512xf32>
    %453 = arith.addf %442, %452 : vector<4x512xf32>
    %c7_276 = arith.constant 7 : index
    %c0_277 = arith.constant 0 : index
    %454 = vector.load %arg1[%c7_276, %c0_277] : memref<9x512xf32, #tpu.memory_space<vmem>>, vector<1x512xf32>
    %455 = vector.extract_strided_slice %381 {offsets = [0, 16], sizes = [4, 496], strides = [1, 1]} : vector<4x512xf32> to vector<4x496xf32>
    %456 = vector.extract_strided_slice %381 {offsets = [0, 0], sizes = [4, 16], strides = [1, 1]} : vector<4x512xf32> to vector<4x16xf32>
    %457 = tpu.concatenate %455, %456 in 1 : vector<4x496xf32>, vector<4x16xf32> -> vector<4x512xf32>
    %458 = vector.broadcast %454 : vector<1x512xf32> to vector<4x512xf32>
    %459 = arith.mulf %457, %458 : vector<4x512xf32>
    %c3_278 = arith.constant 3 : index
    %c7_279 = arith.constant 7 : index
    %c0_280 = arith.constant 0 : index
    %c0_281 = arith.constant 0 : index
    %460 = vector.load %arg6[%c3_278, %c7_279, %c0_280, %c0_281] : memref<4x9x4x4xbf16, #tpu.memory_space<vmem>>, vector<1x1x4x4xbf16>
    %461 = vector.shape_cast %460 : vector<1x1x4x4xbf16> to vector<4x4xbf16>
    %462 = arith.truncf %459 : vector<4x512xf32> to vector<4x512xbf16>
    %cst_282 = arith.constant dense<0.000000e+00> : vector<4x512xf32>
    %463 = tpu.matmul %461, %462, %cst_282 {dimension_numbers = #tpu.dot_dimension_numbers<[1], [0], [0], [1], [0, 0, 1, 1], [], []>} : vector<4x4xbf16>, vector<4x512xbf16>, vector<4x512xf32> -> vector<4x512xf32>
    %464 = arith.addf %453, %463 : vector<4x512xf32>
    %c8_283 = arith.constant 8 : index
    %c0_284 = arith.constant 0 : index
    %465 = vector.load %arg1[%c8_283, %c0_284] : memref<9x512xf32, #tpu.memory_space<vmem>>, vector<1x512xf32>
    %466 = vector.extract_strided_slice %381 {offsets = [0, 17], sizes = [4, 495], strides = [1, 1]} : vector<4x512xf32> to vector<4x495xf32>
    %467 = vector.extract_strided_slice %381 {offsets = [0, 0], sizes = [4, 17], strides = [1, 1]} : vector<4x512xf32> to vector<4x17xf32>
    %468 = tpu.concatenate %466, %467 in 1 : vector<4x495xf32>, vector<4x17xf32> -> vector<4x512xf32>
    %469 = vector.broadcast %465 : vector<1x512xf32> to vector<4x512xf32>
    %470 = arith.mulf %468, %469 : vector<4x512xf32>
    %c3_285 = arith.constant 3 : index
    %c8_286 = arith.constant 8 : index
    %c0_287 = arith.constant 0 : index
    %c0_288 = arith.constant 0 : index
    %471 = vector.load %arg6[%c3_285, %c8_286, %c0_287, %c0_288] : memref<4x9x4x4xbf16, #tpu.memory_space<vmem>>, vector<1x1x4x4xbf16>
    %472 = vector.shape_cast %471 : vector<1x1x4x4xbf16> to vector<4x4xbf16>
    %473 = arith.truncf %470 : vector<4x512xf32> to vector<4x512xbf16>
    %cst_289 = arith.constant dense<0.000000e+00> : vector<4x512xf32>
    %474 = tpu.matmul %472, %473, %cst_289 {dimension_numbers = #tpu.dot_dimension_numbers<[1], [0], [0], [1], [0, 0, 1, 1], [], []>} : vector<4x4xbf16>, vector<4x512xbf16>, vector<4x512xf32> -> vector<4x512xf32>
    %475 = arith.addf %464, %474 : vector<4x512xf32>
    %476 = vector.broadcast %383 : vector<4x1xf32> to vector<4x512xf32>
    %477 = arith.addf %475, %476 : vector<4x512xf32>
    %cst_290 = arith.constant 0.000000e+00 : f32
    %478 = vector.broadcast %cst_290 : f32 to vector<4x512xf32>
    %479 = arith.maximumf %477, %478 : vector<4x512xf32>
    %c0_291 = arith.constant 0 : index
    %c0_292 = arith.constant 0 : index
    %480 = vector.load %arg8[%c0_291, %c0_292] : memref<4x512xf32, #tpu.memory_space<vmem>>, vector<4x512xf32>
    tpu.vector_store %arg8[%c0_291, %c0_292], %479 {strides = array<i32>} : memref<4x512xf32, #tpu.memory_space<vmem>>, vector<4x512xf32>,
    return
  }
  func.func @transform_0(%arg0: i32) -> (i32, i32) {
    %c0_i32 = arith.constant 0 : i32
    %c0_i32_0 = arith.constant 0 : i32
    %c0_i32_1 = arith.constant 0 : i32
    return %c0_i32, %c0_i32_0 : i32, i32
  }
  func.func @transform_1(%arg0: i32) -> (i32, i32) {
    %c0_i32 = arith.constant 0 : i32
    %c0_i32_0 = arith.constant 0 : i32
    return %c0_i32, %arg0 : i32, i32
  }
  func.func @transform_2(%arg0: i32) -> (i32, i32) {
    %c0_i32 = arith.constant 0 : i32
    %c0_i32_0 = arith.constant 0 : i32
    return %c0_i32, %arg0 : i32, i32
  }
  func.func @transform_3(%arg0: i32) -> (i32, i32) {
    %c0_i32 = arith.constant 0 : i32
    %c0_i32_0 = arith.constant 0 : i32
    return %c0_i32, %arg0 : i32, i32
  }
  func.func @transform_4(%arg0: i32) -> (i32, i32, i32) {
    %c0_i32 = arith.constant 0 : i32
    %c0_i32_0 = arith.constant 0 : i32
    %c0_i32_1 = arith.constant 0 : i32
    %c0_i32_2 = arith.constant 0 : i32
    return %c0_i32, %c0_i32_0, %c0_i32_1 : i32, i32, i32
  }
  func.func @transform_5(%arg0: i32) -> (i32, i32, i32, i32) {
    %c0_i32 = arith.constant 0 : i32
    %c0_i32_0 = arith.constant 0 : i32
    %c0_i32_1 = arith.constant 0 : i32
    %c0_i32_2 = arith.constant 0 : i32
    %c0_i32_3 = arith.constant 0 : i32
    return %c0_i32, %c0_i32_0, %c0_i32_1, %c0_i32_2 : i32, i32, i32, i32
  }
  func.func @transform_6(%arg0: i32) -> (i32, i32, i32) {
    %c0_i32 = arith.constant 0 : i32
    %c0_i32_0 = arith.constant 0 : i32
    %c0_i32_1 = arith.constant 0 : i32
    %c0_i32_2 = arith.constant 0 : i32
    return %c0_i32, %c0_i32_0, %c0_i32_1 : i32, i32, i32
  }
  func.func @transform_7(%arg0: i32) -> (i32, i32) {
    %c0_i32 = arith.constant 0 : i32
    %c0_i32_0 = arith.constant 0 : i32
    return %c0_i32, %arg0 : i32, i32
  }
}

</mosaic_0001>

<bundles_post_ra>
// kernel: tpu_custom_call.1
= control target key start
LH: loop header
LB: loop body
LE: loop exit
PB: predicated region body
PF: predicated region fallthrough
CT: control target
= control target key end

     0   :  { %6 = vsyncpa [#allocation3], 0  ;;  %s106_s0 = inlined_call_operand.hbm [shape: f32[8,128], index: 0, kind: input, shape index: {}]   ;;  %s107_s1 = inlined_call_operand.hbm [shape: f32[8,128], index: 1, kind: output, shape index: {}]  }
   0x1   :  { %7 = vsyncpa [#allocation4], 0  ;;  %s87_s6 = smov [#allocation2]  }
   0x2   :  { %s14_s7 = sshll.u32 %s87_s6, 4  ;;  %s15_s7 = int_to_ptr.vmem [resolvable:$true] %s14_s7 }
   0x3   :  { %s51_s8 = scalar_lea.vmem %s15_s7, 128  ;;  %p56_p1 = scmp.lt.s32.totalorder %s15_s7, %s15_s7 }
   0x4   :  { %p52_p0 = scmp.ne.s32.totalorder %s15_s7, %s51_s8  ;;  %p57_p2 = scmp.lt.s32.totalorder %s51_s8, %s51_s8 }
   0x6   :  { %p58_p3 = por %p57_p2, %p56_p1 }
   0x8   :  { %p59_p4 = pnand %p58_p3, %p52_p0 }
   0xa   :  { %62 = shalt.err (!%p59_p4)
}
   0xb   :  { %17 = dma.hbm_to_vmem [thread:$0]  %s106_s0, 128, %s15_s7, [#allocation3]  }
   0xc   :  { %83 = dma.done.wait [#allocation3], 128  }
   0xd   :  { %84 = vsyncadd [#allocation3], 4294967168  ;;  %v21_v0 = vld [vmem:[#allocation2] sm:$0xff]  ;;  %s88_s11 = smov 1   ;;  %s89_s12 = smov [#allocation5]  }
   0xe   :  { %22 = vrot.lane.b32.xlu0 %v21_v0, %s88_s11  ;;  %s31_s13 = sshll.u32 %s89_s12, 4  ;;  %s32_s13 = int_to_ptr.vmem [resolvable:$true] %s31_s13 }
   0xf   :  { %s63_s14 = scalar_lea.vmem %s32_s13, 128  ;;  %p68_p6 = scmp.lt.s32.totalorder %s32_s13, %s32_s13 }
  0x10   :  { %p64_p5 = scmp.ne.s32.totalorder %s32_s13, %s63_s14  ;;  %p69_p7 = scmp.lt.s32.totalorder %s63_s14, %s63_s14 }
  0x12   :  { %p70_p8 = por %p69_p7, %p68_p6 }
  0x14   :  { %p71_p9 = pnand %p70_p8, %p64_p5 }
  0x80   :  { %v23_v1 = vpop.permute.xlu0 %22 }
  0x81   :  { %24 = vst [vmem:[#allocation5] sm:$0xff] %v23_v1 }
  0x82   :  { %74 = shalt.err (!%p71_p9)
}
  0x83   :  { %34 = dma.vmem_to_hbm [thread:$0]  %s32_s13, 128, %s107_s1, [#allocation4]  }
  0x84   :  { %85 = dma.done.wait [#allocation4], 128  }
  0x85   :  { %86 = vsyncadd [#allocation4], 4294967168 }
  0x86   :  { %38 = vsyncpa [#allocation3], 1 }
  0x87   :  { %39 = vsyncpa [#allocation4], 1 }

// kernel: tpu_custom_call.1
= control target key start
LH: loop header
LB: loop body
LE: loop exit
PB: predicated region body
PF: predicated region fallthrough
CT: control target
= control target key end

     0   :  { %12 = vsyncpa [#allocation3], 0  ;;  %s8390_s0 = inlined_call_operand.vmem [shape: f32[9,512], index: 0, kind: input, shape index: {}]   ;;  %s8391_s1 = inlined_call_operand.vmem [shape: f32[8,1024], index: 1, kind: input, shape index: {}]   ;;  %s8392_s2 = inlined_call_operand.vmem [shape: f32[4,1024], index: 2, kind: input, shape index: {}]   ;;  %s8393_s3 = inlined_call_operand.hbm [shape: f32[4,1024], index: 3, kind: input, shape index: {}]   ;;  %s8394_s4 = inlined_call_operand.vmem [shape: bf16[9,4,8], index: 4, kind: input, shape index: {}]   ;;  %s8395_s5 = inlined_call_operand.vmem [shape: bf16[4,9,4,4], index: 5, kind: input, shape index: {}]   ;;  %s8396_s6 = inlined_call_operand.vmem [shape: f32[4,4,1], index: 6, kind: input, shape index: {}]   ;;  %s8397_s7 = inlined_call_operand.hbm [shape: f32[4,1024], index: 7, kind: output, shape index: {}]  }
   0x1   :  { %14 = vsyncpa [#allocation3 + $0x1], 0 }
   0x2   :  { %15 = vsyncpa [#allocation4], 0 }
   0x3   :  { %17 = vsyncpa [#allocation4 + $0x1], 0  ;;  %s6837_s24 = smov 0   ;;  %s6839_s25 = smov 0  }
   0x4   :  { %s6841_s26 = smov 0   ;;  %s6843_s27 = smov 0  }
   0x5 LB: > { %s6858_s28 = sadd.s32 4294967295, %s6784_s27   ;;  %s6380_s29 = sadd.s32 4294967294, %s6784_s27   ;;  %s6784_s27 = sphi %s6843_s27, %s8563_s27   ;;  %s6780_s26 = sphi %s6841_s26, %s8562_s26   ;;  %s6776_s25 = sphi %s6839_s25, %s8561_s25   ;;  %s6772_s24 = sphi %s6837_s24, %s8560_s24  }
   0x6   : > { %s6862_s30 = sadd.s32 1, %s6784_s27   ;;  %s103_s8 = sadd.s32 1, %s6780_s26 }
   0x7   : > { %s100_s9 = ssub.s32 %s6784_s27, %s6862_s30  ;;  %p110_p0 = scmp.ne.s32.totalorder %s6780_s26, %s6776_s25 }
   0x8   : > { %p101_p1 = scmp.eq.s32.totalorder %s100_s9, 0  ;;  %p111_p2 = scmp.eq.s32.totalorder %s6784_s27, 0 }
   0x9   : > { %p116_p3 = scmp.ne.s32.totalorder %s6776_s25, %s6772_s24  ;;  %p117_p4 = scmp.eq.s32.totalorder %s6858_s28, 0 }
   0xa   : > { %s6874_s10 = scalar_select %p101_p1, %s6780_s26, %s103_s8  }
   0xb   : > { %p6876_p5 = por %p111_p2, %p110_p0  ;;  %p6880_p6 = por %p117_p4, %p116_p3 }
   0xc   : > { %p203_p7 = scmp.eq.s32.totalorder %s6858_s28, 1  ;;  %p209_p8 = scmp.eq.s32.totalorder %s6380_s29, 1 }
   0xd   : > { %s8466_s12 = scalar_select %p6880_p6, 1, 0 }
   0xe   : > { %p6645_p10 = scmp.lt.s32.totalorder %s6784_s27, 2  ;;  %p6887_p11 = por %p203_p7, %p110_p0 }
   0xf   : > { %p6891_p12 = por %p209_p8, %p116_p3  ;;  %s259_s15 = sand.u32 1, %s6780_s26  }
  0x10   : > { %s8467_s13 = scalar_select %p6887_p11, 1, 0 }
  0x11   : > { %s8468_s14 = scalar_select %p6891_p12, 1, 0 }
  0x12   : > { %s6631_s16 = sshll.u32 %s6784_s27, 8  ;;  %s6383_s17 = sshll.u32 %s259_s15, 4 }
  0x13   : > { %s6900_s20 = scalar_lea.hbm %s8393_s3, %s6631_s16  ;;  %s263_s21 = scalar_lea.vmem [#allocation2], %s6383_s17 }
  0x14   : > { %s271_s22 = sshll.u32 %s263_s21, 4  ;;  %p6904_p13 = pnand %p6645_p10, %p6876_p5  ;;  %s6908_s22 = int_to_ptr.vmem [resolvable:$true] %s271_s22 }
  0x15   : > { %s260_s29 = scalar_lea.sflag [#allocation3], %s259_s15  ;;  %s6692_s8 = scalar_lea.hbm %s6900_s20, 256 }
  0x16   : > { %p6693_p2 = scmp.ne.s32.totalorder %s6900_s20, %s6692_s8  ;;  %p6694_p3 = pneg %p6904_p13 }
  0x17   : > { %s6697_s11 = scalar_lea.hbm %s8393_s3, 512  ;;  %p6698_p5 = scmp.lt.s32.totalorder %s6900_s20, %s8393_s3 }
  0x18   : > { %p6695_p4 = pnand %p6694_p3, %p6693_p2  ;;  %p6699_p8 = scmp.lt.s32.totalorder %s6697_s11, %s6692_s8 }
  0x1a   : > { %p6696_p7 = pneg %p6695_p4  ;;  %p6700_p10 = por %p6699_p8, %p6698_p5 }
  0x1c   : > { %p6701_p9 = pnand %p6700_p10, %p6696_p7 }
  0x1e   : > { %6704 = shalt.err (!%p6701_p9)
}
  0x1f   : > { %s6705_s15 = scalar_lea.vmem %s6908_s22, 256  ;;  %s6786_s19 = smov [#allocation2]  }
  0x20   : > { %p6706_p0 = scmp.ne.s32.totalorder %s6908_s22, %s6705_s15  ;;  %s6710_s21 = sshll.u32 %s6786_s19, 4  ;;  %s6711_s21 = int_to_ptr.vmem [resolvable:$false] %s6710_s21 }
  0x21   : > { %s6712_s9 = scalar_lea.vmem %s6711_s21, 512  ;;  %p6713_p4 = scmp.lt.s32.totalorder %s6908_s22, %s6711_s21 }
  0x22   : > { %p6708_p1 = pnand %p6706_p0, %p6694_p3  ;;  %p6714_p12 = scmp.lt.s32.totalorder %s6712_s9, %s6705_s15 }
  0x24   : > { %p6709_p2 = pneg %p6708_p1  ;;  %p6715_p11 = por %p6714_p12, %p6713_p4 }
  0x26   : > { %p6716_p6 = pnand %p6715_p11, %p6709_p2 }
  0x28   : > { %6719 = shalt.err (!%p6716_p6)
}
  0x29   : > { %6640 = dma.hbm_to_vmem [thread:$0]  (!%p6904_p13), %s6900_s20, 256, %s6908_s22, %s260_s29  }
  0x2a   : > { %p8470_p9 = scmp.lt.s32.totalorder %s6784_s27, 3  ;;  %p8471_p7 = scmp.ge.s32.totalorder %s6784_s27, 1 }
  0x2c   : > { %p277_p0 = pnand %p8471_p7, %p8470_p9 }
  0x2e   : > { %280 = sbr.rel (%p277_p0) target bundleno = 1729 (0x6c1), region = 48 }
  0x33   : > { %s6935_s8 = sand.u32 1, %s6776_s25   ;;  %p8472_p6 = scmp.ne.s32.totalorder %s8466_s12, 0 }
  0x34   : > { %s8400_s16 = sshll.u32 %s6935_s8, 4  ;;  %s283_s11 = scalar_lea.sflag [#allocation3], %s6935_s8 }
  0x35   : > { %s6941_s23 = scalar_lea.vmem [#allocation2], %s8400_s16 }
  0x36   : > { %6763 = dma.done.wait (%p8472_p6), %s283_s11, 256  }
  0x37   : > { %6765 = vsyncadd (%p8472_p6), %s283_s11, 4294967040  ;;  %s6389_s20 = sshll.u32 %s6858_s28, 2  ;;  %s6787_s15 = smov 16   ;;  %v8403_v2 = vmov 0   ;;  %v350_v5 = vld [vmem:[%s8396_s6] sm:$0xf]  ;;  %v375_v6 = vlaneseq }
  0x38   : > { %p328_p11 = scmp.lt.s32.totalorder %s6389_s20, 7  ;;  %504 = vmatprep.mubr.bf16.mxu0 %v8403_v2  ;;  %545 = vmatprep.mubr.bf16.mxu1 %v8403_v2  ;;  %s6789_s12 = smov 17   ;;  %v6393_v10 = vld [vmem:[%s8390_s0 + $0x1] ss:$8 sm:$0xf]  ;;  %vm415_vm0 = vcmask 130048  }
  0x39   : > { %6688 = vset.pattern.permute.xlu0 %v8403_v2  ;;  %6689 = vset.pattern.permute.xlu1 %v8403_v2  ;;  %s6790_s19 = smov 15   ;;  %s6791_s21 = smov 1   ;;  %v376_v7 = vshrl.u32 %v375_v6, 7  ;;  %v351_v20 = vld [vmem:[%s8390_s0] ss:$8 sm:$0xf] }
  0x3a   : > { %s8565_s20 = smov (!%p328_p11, %s6389_s20), 7  ;;  %s6792_s9 = smov 127   ;;  %vm365_vm1 = vcmask 138240   ;;  %vm459_vm2 = vcmask 1043456   ;;  %vm455_vm3 = vcmask 64512   ;;  %vm662_vm4 = vcmask 121856  }
  0x3b   : > { %s6390_s22 = sshll.u32 %s8565_s20, 3  ;;  %s6793_s11 = smov 113   ;;  %v7033_v8 = vsub.s32 0, %v376_v7  ;;  %v7035_v9 = vsub.s32 1, %v376_v7  ;;  %v7040_v11 = vsub.s32 3, %v376_v7  ;;  %v7042_v12 = vsub.s32 2, %v376_v7 }
  0x3c   : > { %s331_s18 = scalar_lea.vmem %s8391_s1, %s6390_s22  ;;  %s8401_s22 = smov 112   ;;  %v6394_v44 = vld [vmem:[%s8394_s4 + $0x2] sm:$0x3]  ;;  %vm814_vm5 = vcmask 7168   ;;  %vm1072_vm6 = vcmask 1039360   ;;  %vm1224_vm7 = vcmask 924672  }
  0x3d   : > { %v6954_v0 = vld [vmem:[%s331_s18 + $0x18] sm:$0xff]  ;;  %v6958_v1 = vld [vmem:[%s331_s18 + $0x8] sm:$0xff]  ;;  %v6963_v3 = vld [vmem:[%s331_s18] sm:$0xff]  ;;  %s6795_s29 = smov 111   ;;  %v7045_v15 = vrot.slane %v6393_v10, %v7035_v9  ;;  %v7048_v16 = vrot.slane %v6393_v10, %v7033_v8  ;;  %v7051_v17 = vrot.slane %v6393_v10, %v7040_v11  ;;  %v7054_v18 = vrot.slane %v6393_v10, %v7042_v12  ;;  %s6392_s16 = sshll.u32 %s8565_s20, 2 }
  0x3e   : > { %406 = vrot.lane.b32.xlu0 %v6954_v0, %s6787_s15  ;;  %411 = vrot.lane.b32.xlu1 %v6958_v1, %s6787_s15  ;;  %v6966_v4 = vld [vmem:[%s331_s18 + $0x10] sm:$0xff]  ;;  %v7066_v28 = vrot.slane %v351_v20, %v7033_v8  ;;  %v7074_v39 = vrot.slane %v351_v20, %v7035_v9  ;;  %v7080_v42 = vrot.slane %v351_v20, %v7040_v11  ;;  %vm1376_vm8 = vcmask 916480   ;;  %s337_s18 = scalar_lea.vmem %s8392_s2, %s6392_s16  ;;  %s8498_s20 = smov 112  }
  0x3f   : > { %v7083_v43 = vrot.slane %v351_v20, %v7042_v12  ;;  %v6403_v46 = vld [vmem:[%s8390_s0 + $0x2] ss:$8 sm:$0xf]  ;;  %vm1528_vm9 = vcmask 908288   ;;  %vm1746_vm10 = vcmask 1041408   ;;  %vm1742_vm11 = vcmask 31744  }
  0x40   : > { %v7100_v55 = vrot.slane %v6403_v46, %v7033_v8  ;;  %v7108_v63 = vrot.slane %v6403_v46, %v7035_v9  ;;  %v7114_v7 = vrot.slane %v6403_v46, %v7040_v11  ;;  %v7117_v10 = vrot.slane %v6403_v46, %v7042_v12  ;;  %p8557_p13 = scmp.ne.s32.totalorder %s8467_s13, 0 }
  0x42   : > { %409 = vrot.lane.b32.xlu0 %v6963_v3, %s6787_s15  ;;  %413 = vrot.lane.b32.xlu1 %v6966_v4, %s6787_s15  ;;  %8473 = vst [vmem:[#allocation8_spill] sm:$0xff] %v7117_v10 }
  0x46   : > { %353 = vrot.lane.b32.xlu0 %v6954_v0, %s6789_s12  ;;  %359 = vrot.lane.b32.xlu1 %v6963_v3, %s6789_s12 }
  0x4a   : > { %361 = vrot.lane.b32.xlu0 %v6958_v1, %s6789_s12  ;;  %363 = vrot.lane.b32.xlu1 %v6966_v4, %s6789_s12 }
  0x4e   : > { %653 = vrot.lane.b32.xlu0 %v6954_v0, %s6790_s19  ;;  %656 = vrot.lane.b32.xlu1 %v6963_v3, %s6790_s19 }
  0x52   : > { %658 = vrot.lane.b32.xlu0 %v6958_v1, %s6790_s19  ;;  %660 = vrot.lane.b32.xlu1 %v6966_v4, %s6790_s19 }
  0x56   : > { %805 = vrot.lane.b32.xlu0 %v6954_v0, %s6791_s21  ;;  %808 = vrot.lane.b32.xlu1 %v6963_v3, %s6791_s21 }
  0x5a   : > { %810 = vrot.lane.b32.xlu0 %v6958_v1, %s6791_s21  ;;  %812 = vrot.lane.b32.xlu1 %v6966_v4, %s6791_s21 }
  0x5e   : > { %1064 = vrot.lane.b32.xlu0 %v6963_v3, %s6792_s9  ;;  %1066 = vrot.lane.b32.xlu1 %v6958_v1, %s6792_s9 }
  0x62   : > { %1068 = vrot.lane.b32.xlu0 %v6966_v4, %s6792_s9  ;;  %1070 = vrot.lane.b32.xlu1 %v6954_v0, %s6792_s9 }
  0x66   : > { %1216 = vrot.lane.b32.xlu0 %v6963_v3, %s6793_s11  ;;  %1218 = vrot.lane.b32.xlu1 %v6958_v1, %s6793_s11 }
  0x6a   : > { %1220 = vrot.lane.b32.xlu0 %v6966_v4, %s6793_s11  ;;  %1222 = vrot.lane.b32.xlu1 %v6954_v0, %s6793_s11 }
  0x6e   : > { %1368 = vrot.lane.b32.xlu0 %v6963_v3, %s8401_s22  ;;  %1370 = vrot.lane.b32.xlu1 %v6958_v1, %s8401_s22 }
  0x72   : > { %1372 = vrot.lane.b32.xlu0 %v6966_v4, %s8401_s22  ;;  %1374 = vrot.lane.b32.xlu1 %v6954_v0, %s8401_s22 }
  0x76   : > { %1520 = vrot.lane.b32.xlu0 %v6963_v3, %s6795_s29  ;;  %1522 = vrot.lane.b32.xlu1 %v6958_v1, %s6795_s29 }
  0x7a   : > { %1524 = vrot.lane.b32.xlu0 %v6966_v4, %s6795_s29  ;;  %1526 = vrot.lane.b32.xlu1 %v6954_v0, %s6795_s29 }
  0x7e   : > { %1672 = vperm.xlu0 %6688, %v350_v5  }
  0xb0   : > { %v407_v13 = vpop.permute.xlu0 %406  ;;  %v412_v14 = vpop.permute.xlu1 %411 }
  0xb4   : > { %v410_v19 = vpop.permute.xlu0 %409  ;;  %v414_v21 = vpop.permute.xlu1 %413 }
  0xb5   : > { %v423_v22 = vsel %vm415_vm0, %v407_v13, %v410_v19  ;;  %v416_v23 = vsel %vm415_vm0, %v410_v19, %v412_v14  ;;  %v417_v24 = vsel %vm415_vm0, %v412_v14, %v414_v21  ;;  %v418_v26 = vsel %vm415_vm0, %v414_v21, %v407_v13  ;;  %v399_v13 = vld [vmem:[%s8394_s4] sm:$0x3]  ;;  %v6409_v19 = vld [vmem:[%s8390_s0 + $0x3] ss:$8 sm:$0xf] }
  0xb6   : > { %v446_v25 = vmul.f32 %v7045_v15, %v416_v23  ;;  %v445_v27 = vmul.f32 %v7048_v16, %v423_v22  ;;  %v448_v29 = vmul.f32 %v7051_v17, %v418_v26  ;;  %v447_v30 = vmul.f32 %v7054_v18, %v417_v24 }
  0xb8   : > { %v354_v31 = vpop.permute.xlu0 %353  ;;  %v452_v32 = vpack.c.bf16 %v446_v25, %v446_v25  ;;  %v451_v33 = vpack.c.bf16 %v445_v27, %v445_v27  ;;  %v360_v34 = vpop.permute.xlu1 %359  ;;  %v454_v35 = vpack.c.bf16 %v448_v29, %v448_v29  ;;  %v453_v36 = vpack.c.bf16 %v447_v30, %v447_v30 }
  0xb9   : > { %v373_v37 = vsel %vm365_vm1, %v354_v31, %v360_v34  ;;  %v7134_v29 = vrot.slane %v6409_v19, %v7033_v8 }
  0xba   : > { %6395 = vmatprep.subr.msk.bf16.mxu0 %vm459_vm2, %v452_v32  ;;  %v461_v38 = vsel %vm459_vm2, %v451_v33, 0  ;;  %v395_v40 = vmul.f32 %v7066_v28, %v373_v37  ;;  %6397 = vmatprep.subr.msk.bf16.mxu1 %vm459_vm2, %v454_v35  ;;  %v467_v41 = vsel %vm459_vm2, %v453_v36, 0  ;;  %v7142_v37 = vrot.slane %v6409_v19, %v7035_v9 }
  0xbb   : > { %487 = vmatpush1.bf16.msra.mxu0 %v461_v38  ;;  %528 = vmatpush1.bf16.msra.mxu1 %v467_v41  ;;  %8474 = vst [vmem:[#allocation9_spill] sm:$0xff] %v7134_v29  ;;  %v7148_v41 = vrot.slane %v6409_v19, %v7040_v11 }
  0xbc   : > { %v362_v45 = vpop.permute.xlu0 %361  ;;  %v364_v47 = vpop.permute.xlu1 %363  ;;  %v400_v49 = vpack.c.bf16 %v395_v40, %v395_v40  ;;  %8475 = vst [vmem:[#allocation10_spill] sm:$0xff] %v7142_v37 }
  0xbd   : > { %v366_v48 = vsel %vm365_vm1, %v360_v34, %v362_v45  ;;  %v368_v50 = vsel %vm365_vm1, %v364_v47, %v354_v31  ;;  %v367_v51 = vsel %vm365_vm1, %v362_v45, %v364_v47  ;;  %8476 = vst [vmem:[#allocation11_spill] sm:$0xff] %v7148_v41  ;;  %v6404_v45 = vld [vmem:[%s8394_s4 + $0x4] sm:$0x3] }
  0xbe   : > { %v396_v52 = vmul.f32 %v7074_v39, %v366_v48  ;;  %6396 = vmatmul.mubr.msk.bf16.vlgmr.msra.gmra.mxu0 %vm455_vm3, %v6394_v44  ;;  %v398_v53 = vmul.f32 %v7080_v42, %v368_v50  ;;  %v397_v54 = vmul.f32 %v7083_v43, %v367_v51  ;;  %6398 = vmatmul.mubr.msk.bf16.vlgmr.msra.gmra.mxu1 %vm455_vm3, %v6394_v44  ;;  %v558_v62 = vsel %vm459_vm2, %v400_v49, 0  ;;  %v6420_v49 = vld [vmem:[%s8390_s0 + $0x5] ss:$8 sm:$0xf] }
  0xbf   : > { %601 = vmatprep.mubr.bf16.mxu0 %v8403_v2  ;;  %642 = vmatprep.mubr.bf16.mxu1 %v8403_v2  ;;  %v7151_v44 = vrot.slane %v6409_v19, %v7042_v12 }
  0xc0   : > { %v401_v56 = vpack.c.bf16 %v396_v52, %v396_v52  ;;  %v654_v57 = vpop.permute.xlu0 %653  ;;  %v403_v58 = vpack.c.bf16 %v398_v53, %v398_v53  ;;  %v402_v59 = vpack.c.bf16 %v397_v54, %v397_v54  ;;  %v657_v60 = vpop.permute.xlu1 %656 }
  0xc1   : > { %v670_v61 = vsel %vm662_vm4, %v654_v57, %v657_v60  ;;  %8477 = vst [vmem:[#allocation12_spill] sm:$0xff] %v7151_v44 }
  0xc2   : > { %6399 = vmatprep.subr.msk.bf16.mxu0 %vm459_vm2, %v401_v56  ;;  %v692_v5 = vmul.f32 %v7100_v55, %v670_v61  ;;  %6401 = vmatprep.subr.msk.bf16.mxu1 %vm459_vm2, %v403_v58  ;;  %v564_v6 = vsel %vm459_vm2, %v402_v59, 0  ;;  %v7169_v58 = vrot.slane %v6420_v49, %v7033_v8  ;;  %v957_v61 = vpack.c.bf16 %v6963_v3, %v6963_v3 }
  0xc3   : > { %584 = vmatpush1.bf16.msra.mxu0 %v558_v62  ;;  %625 = vmatpush1.bf16.msra.mxu1 %v564_v6 }
  0xc4   : > { %v659_v14 = vpop.permute.xlu0 %658  ;;  %v661_v20 = vpop.permute.xlu1 %660  ;;  %v698_v22 = vpack.c.bf16 %v692_v5, %v692_v5  ;;  %8478 = vst [vmem:[#allocation13_spill] sm:$0xff] %v7169_v58 }
  0xc5   : > { %v663_v21 = vsel %vm662_vm4, %v657_v60, %v659_v14  ;;  %v665_v23 = vsel %vm662_vm4, %v661_v20, %v654_v57  ;;  %v664_v24 = vsel %vm662_vm4, %v659_v14, %v661_v20  ;;  %v958_v60 = vpack.c.bf16 %v6958_v1, %v6958_v1 }
  0xc6   : > { %v693_v25 = vmul.f32 %v7108_v63, %v663_v21  ;;  %6400 = vmatmul.mubr.msk.bf16.vlgmr.msra.gmra.mxu0 %vm455_vm3, %v399_v13  ;;  %v695_v26 = vmul.f32 %v7114_v7, %v665_v23  ;;  %v694_v27 = vmul.f32 %v7117_v10, %v664_v24  ;;  %6402 = vmatmul.mubr.msk.bf16.vlgmr.msra.gmra.mxu1 %vm455_vm3, %v399_v13  ;;  %v706_v36 = vsel %vm459_vm2, %v698_v22, 0 }
  0xc7   : > { %749 = vmatprep.mubr.bf16.mxu0 %v8403_v2  ;;  %790 = vmatprep.mubr.bf16.mxu1 %v8403_v2  ;;  %v960_v13 = vpack.c.bf16 %v6954_v0, %v6954_v0  ;;  %v959_v14 = vpack.c.bf16 %v6966_v4, %v6966_v4  ;;  %v7184_v1 = vrot.slane %v6420_v49, %v7035_v9  ;;  %v6410_v0 = vld [vmem:[%s8394_s4 + $0x6] sm:$0x3]  ;;  %v965_v24 = vsel %vm459_vm2, %v957_v61, 0 }
  0xc8   : > { %v699_v30 = vpack.c.bf16 %v693_v25, %v693_v25  ;;  %v806_v31 = vpop.permute.xlu0 %805  ;;  %v701_v32 = vpack.c.bf16 %v695_v26, %v695_v26  ;;  %v700_v33 = vpack.c.bf16 %v694_v27, %v694_v27  ;;  %v809_v34 = vpop.permute.xlu1 %808  ;;  %v7192_v4 = vrot.slane %v6420_v49, %v7040_v11 }
  0xc9   : > { %v822_v35 = vsel %vm814_vm5, %v806_v31, %v809_v34  ;;  %8479 = vst [vmem:[#allocation14_spill] sm:$0xff] %v7184_v1  ;;  %v7195_v21 = vrot.slane %v6420_v49, %v7042_v12  ;;  %v971_v27 = vsel %vm459_vm2, %v959_v14, 0 }
  0xca   : > { %6405 = vmatprep.subr.msk.bf16.mxu0 %vm459_vm2, %v699_v30  ;;  %v844_v38 = vmul.f32 %v7134_v29, %v822_v35  ;;  %6407 = vmatprep.subr.msk.bf16.mxu1 %vm459_vm2, %v701_v32  ;;  %v712_v40 = vsel %vm459_vm2, %v700_v33, 0  ;;  %8480 = vst [vmem:[#allocation15_spill] sm:$0xff] %v7192_v4  ;;  %v6426_v30 = vld [vmem:[%s8390_s0 + $0x6] ss:$8 sm:$0xf] }
  0xcb   : > { %732 = vmatpush1.bf16.msra.mxu0 %v706_v36  ;;  %773 = vmatpush1.bf16.msra.mxu1 %v712_v40  ;;  %8481 = vst [vmem:[#allocation16_spill] sm:$0xff] %v7195_v21  ;;  %v7214_v40 = vrot.slane %v6426_v30, %v7033_v8 }
  0xcc   : > { %v811_v46 = vpop.permute.xlu0 %810  ;;  %v813_v47 = vpop.permute.xlu1 %812  ;;  %v850_v50 = vpack.c.bf16 %v844_v38, %v844_v38 }
  0xcd   : > { %v815_v48 = vsel %vm814_vm5, %v809_v34, %v811_v46  ;;  %v817_v51 = vsel %vm814_vm5, %v813_v47, %v806_v31  ;;  %v816_v52 = vsel %vm814_vm5, %v811_v46, %v813_v47  ;;  %8482 = vst [vmem:[#allocation17_spill] sm:$0xff] %v7214_v40 }
  0xce   : > { %v845_v53 = vmul.f32 %v7142_v37, %v815_v48  ;;  %6406 = vmatmul.mubr.msk.bf16.vlgmr.msra.gmra.mxu0 %vm455_vm3, %v6404_v45  ;;  %v847_v54 = vmul.f32 %v7148_v41, %v817_v51  ;;  %v846_v56 = vmul.f32 %v7151_v44, %v816_v52  ;;  %6408 = vmatmul.mubr.msk.bf16.vlgmr.msra.gmra.mxu1 %vm455_vm3, %v6404_v45  ;;  %v858_v19 = vsel %vm459_vm2, %v850_v50, 0  ;;  %v6415_v51 = vld [vmem:[%s8394_s4 + $0x8] sm:$0x3] }
  0xcf   : > { %901 = vmatprep.mubr.bf16.mxu0 %v8403_v2  ;;  %942 = vmatprep.mubr.bf16.mxu1 %v8403_v2  ;;  %v7221_v50 = vrot.slane %v6426_v30, %v7035_v9  ;;  %v7228_v52 = vrot.slane %v6426_v30, %v7040_v11 }
  0xd0   : > { %v851_v57 = vpack.c.bf16 %v845_v53, %v845_v53  ;;  %v1065_v59 = vpop.permute.xlu0 %1064  ;;  %v853_v62 = vpack.c.bf16 %v847_v54, %v847_v54  ;;  %v852_v5 = vpack.c.bf16 %v846_v56, %v846_v56  ;;  %v1067_v6 = vpop.permute.xlu1 %1066  ;;  %v7231_v53 = vrot.slane %v6426_v30, %v7042_v12  ;;  %v6421_v30 = vld [vmem:[%s8394_s4 + $0xa] sm:$0x3] }
  0xd1   : > { %v1073_v20 = vsel %vm1072_vm6, %v1065_v59, %v1067_v6  ;;  %8483 = vst [vmem:[#allocation18_spill] sm:$0xff] %v7221_v50  ;;  %8484 = vst [vmem:[#allocation19_spill] sm:$0xff] %v7228_v52 }
  0xd2   : > { %6411 = vmatprep.subr.msk.bf16.mxu0 %vm459_vm2, %v851_v57  ;;  %6413 = vmatprep.subr.msk.bf16.mxu1 %vm459_vm2, %v853_v62  ;;  %v864_v3 = vsel %vm459_vm2, %v852_v5, 0  ;;  %v1103_v22 = vmul.f32 %v7169_v58, %v1073_v20  ;;  %8485 = vst [vmem:[#allocation20_spill] sm:$0xff] %v7231_v53  ;;  %v6432_v62 = vld [vmem:[%s8390_s0 + $0x7] ss:$8 sm:$0xf] }
  0xd3   : > { %884 = vmatpush1.bf16.msra.mxu0 %v858_v19  ;;  %925 = vmatpush1.bf16.msra.mxu1 %v864_v3 }
  0xd4   : > { %v1069_v23 = vpop.permute.xlu0 %1068  ;;  %6416 = vmatprep.subr.msk.bf16.mxu0 %vm459_vm2, %v958_v60  ;;  %v1071_v25 = vpop.permute.xlu1 %1070  ;;  %6418 = vmatprep.subr.msk.bf16.mxu1 %vm459_vm2, %v960_v13  ;;  %v1109_v36 = vpack.c.bf16 %v1103_v22, %v1103_v22 }
  0xd5   : > { %v1074_v26 = vsel %vm1072_vm6, %v1067_v6, %v1069_v23  ;;  %v1081_v31 = vsel %vm1072_vm6, %v1071_v25, %v1065_v59  ;;  %v1075_v32 = vsel %vm1072_vm6, %v1069_v23, %v1071_v25 }
  0xd6   : > { %6412 = vmatmul.mubr.msk.bf16.vlgmr.msra.gmra.mxu0 %vm455_vm3, %v6410_v0  ;;  %v1104_v33 = vmul.f32 %v7184_v1, %v1074_v26  ;;  %6414 = vmatmul.mubr.msk.bf16.vlgmr.msra.gmra.mxu1 %vm455_vm3, %v6410_v0  ;;  %v1106_v34 = vmul.f32 %v7192_v4, %v1081_v31  ;;  %v1105_v35 = vmul.f32 %v7195_v21, %v1075_v32  ;;  %v1117_v56 = vsel %vm459_vm2, %v1109_v36, 0 }
  0xd7   : > { %991 = vmatpush1.bf16.msra.mxu0 %v965_v24  ;;  %1032 = vmatpush1.bf16.msra.mxu1 %v971_v27  ;;  %v7248_v0 = vrot.slane %v6432_v62, %v7033_v8  ;;  %v7255_v27 = vrot.slane %v6432_v62, %v7035_v9  ;;  %v7262_v31 = vrot.slane %v6432_v62, %v7040_v11 }
  0xd8   : > { %v1110_v38 = vpack.c.bf16 %v1104_v33, %v1104_v33  ;;  %v1217_v45 = vpop.permute.xlu0 %1216  ;;  %1008 = vmatprep.mubr.bf16.mxu0 %v8403_v2  ;;  %v1112_v46 = vpack.c.bf16 %v1106_v34, %v1106_v34  ;;  %v1111_v47 = vpack.c.bf16 %v1105_v35, %v1105_v35  ;;  %v1219_v48 = vpop.permute.xlu1 %1218  ;;  %1049 = vmatprep.mubr.bf16.mxu1 %v8403_v2 }
  0xd9   : > { %v1225_v49 = vsel %vm1224_vm7, %v1217_v45, %v1219_v48  ;;  %8486 = vst [vmem:[#allocation21_spill] sm:$0xff] %v7248_v0  ;;  %8487 = vst [vmem:[#allocation22_spill] sm:$0xff] %v7255_v27  ;;  %v7265_v32 = vrot.slane %v6432_v62, %v7042_v12 }
  0xda   : > { %6422 = vmatprep.subr.msk.bf16.mxu0 %vm459_vm2, %v1110_v38  ;;  %6424 = vmatprep.subr.msk.bf16.mxu1 %vm459_vm2, %v1112_v46  ;;  %v1255_v54 = vmul.f32 %v7214_v40, %v1225_v49  ;;  %v1123_v61 = vsel %vm459_vm2, %v1111_v47, 0  ;;  %8488 = vst [vmem:[#allocation23_spill] sm:$0xff] %v7262_v31  ;;  %v6438_v46 = vld [vmem:[%s8390_s0 + $0x20] ss:$8 sm:$0xf] }
  0xdb   : > { %8489 = vst [vmem:[#allocation24_spill] sm:$0xff] %v7265_v32 }
  0xdc   : > { %v1221_v57 = vpop.permute.xlu0 %1220  ;;  %v1223_v59 = vpop.permute.xlu1 %1222  ;;  %v1261_v20 = vpack.c.bf16 %v1255_v54, %v1255_v54 }
  0xdd   : > { %v1226_v60 = vsel %vm1224_vm7, %v1219_v48, %v1221_v57  ;;  %v1233_v5 = vsel %vm1224_vm7, %v1223_v59, %v1217_v45  ;;  %v1227_v6 = vsel %vm1224_vm7, %v1221_v57, %v1223_v59  ;;  %v7282_v59 = vrot.slane %v6438_v46, %v7033_v8  ;;  %v6427_v8 = vld [vmem:[%s8394_s4 + $0xc] sm:$0x3] }
  0xde   : > { %6417 = vmatmul.mubr.msk.bf16.vlgmr.msra.gmra.mxu0 %vm455_vm3, %v6415_v51  ;;  %v1256_v13 = vmul.f32 %v7221_v50, %v1226_v60  ;;  %6419 = vmatmul.mubr.msk.bf16.vlgmr.msra.gmra.mxu1 %vm455_vm3, %v6415_v51  ;;  %v1258_v14 = vmul.f32 %v7228_v52, %v1233_v5  ;;  %v1257_v19 = vmul.f32 %v7231_v53, %v1227_v6  ;;  %v1269_v34 = vsel %vm459_vm2, %v1261_v20, 0 }
  0xdf   : > { %1143 = vmatpush1.bf16.msra.mxu0 %v1117_v56  ;;  %1184 = vmatpush1.bf16.msra.mxu1 %v1123_v61  ;;  %8490 = vst [vmem:[#allocation25_spill] sm:$0xff] %v7282_v59 }
  0xe0   : > { %v1262_v3 = vpack.c.bf16 %v1256_v13, %v1256_v13  ;;  %v1369_v22 = vpop.permute.xlu0 %1368  ;;  %1160 = vmatprep.mubr.bf16.mxu0 %v8403_v2  ;;  %v1264_v23 = vpack.c.bf16 %v1258_v14, %v1258_v14  ;;  %v1263_v24 = vpack.c.bf16 %v1257_v19, %v1257_v19  ;;  %v1371_v25 = vpop.permute.xlu1 %1370  ;;  %1201 = vmatprep.mubr.bf16.mxu1 %v8403_v2 }
  0xe1   : > { %v1377_v26 = vsel %vm1376_vm8, %v1369_v22, %v1371_v25  ;;  %v7289_v13 = vrot.slane %v6438_v46, %v7035_v9  ;;  %v7296_v14 = vrot.slane %v6438_v46, %v7040_v11  ;;  %v7299_v19 = vrot.slane %v6438_v46, %v7042_v12 }
  0xe2   : > { %6428 = vmatprep.subr.msk.bf16.mxu0 %vm459_vm2, %v1262_v3  ;;  %6430 = vmatprep.subr.msk.bf16.mxu1 %vm459_vm2, %v1264_v23  ;;  %v1407_v33 = vmul.f32 %v7248_v0, %v1377_v26  ;;  %v1275_v45 = vsel %vm459_vm2, %v1263_v24, 0 }
  0xe3   : > { %8491 = vst [vmem:[#allocation26_spill] sm:$0xff] %v7289_v13  ;;  %8492 = vst [vmem:[#allocation27_spill] sm:$0xff] %v7296_v14 }
  0xe4   : > { %v1373_v35 = vpop.permute.xlu0 %1372  ;;  %v1375_v36 = vpop.permute.xlu1 %1374  ;;  %v1413_v56 = vpack.c.bf16 %v1407_v33, %v1407_v33  ;;  %8493 = vst [vmem:[#allocation28_spill] sm:$0xff] %v7299_v19 }
  0xe5   : > { %v1378_v38 = vsel %vm1376_vm8, %v1371_v25, %v1373_v35  ;;  %v1385_v47 = vsel %vm1376_vm8, %v1375_v36, %v1369_v22  ;;  %v1379_v48 = vsel %vm1376_vm8, %v1373_v35, %v1375_v36 }
  0xe6   : > { %6423 = vmatmul.mubr.msk.bf16.vlgmr.msra.gmra.mxu0 %vm455_vm3, %v6421_v30  ;;  %v1408_v49 = vmul.f32 %v7255_v27, %v1378_v38  ;;  %6425 = vmatmul.mubr.msk.bf16.vlgmr.msra.gmra.mxu1 %vm455_vm3, %v6421_v30  ;;  %v1410_v51 = vmul.f32 %v7262_v31, %v1385_v47  ;;  %v1409_v54 = vmul.f32 %v7265_v32, %v1379_v48  ;;  %v1421_v3 = vsel %vm459_vm2, %v1413_v56, 0  ;;  %v6433_v38 = vld [vmem:[%s8394_s4 + $0xe] sm:$0x3]  ;;  %v6439_v47 = vld [vmem:[%s8394_s4 + $0x10] sm:$0x3] }
  0xe7   : > { %1295 = vmatpush1.bf16.msra.mxu0 %v1269_v34  ;;  %1336 = vmatpush1.bf16.msra.mxu1 %v1275_v45 }
  0xe8   : > { %v1414_v57 = vpack.c.bf16 %v1408_v49, %v1408_v49  ;;  %v1521_v60 = vpop.permute.xlu0 %1520  ;;  %1312 = vmatprep.mubr.bf16.mxu0 %v8403_v2  ;;  %v1416_v61 = vpack.c.bf16 %v1410_v51, %v1410_v51  ;;  %v1415_v62 = vpack.c.bf16 %v1409_v54, %v1409_v54  ;;  %v1523_v5 = vpop.permute.xlu1 %1522  ;;  %1353 = vmatprep.mubr.bf16.mxu1 %v8403_v2 }
  0xe9   : > { %v1529_v6 = vsel %vm1528_vm9, %v1521_v60, %v1523_v5 }
  0xea   : > { %6434 = vmatprep.subr.msk.bf16.mxu0 %vm459_vm2, %v1414_v57  ;;  %6436 = vmatprep.subr.msk.bf16.mxu1 %vm459_vm2, %v1416_v61  ;;  %v1559_v20 = vmul.f32 %v7282_v59, %v1529_v6  ;;  %v1427_v24 = vsel %vm459_vm2, %v1415_v62, 0 }
  0xec   : > { %v1525_v22 = vpop.permute.xlu0 %1524  ;;  %v1527_v23 = vpop.permute.xlu1 %1526  ;;  %v1565_v33 = vpack.c.bf16 %v1559_v20, %v1559_v20 }
  0xed   : > { %v1530_v9 = vsel %vm1528_vm9, %v1523_v5, %v1525_v22  ;;  %v1537_v25 = vsel %vm1528_vm9, %v1527_v23, %v1521_v60  ;;  %v1531_v11 = vsel %vm1528_vm9, %v1525_v22, %v1527_v23 }
  0xee   : > { %6429 = vmatmul.mubr.msk.bf16.vlgmr.msra.gmra.mxu0 %vm455_vm3, %v6427_v8  ;;  %v1560_v26 = vmul.f32 %v7289_v13, %v1530_v9  ;;  %6431 = vmatmul.mubr.msk.bf16.vlgmr.msra.gmra.mxu1 %vm455_vm3, %v6427_v8  ;;  %v1562_v12 = vmul.f32 %v7296_v14, %v1537_v25  ;;  %v1561_v30 = vmul.f32 %v7299_v19, %v1531_v11  ;;  %v1573_v45 = vsel %vm459_vm2, %v1565_v33, 0 }
  0xef   : > { %1447 = vmatpush1.bf16.msra.mxu0 %v1421_v3  ;;  %1488 = vmatpush1.bf16.msra.mxu1 %v1427_v24 }
  0xf0   : > { %v1566_v34 = vpack.c.bf16 %v1560_v26, %v1560_v26  ;;  %1464 = vmatprep.mubr.bf16.mxu0 %v8403_v2  ;;  %v1568_v35 = vpack.c.bf16 %v1562_v12, %v1562_v12  ;;  %v1567_v36 = vpack.c.bf16 %v1561_v30, %v1561_v30  ;;  %1505 = vmatprep.mubr.bf16.mxu1 %v8403_v2 }
  0xf2   : > { %6440 = vmatprep.subr.msk.bf16.mxu0 %vm459_vm2, %v1566_v34  ;;  %6442 = vmatprep.subr.msk.bf16.mxu1 %vm459_vm2, %v1568_v35  ;;  %v1579_v46 = vsel %vm459_vm2, %v1567_v36, 0 }
  0xf6   : > { %6435 = vmatmul.mubr.msk.bf16.vlgmr.msra.gmra.mxu0 %vm455_vm3, %v6433_v38  ;;  %6437 = vmatmul.mubr.msk.bf16.vlgmr.msra.gmra.mxu1 %vm455_vm3, %v6433_v38 }
  0xf7   : > { %1599 = vmatpush1.bf16.msra.mxu0 %v1573_v45  ;;  %1640 = vmatpush1.bf16.msra.mxu1 %v1579_v46 }
  0xf8   : > { %1616 = vmatprep.mubr.bf16.mxu0 %v8403_v2  ;;  %1657 = vmatprep.mubr.bf16.mxu1 %v8403_v2 }
  0xfe   : > { %6441 = vmatmul.mubr.msk.bf16.vlgmr.msra.gmra.mxu0 %vm455_vm3, %v6439_v47  ;;  %6443 = vmatmul.mubr.msk.bf16.vlgmr.msra.gmra.mxu1 %vm455_vm3, %v6439_v47 }
  0xff   : > { %1791 = vmatprep.mubr.bf16.mxu0 %v8403_v2  ;;  %1832 = vmatprep.mubr.bf16.mxu1 %v8403_v2 }
 0x17e   : > { %v506_v48 = vpop.f32.mrf.mxu0  ;;  %v547_v49 = vpop.f32.mrf.mxu1 }
 0x180   : > { %v508_v51 = vpop.f32.mrf.mxu0  ;;  %v549_v54 = vpop.f32.mrf.mxu1 }
 0x182   : > { %v510_v56 = vpop.f32.mrf.mxu0  ;;  %v551_v57 = vpop.f32.mrf.mxu1 }
 0x184   : > { %v511_v60 = vpop.f32.mrf.mxu0  ;;  %v552_v61 = vpop.f32.mrf.mxu1 }
 0x186   : > { %v603_v62 = vpop.f32.mrf.mxu0  ;;  %v644_v5 = vpop.f32.mrf.mxu1 }
 0x187   : > { %v645_v31 = vadd.f32 %v644_v5, %v547_v49 }
 0x188   : > { %v605_v6 = vpop.f32.mrf.mxu0  ;;  %v646_v8 = vpop.f32.mrf.mxu1 }
 0x189   : > { %v606_v27 = vadd.f32 %v605_v6, %v508_v51 }
 0x18a   : > { %v607_v20 = vpop.f32.mrf.mxu0  ;;  %v648_v3 = vpop.f32.mrf.mxu1 }
 0x18c   : > { %v608_v22 = vpop.f32.mrf.mxu0  ;;  %v649_v23 = vpop.f32.mrf.mxu1 }
 0x18e   : > { %v751_v9 = vpop.f32.mrf.mxu0  ;;  %v792_v24 = vpop.f32.mrf.mxu1 }
 0x190   : > { %v753_v25 = vpop.f32.mrf.mxu0  ;;  %v794_v11 = vpop.f32.mrf.mxu1 }
 0x191   : > { %v800_v53 = vadd.f32 %v753_v25, %v606_v27 }
 0x192   : > { %v755_v26 = vpop.f32.mrf.mxu0  ;;  %v796_v12 = vpop.f32.mrf.mxu1 }
 0x194   : > { %v756_v30 = vpop.f32.mrf.mxu0  ;;  %v797_v33 = vpop.f32.mrf.mxu1 }
 0x196   : > { %v903_v34 = vpop.f32.mrf.mxu0  ;;  %v944_v35 = vpop.f32.mrf.mxu1 }
 0x198   : > { %v905_v36 = vpop.f32.mrf.mxu0  ;;  %v946_v38 = vpop.f32.mrf.mxu1 }
 0x19a   : > { %v907_v45 = vpop.f32.mrf.mxu0  ;;  %v948_v46 = vpop.f32.mrf.mxu1 }
 0x19c   : > { %v908_v47 = vpop.f32.mrf.mxu0  ;;  %v949_v56 = vpop.f32.mrf.mxu1 }
 0x19d   : > { %v604_v56 = vadd.f32 %v603_v62, %v506_v48 }
 0x19e   : > { %v1010_v57 = vpop.f32.mrf.mxu0  ;;  %v1051_v60 = vpop.f32.mrf.mxu1 }
 0x1a0   : > { %v1012_v61 = vpop.f32.mrf.mxu0  ;;  %v1053_v20 = vpop.f32.mrf.mxu1 }
 0x1a2   : > { %v1014_v3 = vpop.f32.mrf.mxu0  ;;  %v1055_v22 = vpop.f32.mrf.mxu1 }
 0x1a3   : > { %v799_v3 = vadd.f32 %v751_v9, %v604_v56 }
 0x1a4   : > { %v1015_v23 = vpop.f32.mrf.mxu0  ;;  %v1056_v2 = vpop.f32.mrf.mxu1 }
 0x1a5   : > { %v801_v2 = vadd.f32 %v792_v24, %v645_v31  ;;  %v951_v40 = vadd.f32 %v903_v34, %v799_v3 }
 0x1a6   : > { %v1162_v26 = vpop.f32.mrf.mxu0  ;;  %v1203_v12 = vpop.f32.mrf.mxu1 }
 0x1a8   : > { %v1164_v30 = vpop.f32.mrf.mxu0  ;;  %v1205_v33 = vpop.f32.mrf.mxu1 }
 0x1aa   : > { %v1166_v19 = vpop.f32.mrf.mxu0  ;;  %v1207_v59 = vpop.f32.mrf.mxu1 }
 0x1ab   : > { %v647_v19 = vadd.f32 %v646_v8, %v549_v54  ;;  %v953_v59 = vadd.f32 %v944_v35, %v801_v2  ;;  %v1673_v35 = vpop.permute.xlu0 %1672 }
 0x1ac   : > { %v1167_v14 = vpop.f32.mrf.mxu0  ;;  %v1208_v13 = vpop.f32.mrf.mxu1 }
 0x1ad   : > { %v952_v13 = vadd.f32 %v905_v36, %v800_v53  ;;  %v1058_v14 = vadd.f32 %v1010_v57, %v951_v40  ;;  %v802_v48 = vadd.f32 %v794_v11, %v647_v19  ;;  %v1060_v62 = vadd.f32 %v1051_v60, %v953_v59 }
 0x1ae   : > { %v1314_v45 = vpop.f32.mrf.mxu0  ;;  %v1355_v46 = vpop.f32.mrf.mxu1 }
 0x1af   : > { %v1210_v49 = vadd.f32 %v1162_v26, %v1058_v14  ;;  %v954_v6 = vadd.f32 %v946_v38, %v802_v48  ;;  %v1212_v9 = vadd.f32 %v1203_v12, %v1060_v62 }
 0x1b0   : > { %v1316_v47 = vpop.f32.mrf.mxu0  ;;  %v1357_v32 = vpop.f32.mrf.mxu1 }
 0x1b1   : > { %v1362_v27 = vadd.f32 %v1314_v45, %v1210_v49  ;;  %v1061_v54 = vadd.f32 %v1053_v20, %v954_v6  ;;  %v1364_v8 = vadd.f32 %v1355_v46, %v1212_v9 }
 0x1b2   : > { %v1318_v0 = vpop.f32.mrf.mxu0  ;;  %v1359_v22 = vpop.f32.mrf.mxu1 }
 0x1b3   : > { %v1059_v0 = vadd.f32 %v1012_v61, %v952_v13  ;;  %v1213_v11 = vadd.f32 %v1205_v33, %v1061_v54 }
 0x1b4   : > { %v1319_v23 = vpop.f32.mrf.mxu0  ;;  %v1360_v52 = vpop.f32.mrf.mxu1 }
 0x1b5   : > { %v1211_v31 = vadd.f32 %v1164_v30, %v1059_v0  ;;  %v1365_v26 = vadd.f32 %v1357_v32, %v1213_v11  ;;  %v7352_v23 = vld [vmem:[%s337_s18] sm:$0xff] }
 0x1b6   : > { %v1466_v50 = vpop.f32.mrf.mxu0  ;;  %v1507_v21 = vpop.f32.mrf.mxu1  ;;  %v7362_v19 = vcombine.high %v7352_v23, %v7352_v23 }
 0x1b7   : > { %v1363_v25 = vadd.f32 %v1316_v47, %v1211_v31  ;;  %v1514_v53 = vadd.f32 %v1466_v50, %v1362_v27  ;;  %v1516_v36 = vadd.f32 %v1507_v21, %v1364_v8  ;;  %v7338_v50 = vld [vmem:[%s337_s18 + $0x8] sm:$0xff]  ;;  %v6444_v27 = vld [vmem:[%s8396_s6 + $0x4] sm:$0xf] }
 0x1b8   : > { %v1468_v58 = vpop.f32.mrf.mxu0  ;;  %v1509_v51 = vpop.f32.mrf.mxu1  ;;  %v7350_v22 = vcombine.high %v7338_v50, %v7338_v50 }
 0x1b9   : > { %v1515_v38 = vadd.f32 %v1468_v58, %v1363_v25  ;;  %v1517_v47 = vadd.f32 %v1509_v51, %v1365_v26 }
 0x1ba   : > { %v1470_v5 = vpop.f32.mrf.mxu0  ;;  %v1511_v24 = vpop.f32.mrf.mxu1 }
 0x1bc   : > { %v1471_v52 = vpop.f32.mrf.mxu0  ;;  %v1512_v40 = vpop.f32.mrf.mxu1 }
 0x1be   : > { %v1618_v34 = vpop.f32.mrf.mxu0  ;;  %v1659_v60 = vpop.f32.mrf.mxu1 }
 0x1bf   : > { %v1666_v57 = vadd.f32 %v1618_v34, %v1514_v53  ;;  %v1668_v12 = vadd.f32 %v1659_v60, %v1516_v36 }
 0x1c0   : > { %v1620_v61 = vpop.f32.mrf.mxu0  ;;  %v1661_v30 = vpop.f32.mrf.mxu1 }
 0x1c1   : > { %v7336_v20 = vadd.f32 %v1673_v35, %v1666_v57  ;;  %v1667_v45 = vadd.f32 %v1620_v61, %v1515_v38  ;;  %v1669_v21 = vadd.f32 %v1661_v30, %v1517_v47  ;;  %v7344_v33 = vadd.f32 %v1673_v35, %v1668_v12  ;;  %v6445_v61 = vld [vmem:[%s8395_s5 + $0x12] sm:$0x3] }
 0x1c2   : > { %v1622_v46 = vpop.f32.mrf.mxu0  ;;  %v1663_v3 = vpop.f32.mrf.mxu1 }
 0x1c3   : > { %8494 = vst [vmem:[#allocation29_spill] sm:$0xff] %v7336_v20  ;;  %v7340_v56 = vadd.f32 %v1673_v35, %v1667_v45  ;;  %1718 = vrot.lane.b32.xlu1 %v7336_v20, %s6789_s12  ;;  %8496 = vst [vmem:[#allocation31_spill] sm:$0xff] %v7344_v33  ;;  %v7356_v2 = vadd.f32 %v1673_v35, %v1669_v21 }
 0x1c4   : > { %v1623_v58 = vpop.f32.mrf.mxu0  ;;  %v1664_v32 = vpop.f32.mrf.mxu1 }
 0x1c5   : > { %8495 = vst [vmem:[#allocation30_spill] sm:$0xff] %v7340_v56  ;;  %1720 = vrot.lane.b32.xlu0 %v7340_v56, %s6789_s12  ;;  %8497 = vst [vmem:[#allocation32_spill] sm:$0xff] %v7356_v2  ;;  %v8499_v32 = vmov 0  }
 0x1c7   : > { %1722 = vrot.lane.b32.xlu1 %v7344_v33, %s6789_s12 }
 0x1c9   : > { %1683 = vrot.lane.b32.xlu0 %v7350_v22, %s6789_s12 }
 0x1cb   : > { %1712 = vrot.lane.b32.xlu1 %v7356_v2, %s6789_s12 }
 0x1cd   : > { %1690 = vrot.lane.b32.xlu0 %v7362_v19, %s6789_s12 }
 0x1cf   : > { %1688 = vrot.lane.b32.xlu1 %v7352_v23, %s6789_s12 }
 0x1d1   : > { %1938 = vrot.lane.b32.xlu0 %v7350_v22, %s6787_s15 }
 0x1d3   : > { %1692 = vrot.lane.b32.xlu1 %v7338_v50, %s6789_s12 }
 0x1d5   : > { %1943 = vrot.lane.b32.xlu0 %v7362_v19, %s6787_s15 }
 0x1d7   : > { %1941 = vrot.lane.b32.xlu1 %v7352_v23, %s6787_s15 }
 0x1d9   : > { %2066 = vrot.lane.b32.xlu0 %v7356_v2, %s6787_s15 }
 0x1db   : > { %1945 = vrot.lane.b32.xlu1 %v7338_v50, %s6787_s15 }
 0x1dd   : > { %2071 = vrot.lane.b32.xlu0 %v7340_v56, %s6787_s15 }
 0x1df   : > { %2069 = vrot.lane.b32.xlu1 %v7336_v20, %s6787_s15 }
 0x1e1   : > { %2194 = vrot.lane.b32.xlu0 %v7350_v22, %s6790_s19 }
 0x1e3   : > { %2073 = vrot.lane.b32.xlu1 %v7344_v33, %s6787_s15 }
 0x1e5   : > { %2199 = vrot.lane.b32.xlu0 %v7362_v19, %s6790_s19 }
 0x1e7   : > { %2197 = vrot.lane.b32.xlu1 %v7352_v23, %s6790_s19 }
 0x1e9   : > { %2322 = vrot.lane.b32.xlu0 %v7356_v2, %s6790_s19 }
 0x1eb   : > { %2201 = vrot.lane.b32.xlu1 %v7338_v50, %s6790_s19 }
 0x1ed   : > { %2327 = vrot.lane.b32.xlu0 %v7340_v56, %s6790_s19 }
 0x1ef   : > { %2325 = vrot.lane.b32.xlu1 %v7336_v20, %s6790_s19 }
 0x1f1   : > { %2450 = vrot.lane.b32.xlu0 %v7350_v22, %s6791_s21 }
 0x1f3   : > { %2329 = vrot.lane.b32.xlu1 %v7344_v33, %s6790_s19 }
 0x1f5   : > { %2455 = vrot.lane.b32.xlu0 %v7362_v19, %s6791_s21 }
 0x1f7   : > { %2453 = vrot.lane.b32.xlu1 %v7352_v23, %s6791_s21 }
 0x1f9   : > { %2578 = vrot.lane.b32.xlu0 %v7356_v2, %s6791_s21 }
 0x1fb   : > { %2457 = vrot.lane.b32.xlu1 %v7338_v50, %s6791_s21 }
 0x1fd   : > { %2583 = vrot.lane.b32.xlu0 %v7340_v56, %s6791_s21 }
 0x1ff   : > { %2581 = vrot.lane.b32.xlu1 %v7336_v20, %s6791_s21 }
 0x201   : > { %2922 = vrot.lane.b32.xlu0 %v7352_v23, %s6792_s9 }
 0x203   : > { %2585 = vrot.lane.b32.xlu1 %v7344_v33, %s6791_s21 }
 0x205   : > { %2926 = vrot.lane.b32.xlu0 %v7338_v50, %s6792_s9 }
 0x207   : > { %2924 = vrot.lane.b32.xlu1 %v7362_v19, %s6792_s9 }
 0x209   : > { %3050 = vrot.lane.b32.xlu0 %v7336_v20, %s6792_s9 }
 0x20b   : > { %2928 = vrot.lane.b32.xlu1 %v7350_v22, %s6792_s9 }
 0x20d   : > { %3054 = vrot.lane.b32.xlu0 %v7344_v33, %s6792_s9 }
 0x20f   : > { %3052 = vrot.lane.b32.xlu1 %v7340_v56, %s6792_s9 }
 0x211   : > { %3178 = vrot.lane.b32.xlu0 %v7352_v23, %s6793_s11 }
 0x213   : > { %3056 = vrot.lane.b32.xlu1 %v7356_v2, %s6792_s9 }
 0x215   : > { %3182 = vrot.lane.b32.xlu0 %v7338_v50, %s6793_s11 }
 0x217   : > { %3180 = vrot.lane.b32.xlu1 %v7362_v19, %s6793_s11 }
 0x219   : > { %3306 = vrot.lane.b32.xlu0 %v7336_v20, %s6793_s11 }
 0x21b   : > { %3184 = vrot.lane.b32.xlu1 %v7350_v22, %s6793_s11 }
 0x21d   : > { %3310 = vrot.lane.b32.xlu0 %v7344_v33, %s6793_s11 }
 0x21f   : > { %3308 = vrot.lane.b32.xlu1 %v7340_v56, %s6793_s11 }
 0x221   : > { %3434 = vrot.lane.b32.xlu0 %v7352_v23, %s8498_s20 }
 0x223   : > { %3312 = vrot.lane.b32.xlu1 %v7356_v2, %s6793_s11 }
 0x225   : > { %3438 = vrot.lane.b32.xlu0 %v7338_v50, %s8498_s20 }
 0x227   : > { %3436 = vrot.lane.b32.xlu1 %v7362_v19, %s8498_s20 }
 0x229   : > { %3562 = vrot.lane.b32.xlu0 %v7336_v20, %s8498_s20 }
 0x22b   : > { %3440 = vrot.lane.b32.xlu1 %v7350_v22, %s8498_s20 }
 0x22d   : > { %3566 = vrot.lane.b32.xlu0 %v7344_v33, %s8498_s20 }
 0x22f   : > { %3564 = vrot.lane.b32.xlu1 %v7340_v56, %s8498_s20 }
 0x231   : > { %3690 = vrot.lane.b32.xlu0 %v7352_v23, %s6795_s29 }
 0x233   : > { %3568 = vrot.lane.b32.xlu1 %v7356_v2, %s8498_s20 }
 0x235   : > { %v1719_v59 = vpop.permute.xlu1 %1718  ;;  %3694 = vrot.lane.b32.xlu0 %v7338_v50, %s6795_s29 }
 0x237   : > { %v1721_v13 = vpop.permute.xlu0 %1720  ;;  %3692 = vrot.lane.b32.xlu1 %v7362_v19, %s6795_s29 }
 0x238   : > { %v1724_v14 = vsel %vm365_vm1, %v1719_v59, %v1721_v13 }
 0x239   : > { %v1733_v48 = vmul.f32 %v1724_v14, %v7074_v39  ;;  %v1723_v62 = vpop.permute.xlu1 %1722  ;;  %3818 = vrot.lane.b32.xlu0 %v7336_v20, %s6795_s29 }
 0x23a   : > { %v1725_v0 = vsel %vm365_vm1, %v1721_v13, %v1723_v62 }
 0x23b   : > { %v1739_v49 = vpack.c.bf16 %v1733_v48, %v1733_v48  ;;  %v1734_v51 = vmul.f32 %v1725_v0, %v7083_v43  ;;  %v1684_v5 = vpop.permute.xlu0 %1683  ;;  %3696 = vrot.lane.b32.xlu1 %v7350_v22, %s6795_s29 }
 0x23d   : > { %v1713_v6 = vpop.permute.xlu1 %1712  ;;  %6446 = vmatprep.subr.msk.bf16.mxu0 %vm1746_vm10, %v1739_v49  ;;  %3822 = vrot.lane.b32.xlu0 %v7344_v33, %s6795_s29  ;;  %v1740_v24 = vpack.c.bf16 %v1734_v51, %v1734_v51 }
 0x23e   : > { %v1726_v9 = vsel %vm365_vm1, %v1723_v62, %v1713_v6  ;;  %v1731_v31 = vsel %vm365_vm1, %v1713_v6, %v1719_v59  ;;  %v1706_v6 = vld [vmem:[%s8395_s5] sm:$0x3] }
 0x23f   : > { %v1732_v52 = vmul.f32 %v1731_v31, %v7066_v28  ;;  %v1735_v54 = vmul.f32 %v1726_v9, %v7080_v42  ;;  %3820 = vrot.lane.b32.xlu1 %v7340_v56, %s6795_s29  ;;  %v1691_v8 = vpop.permute.xlu0 %1690  ;;  %v1754_v60 = vsel %vm1746_vm10, %v1740_v24, 0 }
 0x241   : > { %v1738_v25 = vpack.c.bf16 %v1732_v52, %v1732_v52  ;;  %v1741_v53 = vpack.c.bf16 %v1735_v54, %v1735_v54  ;;  %v1689_v40 = vpop.permute.xlu1 %1688  ;;  %3948 = vperm.xlu0 %6688, %v6444_v27  }
 0x242   : > { %v1694_v34 = vsel %vm365_vm1, %v1689_v40, %v1691_v8  ;;  %v1701_v35 = vsel %vm365_vm1, %v1684_v5, %v1689_v40 }
 0x243   : > { %v1702_v11 = vmul.f32 %v1701_v35, %v7066_v28  ;;  %v1703_v36 = vmul.f32 %v1694_v34, %v7074_v39  ;;  %6448 = vmatprep.subr.msk.bf16.mxu1 %vm1746_vm10, %v1741_v53  ;;  %3824 = vrot.lane.b32.xlu1 %v7356_v2, %s6795_s29  ;;  %v1939_v38 = vpop.permute.xlu0 %1938  ;;  %v1748_v57 = vsel %vm1746_vm10, %v1738_v25, 0 }
 0x244   : > { %1774 = vmatpush1.bf16.msra.mxu0 %v1748_v57  ;;  %1815 = vmatpush1.bf16.msra.mxu1 %v1754_v60 }
 0x245   : > { %v1707_v26 = vpack.c.bf16 %v1702_v11, %v1702_v11  ;;  %v1708_v12 = vpack.c.bf16 %v1703_v36, %v1703_v36  ;;  %v1693_v30 = vpop.permute.xlu1 %1692 }
 0x246   : > { %v1695_v45 = vsel %vm365_vm1, %v1691_v8, %v1693_v30  ;;  %v1696_v46 = vsel %vm365_vm1, %v1693_v30, %v1684_v5 }
 0x247   : > { %v1704_v47 = vmul.f32 %v1695_v45, %v7083_v43  ;;  %v1705_v3 = vmul.f32 %v1696_v46, %v7080_v42  ;;  %6447 = vmatmul.mubr.msk.bf16.vlgmr.msra.gmra.mxu0 %vm1742_vm11, %v6445_v61  ;;  %6449 = vmatmul.mubr.msk.bf16.vlgmr.msra.gmra.mxu1 %vm1742_vm11, %v6445_v61  ;;  %v1944_v58 = vpop.permute.xlu0 %1943  ;;  %v1845_v21 = vsel %vm1746_vm10, %v1707_v26, 0  ;;  %v6454_v26 = vld [vmem:[%s8395_s5 + $0x2] sm:$0x3] }
 0x248   : > { %6450 = vmatprep.subr.msk.bf16.mxu0 %vm1746_vm10, %v1708_v12  ;;  %1888 = vmatprep.mubr.bf16.mxu0 %v8499_v32 }
 0x249   : > { %v1709_v59 = vpack.c.bf16 %v1704_v47, %v1704_v47  ;;  %v1710_v13 = vpack.c.bf16 %v1705_v3, %v1705_v3  ;;  %1871 = vmatpush1.bf16.msra.mxu0 %v1845_v21  ;;  %v1942_v14 = vpop.permute.xlu1 %1941  ;;  %1929 = vmatprep.mubr.bf16.mxu1 %v8499_v32 }
 0x24a   : > { %v1947_v48 = vsel %vm415_vm0, %v1942_v14, %v1944_v58  ;;  %v1954_v62 = vsel %vm415_vm0, %v1939_v38, %v1942_v14 }
 0x24b   : > { %v1955_v0 = vmul.f32 %v1954_v62, %v7048_v16  ;;  %v1956_v49 = vmul.f32 %v1947_v48, %v7045_v15  ;;  %6452 = vmatprep.subr.msk.bf16.mxu1 %vm1746_vm10, %v1710_v13  ;;  %v2067_v51 = vpop.permute.xlu0 %2066  ;;  %v1851_v5 = vsel %vm1746_vm10, %v1709_v59, 0 }
 0x24c   : > { %1912 = vmatpush1.bf16.msra.mxu1 %v1851_v5 }
 0x24d   : > { %v1961_v9 = vpack.c.bf16 %v1955_v0, %v1955_v0  ;;  %v1962_v31 = vpack.c.bf16 %v1956_v49, %v1956_v49  ;;  %v1946_v27 = vpop.permute.xlu1 %1945 }
 0x24e   : > { %v1948_v24 = vsel %vm415_vm0, %v1944_v58, %v1946_v27  ;;  %v1949_v52 = vsel %vm415_vm0, %v1946_v27, %v1939_v38 }
 0x24f   : > { %v1957_v54 = vmul.f32 %v1948_v24, %v7054_v18  ;;  %v1958_v8 = vmul.f32 %v1949_v52, %v7051_v17  ;;  %6451 = vmatmul.mubr.msk.bf16.vlgmr.msra.gmra.mxu0 %vm1742_vm11, %v1706_v6  ;;  %6453 = vmatmul.mubr.msk.bf16.vlgmr.msra.gmra.mxu1 %vm1742_vm11, %v1706_v6  ;;  %v2072_v25 = vpop.permute.xlu0 %2071  ;;  %v1969_v53 = vsel %vm1746_vm10, %v1961_v9, 0  ;;  %v6459_v9 = vld [vmem:[%s8395_s5 + $0x14] sm:$0x3] }
 0x250   : > { %6455 = vmatprep.subr.msk.bf16.mxu0 %vm1746_vm10, %v1962_v31  ;;  %2012 = vmatprep.mubr.bf16.mxu0 %v8499_v32 }
 0x251   : > { %v1963_v40 = vpack.c.bf16 %v1957_v54, %v1957_v54  ;;  %v1964_v34 = vpack.c.bf16 %v1958_v8, %v1958_v8  ;;  %1995 = vmatpush1.bf16.msra.mxu0 %v1969_v53  ;;  %v2070_v35 = vpop.permute.xlu1 %2069  ;;  %2053 = vmatprep.mubr.bf16.mxu1 %v8499_v32 }
 0x252   : > { %v2075_v11 = vsel %vm415_vm0, %v2070_v35, %v2072_v25  ;;  %v2082_v36 = vsel %vm415_vm0, %v2067_v51, %v2070_v35 }
 0x253   : > { %v2083_v38 = vmul.f32 %v2082_v36, %v7048_v16  ;;  %v2084_v57 = vmul.f32 %v2075_v11, %v7045_v15  ;;  %6457 = vmatprep.subr.msk.bf16.mxu1 %vm1746_vm10, %v1964_v34  ;;  %v2195_v60 = vpop.permute.xlu0 %2194  ;;  %v1975_v61 = vsel %vm1746_vm10, %v1963_v40, 0 }
 0x254   : > { %2036 = vmatpush1.bf16.msra.mxu1 %v1975_v61 }
 0x255   : > { %v2089_v12 = vpack.c.bf16 %v2083_v38, %v2083_v38  ;;  %v2090_v30 = vpack.c.bf16 %v2084_v57, %v2084_v57  ;;  %v2074_v45 = vpop.permute.xlu1 %2073 }
 0x256   : > { %v2076_v46 = vsel %vm415_vm0, %v2072_v25, %v2074_v45  ;;  %v2077_v47 = vsel %vm415_vm0, %v2074_v45, %v2067_v51 }
 0x257   : > { %v2085_v3 = vmul.f32 %v2076_v46, %v7054_v18  ;;  %v2086_v58 = vmul.f32 %v2077_v47, %v7051_v17  ;;  %6456 = vmatmul.mubr.msk.bf16.vlgmr.msra.gmra.mxu0 %vm1742_vm11, %v6454_v26  ;;  %6458 = vmatmul.mubr.msk.bf16.vlgmr.msra.gmra.mxu1 %vm1742_vm11, %v6454_v26  ;;  %v2200_v21 = vpop.permute.xlu0 %2199  ;;  %v2097_v59 = vsel %vm1746_vm10, %v2089_v12, 0  ;;  %v6464_v12 = vld [vmem:[%s8395_s5 + $0x4] sm:$0x3] }
 0x258   : > { %6460 = vmatprep.subr.msk.bf16.mxu0 %vm1746_vm10, %v2090_v30  ;;  %2140 = vmatprep.mubr.bf16.mxu0 %v8499_v32 }
 0x259   : > { %v2091_v13 = vpack.c.bf16 %v2085_v3, %v2085_v3  ;;  %v2092_v14 = vpack.c.bf16 %v2086_v58, %v2086_v58  ;;  %2123 = vmatpush1.bf16.msra.mxu0 %v2097_v59  ;;  %v2198_v48 = vpop.permute.xlu1 %2197  ;;  %2181 = vmatprep.mubr.bf16.mxu1 %v8499_v32 }
 0x25a   : > { %v2203_v62 = vsel %vm662_vm4, %v2198_v48, %v2200_v21  ;;  %v2210_v0 = vsel %vm662_vm4, %v2195_v60, %v2198_v48 }
 0x25b   : > { %v2211_v49 = vmul.f32 %v2210_v0, %v7100_v55  ;;  %v2212_v51 = vmul.f32 %v2203_v62, %v7108_v63  ;;  %6462 = vmatprep.subr.msk.bf16.mxu1 %vm1746_vm10, %v2092_v14  ;;  %v2323_v5 = vpop.permute.xlu0 %2322  ;;  %v2103_v6 = vsel %vm1746_vm10, %v2091_v13, 0 }
 0x25c   : > { %2164 = vmatpush1.bf16.msra.mxu1 %v2103_v6 }
 0x25d   : > { %v2217_v31 = vpack.c.bf16 %v2211_v49, %v2211_v49  ;;  %v2218_v27 = vpack.c.bf16 %v2212_v51, %v2212_v51  ;;  %v2202_v24 = vpop.permute.xlu1 %2201 }
 0x25e   : > { %v2204_v52 = vsel %vm662_vm4, %v2200_v21, %v2202_v24  ;;  %v2205_v54 = vsel %vm662_vm4, %v2202_v24, %v2195_v60 }
 0x25f   : > { %v2213_v8 = vmul.f32 %v2204_v52, %v7117_v10  ;;  %v2214_v25 = vmul.f32 %v2205_v54, %v7114_v7  ;;  %6461 = vmatmul.mubr.msk.bf16.vlgmr.msra.gmra.mxu0 %vm1742_vm11, %v6459_v9  ;;  %6463 = vmatmul.mubr.msk.bf16.vlgmr.msra.gmra.mxu1 %vm1742_vm11, %v6459_v9  ;;  %v2328_v53 = vpop.permute.xlu0 %2327  ;;  %v2225_v40 = vsel %vm1746_vm10, %v2217_v31, 0  ;;  %v6469_v31 = vld [vmem:[%s8395_s5 + $0x16] sm:$0x3] }
 0x260   : > { %6465 = vmatprep.subr.msk.bf16.mxu0 %vm1746_vm10, %v2218_v27  ;;  %2268 = vmatprep.mubr.bf16.mxu0 %v8499_v32 }
 0x261   : > { %v2219_v34 = vpack.c.bf16 %v2213_v8, %v2213_v8  ;;  %v2220_v35 = vpack.c.bf16 %v2214_v25, %v2214_v25  ;;  %2251 = vmatpush1.bf16.msra.mxu0 %v2225_v40  ;;  %v2326_v11 = vpop.permute.xlu1 %2325  ;;  %2309 = vmatprep.mubr.bf16.mxu1 %v8499_v32 }
 0x262   : > { %v2331_v36 = vsel %vm662_vm4, %v2326_v11, %v2328_v53  ;;  %v2338_v38 = vsel %vm662_vm4, %v2323_v5, %v2326_v11 }
 0x263   : > { %v2339_v57 = vmul.f32 %v2338_v38, %v7100_v55  ;;  %v2340_v60 = vmul.f32 %v2331_v36, %v7108_v63  ;;  %6467 = vmatprep.subr.msk.bf16.mxu1 %vm1746_vm10, %v2220_v35  ;;  %v2451_v61 = vpop.permute.xlu0 %2450  ;;  %v2231_v26 = vsel %vm1746_vm10, %v2219_v34, 0 }
 0x264   : > { %2292 = vmatpush1.bf16.msra.mxu1 %v2231_v26 }
 0x265   : > { %v2345_v30 = vpack.c.bf16 %v2339_v57, %v2339_v57  ;;  %v2346_v45 = vpack.c.bf16 %v2340_v60, %v2340_v60  ;;  %v2330_v46 = vpop.permute.xlu1 %2329 }
 0x266   : > { %v2332_v47 = vsel %vm662_vm4, %v2328_v53, %v2330_v46  ;;  %v2333_v3 = vsel %vm662_vm4, %v2330_v46, %v2323_v5 }
 0x267   : > { %v2341_v58 = vmul.f32 %v2332_v47, %v7117_v10  ;;  %v2342_v21 = vmul.f32 %v2333_v3, %v7114_v7  ;;  %6466 = vmatmul.mubr.msk.bf16.vlgmr.msra.gmra.mxu0 %vm1742_vm11, %v6464_v12  ;;  %6468 = vmatmul.mubr.msk.bf16.vlgmr.msra.gmra.mxu1 %vm1742_vm11, %v6464_v12  ;;  %v2456_v59 = vpop.permute.xlu0 %2455  ;;  %v2353_v13 = vsel %vm1746_vm10, %v2345_v30, 0  ;;  %v6474_v30 = vld [vmem:[%s8395_s5 + $0x6] sm:$0x3] }
 0x268   : > { %6470 = vmatprep.subr.msk.bf16.mxu0 %vm1746_vm10, %v2346_v45  ;;  %2396 = vmatprep.mubr.bf16.mxu0 %v8499_v32 }
 0x269   : > { %v2347_v14 = vpack.c.bf16 %v2341_v58, %v2341_v58  ;;  %v2348_v48 = vpack.c.bf16 %v2342_v21, %v2342_v21  ;;  %2379 = vmatpush1.bf16.msra.mxu0 %v2353_v13  ;;  %v2454_v62 = vpop.permute.xlu1 %2453  ;;  %2437 = vmatprep.mubr.bf16.mxu1 %v8499_v32  ;;  %v2711_v21 = vpack.c.bf16 %v7362_v19, %v7362_v19 }
 0x26a   : > { %v2459_v0 = vsel %vm814_vm5, %v2454_v62, %v2456_v59  ;;  %v2466_v49 = vsel %vm814_vm5, %v2451_v61, %v2454_v62  ;;  %v2713_v62 = vpack.c.bf16 %v7350_v22, %v7350_v22  ;;  %v2710_v19 = vpack.c.bf16 %v7352_v23, %v7352_v23  ;;  %v6479_v22 = vld [vmem:[%s8395_s5 + $0x18] sm:$0x3] }
 0x26b   : > { %v2467_v51 = vmul.f32 %v2466_v49, %v7134_v29  ;;  %v2468_v5 = vmul.f32 %v2459_v0, %v7142_v37  ;;  %6472 = vmatprep.subr.msk.bf16.mxu1 %vm1746_vm10, %v2348_v48  ;;  %v2579_v6 = vpop.permute.xlu0 %2578  ;;  %v2359_v9 = vsel %vm1746_vm10, %v2347_v14, 0 }
 0x26c   : > { %2420 = vmatpush1.bf16.msra.mxu1 %v2359_v9 }
 0x26d   : > { %v2473_v27 = vpack.c.bf16 %v2467_v51, %v2467_v51  ;;  %v2474_v24 = vpack.c.bf16 %v2468_v5, %v2468_v5  ;;  %v2458_v52 = vpop.permute.xlu1 %2457  ;;  %v2712_v5 = vpack.c.bf16 %v7338_v50, %v7338_v50  ;;  %v2818_v50 = vpack.c.bf16 %v7340_v56, %v7340_v56 }
 0x26e   : > { %v2460_v54 = vsel %vm814_vm5, %v2456_v59, %v2458_v52  ;;  %v2461_v8 = vsel %vm814_vm5, %v2458_v52, %v2451_v61 }
 0x26f   : > { %v2469_v25 = vmul.f32 %v2460_v54, %v7151_v44  ;;  %v2470_v53 = vmul.f32 %v2461_v8, %v7148_v41  ;;  %6471 = vmatmul.mubr.msk.bf16.vlgmr.msra.gmra.mxu0 %vm1742_vm11, %v6469_v31  ;;  %6473 = vmatmul.mubr.msk.bf16.vlgmr.msra.gmra.mxu1 %vm1742_vm11, %v6469_v31  ;;  %v2584_v40 = vpop.permute.xlu0 %2583  ;;  %v2481_v34 = vsel %vm1746_vm10, %v2473_v27, 0  ;;  %v2718_v31 = vsel %vm1746_vm10, %v2710_v19, 0 }
 0x270   : > { %6475 = vmatprep.subr.msk.bf16.mxu0 %vm1746_vm10, %v2474_v24  ;;  %2524 = vmatprep.mubr.bf16.mxu0 %v8499_v32  ;;  %v2724_v27 = vsel %vm1746_vm10, %v2712_v5, 0  ;;  %v2820_v8 = vpack.c.bf16 %v7356_v2, %v7356_v2  ;;  %v6489_v5 = vld [vmem:[%s8395_s5 + $0x1a] sm:$0x3] }
 0x271   : > { %v2475_v35 = vpack.c.bf16 %v2469_v25, %v2469_v25  ;;  %v2476_v11 = vpack.c.bf16 %v2470_v53, %v2470_v53  ;;  %2507 = vmatpush1.bf16.msra.mxu0 %v2481_v34  ;;  %v2582_v36 = vpop.permute.xlu1 %2581  ;;  %2565 = vmatprep.mubr.bf16.mxu1 %v8499_v32 }
 0x272   : > { %v2587_v38 = vsel %vm814_vm5, %v2582_v36, %v2584_v40  ;;  %v2594_v57 = vsel %vm814_vm5, %v2579_v6, %v2582_v36  ;;  %v2819_v36 = vpack.c.bf16 %v7344_v33, %v7344_v33 }
 0x273   : > { %v2595_v60 = vmul.f32 %v2594_v57, %v7134_v29  ;;  %v2596_v61 = vmul.f32 %v2587_v38, %v7142_v37  ;;  %6477 = vmatprep.subr.msk.bf16.mxu1 %vm1746_vm10, %v2476_v11  ;;  %v2923_v26 = vpop.permute.xlu0 %2922  ;;  %v2487_v12 = vsel %vm1746_vm10, %v2475_v35, 0  ;;  %v2817_v38 = vpack.c.bf16 %v7336_v20, %v7336_v20  ;;  %v6484_v57 = vld [vmem:[%s8395_s5 + $0x8] sm:$0x3] }
 0x274   : > { %2548 = vmatpush1.bf16.msra.mxu1 %v2487_v12 }
 0x275   : > { %v2601_v45 = vpack.c.bf16 %v2595_v60, %v2595_v60  ;;  %v2602_v46 = vpack.c.bf16 %v2596_v61, %v2596_v61  ;;  %v2586_v47 = vpop.permute.xlu1 %2585  ;;  %v8500_v60 = vld [vmem:[#allocation13_spill] sm:$0xff] }
 0x276   : > { %v2588_v3 = vsel %vm814_vm5, %v2584_v40, %v2586_v47  ;;  %v2589_v58 = vsel %vm814_vm5, %v2586_v47, %v2579_v6 }
 0x277   : > { %v2597_v59 = vmul.f32 %v2588_v3, %v7151_v44  ;;  %v2598_v13 = vmul.f32 %v2589_v58, %v7148_v41  ;;  %6476 = vmatmul.mubr.msk.bf16.vlgmr.msra.gmra.mxu0 %vm1742_vm11, %v6474_v30  ;;  %6478 = vmatmul.mubr.msk.bf16.vlgmr.msra.gmra.mxu1 %vm1742_vm11, %v6474_v30  ;;  %v2927_v14 = vpop.permute.xlu0 %2926  ;;  %v2609_v48 = vsel %vm1746_vm10, %v2601_v45, 0  ;;  %v2831_v3 = vsel %vm1746_vm10, %v2819_v36, 0 }
 0x278   : > { %6480 = vmatprep.subr.msk.bf16.mxu0 %vm1746_vm10, %v2602_v46  ;;  %2652 = vmatprep.mubr.bf16.mxu0 %v8499_v32 }
 0x279   : > { %v2603_v0 = vpack.c.bf16 %v2597_v59, %v2597_v59  ;;  %v2604_v49 = vpack.c.bf16 %v2598_v13, %v2598_v13  ;;  %2635 = vmatpush1.bf16.msra.mxu0 %v2609_v48  ;;  %v2925_v51 = vpop.permute.xlu1 %2924  ;;  %2693 = vmatprep.mubr.bf16.mxu1 %v8499_v32 }
 0x27a   : > { %6485 = vmatprep.subr.msk.bf16.mxu0 %vm1746_vm10, %v2711_v21  ;;  %v2931_v24 = vsel %vm1072_vm6, %v2925_v51, %v2927_v14  ;;  %v2930_v25 = vsel %vm1072_vm6, %v2923_v26, %v2925_v51  ;;  %v2825_v21 = vsel %vm1746_vm10, %v2817_v38, 0 }
 0x27b   : > { %6482 = vmatprep.subr.msk.bf16.mxu1 %vm1746_vm10, %v2604_v49  ;;  %v3051_v6 = vpop.permute.xlu0 %3050  ;;  %v2615_v9 = vsel %vm1746_vm10, %v2603_v0, 0  ;;  %v2940_v40 = vmul.f32 %v2931_v24, %v7184_v1  ;;  %v2939_v61 = vmul.f32 %v2930_v25, %v8500_v60 }
 0x27c   : > { %2676 = vmatpush1.bf16.msra.mxu1 %v2615_v9 }
 0x27d   : > { %v2929_v23 = vpop.permute.xlu1 %2928  ;;  %6487 = vmatprep.subr.msk.bf16.mxu1 %vm1746_vm10, %v2713_v62  ;;  %v2946_v45 = vpack.c.bf16 %v2940_v40, %v2940_v40  ;;  %v2945_v13 = vpack.c.bf16 %v2939_v61, %v2939_v61 }
 0x27e   : > { %v2938_v52 = vsel %vm1072_vm6, %v2929_v23, %v2923_v26  ;;  %v2932_v34 = vsel %vm1072_vm6, %v2927_v14, %v2929_v23  ;;  %v8501_v26 = vld [vmem:[#allocation16_spill] sm:$0xff] }
 0x27f   : > { %6481 = vmatmul.mubr.msk.bf16.vlgmr.msra.gmra.mxu0 %vm1742_vm11, %v6479_v22  ;;  %6483 = vmatmul.mubr.msk.bf16.vlgmr.msra.gmra.mxu1 %vm1742_vm11, %v6479_v22  ;;  %v3055_v54 = vpop.permute.xlu0 %3054  ;;  %v2942_v35 = vmul.f32 %v2938_v52, %v7192_v4  ;;  %v2941_v12 = vmul.f32 %v2932_v34, %v8501_v26  ;;  %v2953_v23 = vsel %vm1746_vm10, %v2945_v13, 0 }
 0x280   : > { %2744 = vmatpush1.bf16.msra.mxu0 %v2718_v31  ;;  %2785 = vmatpush1.bf16.msra.mxu1 %v2724_v27 }
 0x281   : > { %6490 = vmatprep.subr.msk.bf16.mxu0 %vm1746_vm10, %v2818_v50  ;;  %v3053_v53 = vpop.permute.xlu1 %3052  ;;  %6492 = vmatprep.subr.msk.bf16.mxu1 %vm1746_vm10, %v2820_v8  ;;  %v2948_v46 = vpack.c.bf16 %v2942_v35, %v2942_v35  ;;  %v2947_v14 = vpack.c.bf16 %v2941_v12, %v2941_v12  ;;  %v8503_v35 = vld [vmem:[#allocation19_spill] sm:$0xff]  ;;  %v8504_v12 = vld [vmem:[#allocation17_spill] sm:$0xff] }
 0x282   : > { %2761 = vmatprep.mubr.bf16.mxu0 %v8499_v32  ;;  %2802 = vmatprep.mubr.bf16.mxu1 %v8499_v32  ;;  %v3059_v47 = vsel %vm1072_vm6, %v3053_v53, %v3055_v54  ;;  %v3058_v19 = vsel %vm1072_vm6, %v3051_v6, %v3053_v53  ;;  %v8502_v53 = vld [vmem:[#allocation18_spill] sm:$0xff] }
 0x283   : > { %v3179_v11 = vpop.permute.xlu0 %3178  ;;  %v3068_v62 = vmul.f32 %v3059_v47, %v7184_v1  ;;  %v2959_v22 = vsel %vm1746_vm10, %v2947_v14, 0  ;;  %v3067_v31 = vmul.f32 %v3058_v19, %v8500_v60 }
 0x285   : > { %v3057_v30 = vpop.permute.xlu1 %3056  ;;  %v3074_v27 = vpack.c.bf16 %v3068_v62, %v3068_v62  ;;  %v3073_v38 = vpack.c.bf16 %v3067_v31, %v3067_v31  ;;  %v6499_v31 = vld [vmem:[%s8395_s5 + $0x1c] sm:$0x3] }
 0x286   : > { %v3066_v59 = vsel %vm1072_vm6, %v3057_v30, %v3051_v6  ;;  %v3060_v0 = vsel %vm1072_vm6, %v3055_v54, %v3057_v30 }
 0x287   : > { %6488 = vmatmul.mubr.msk.bf16.vlgmr.msra.gmra.mxu1 %vm1742_vm11, %v6484_v57  ;;  %v3183_v58 = vpop.permute.xlu0 %3182  ;;  %6486 = vmatmul.mubr.msk.bf16.vlgmr.msra.gmra.mxu0 %vm1742_vm11, %v6484_v57  ;;  %v3070_v49 = vmul.f32 %v3066_v59, %v7192_v4  ;;  %v3069_v50 = vmul.f32 %v3060_v0, %v8501_v26  ;;  %v3081_v14 = vsel %vm1746_vm10, %v3073_v38, 0  ;;  %v8506_v38 = vld [vmem:[#allocation22_spill] sm:$0xff] }
 0x288   : > { %2892 = vmatpush1.bf16.msra.mxu1 %v2831_v3  ;;  %2851 = vmatpush1.bf16.msra.mxu0 %v2825_v21 }
 0x289   : > { %v3181_v48 = vpop.permute.xlu1 %3180  ;;  %2868 = vmatprep.mubr.bf16.mxu0 %v8499_v32  ;;  %2909 = vmatprep.mubr.bf16.mxu1 %v8499_v32  ;;  %v3076_v6 = vpack.c.bf16 %v3070_v49, %v3070_v49  ;;  %v3075_v57 = vpack.c.bf16 %v3069_v50, %v3069_v50 }
 0x28a   : > { %6495 = vmatprep.subr.msk.bf16.mxu0 %vm1746_vm10, %v2946_v45  ;;  %6497 = vmatprep.subr.msk.bf16.mxu1 %vm1746_vm10, %v2948_v46  ;;  %v3187_v24 = vsel %vm1224_vm7, %v3181_v48, %v3183_v58  ;;  %v3186_v8 = vsel %vm1224_vm7, %v3179_v11, %v3181_v48  ;;  %v8505_v45 = vld [vmem:[#allocation20_spill] sm:$0xff] }
 0x28b   : > { %v3307_v51 = vpop.permute.xlu0 %3306  ;;  %v3196_v40 = vmul.f32 %v3187_v24, %v8502_v53  ;;  %v3195_v30 = vmul.f32 %v3186_v8, %v8504_v12  ;;  %v3087_v59 = vsel %vm1746_vm10, %v3075_v57, 0 }
 0x28d   : > { %v3185_v9 = vpop.permute.xlu1 %3184  ;;  %v3202_v3 = vpack.c.bf16 %v3196_v40, %v3196_v40  ;;  %v3201_v62 = vpack.c.bf16 %v3195_v30, %v3195_v30  ;;  %v8507_v30 = vld [vmem:[#allocation23_spill] sm:$0xff] }
 0x28e   : > { %v3194_v52 = vsel %vm1224_vm7, %v3185_v9, %v3179_v11  ;;  %v3188_v34 = vsel %vm1224_vm7, %v3183_v58, %v3185_v9  ;;  %v6494_v11 = vld [vmem:[%s8395_s5 + $0xa] sm:$0x3] }
 0x28f   : > { %6493 = vmatmul.mubr.msk.bf16.vlgmr.msra.gmra.mxu1 %vm1742_vm11, %v6489_v5  ;;  %v3311_v54 = vpop.permute.xlu0 %3310  ;;  %6491 = vmatmul.mubr.msk.bf16.vlgmr.msra.gmra.mxu0 %vm1742_vm11, %v6489_v5  ;;  %v3198_v36 = vmul.f32 %v3194_v52, %v8503_v35  ;;  %v3197_v46 = vmul.f32 %v3188_v34, %v8505_v45 }
 0x290   : > { %3020 = vmatpush1.bf16.msra.mxu1 %v2959_v22  ;;  %2979 = vmatpush1.bf16.msra.mxu0 %v2953_v23 }
 0x291   : > { %6500 = vmatprep.subr.msk.bf16.mxu0 %vm1746_vm10, %v3074_v27  ;;  %6502 = vmatprep.subr.msk.bf16.mxu1 %vm1746_vm10, %v3076_v6  ;;  %v3309_v25 = vpop.permute.xlu1 %3308  ;;  %v3204_v58 = vpack.c.bf16 %v3198_v36, %v3198_v36  ;;  %v3203_v19 = vpack.c.bf16 %v3197_v46, %v3197_v46  ;;  %v3209_v6 = vsel %vm1746_vm10, %v3201_v62, 0 }
 0x292   : > { %2996 = vmatprep.mubr.bf16.mxu0 %v8499_v32  ;;  %3037 = vmatprep.mubr.bf16.mxu1 %v8499_v32  ;;  %v3315_v21 = vsel %vm1224_vm7, %v3309_v25, %v3311_v54  ;;  %v3314_v5 = vsel %vm1224_vm7, %v3307_v51, %v3309_v25 }
 0x293   : > { %v3435_v61 = vpop.permute.xlu0 %3434  ;;  %v3324_v49 = vmul.f32 %v3315_v21, %v8502_v53  ;;  %v3215_v50 = vsel %vm1746_vm10, %v3203_v19, 0  ;;  %v3323_v24 = vmul.f32 %v3314_v5, %v8504_v12 }
 0x295   : > { %v3313_v47 = vpop.permute.xlu1 %3312  ;;  %v3330_v52 = vpack.c.bf16 %v3324_v49, %v3324_v49 }
 0x296   : > { %v3322_v48 = vsel %vm1224_vm7, %v3313_v47, %v3307_v51  ;;  %v3316_v9 = vsel %vm1224_vm7, %v3311_v54, %v3313_v47  ;;  %v3329_v47 = vpack.c.bf16 %v3323_v24, %v3323_v24 }
 0x297   : > { %6498 = vmatmul.mubr.msk.bf16.vlgmr.msra.gmra.mxu1 %vm1742_vm11, %v6494_v11  ;;  %v3439_v13 = vpop.permute.xlu0 %3438  ;;  %6496 = vmatmul.mubr.msk.bf16.vlgmr.msra.gmra.mxu0 %vm1742_vm11, %v6494_v11  ;;  %v3326_v22 = vmul.f32 %v3322_v48, %v8503_v35  ;;  %v3325_v8 = vmul.f32 %v3316_v9, %v8505_v45 }
 0x298   : > { %3148 = vmatpush1.bf16.msra.mxu1 %v3087_v59  ;;  %3107 = vmatpush1.bf16.msra.mxu0 %v3081_v14  ;;  %v8509_v59 = vld [vmem:[#allocation24_spill] sm:$0xff]  ;;  %v3337_v5 = vsel %vm1746_vm10, %v3329_v47, 0 }
 0x299   : > { %v3437_v0 = vpop.permute.xlu1 %3436  ;;  %3124 = vmatprep.mubr.bf16.mxu0 %v8499_v32  ;;  %3165 = vmatprep.mubr.bf16.mxu1 %v8499_v32  ;;  %v3332_v51 = vpack.c.bf16 %v3326_v22, %v3326_v22 }
 0x29a   : > { %6505 = vmatprep.subr.msk.bf16.mxu0 %vm1746_vm10, %v3202_v3  ;;  %6507 = vmatprep.subr.msk.bf16.mxu1 %vm1746_vm10, %v3204_v58  ;;  %v3443_v54 = vsel %vm1376_vm8, %v3437_v0, %v3439_v13  ;;  %v3442_v34 = vsel %vm1376_vm8, %v3435_v61, %v3437_v0  ;;  %v3331_v3 = vpack.c.bf16 %v3325_v8, %v3325_v8  ;;  %v8508_v58 = vld [vmem:[#allocation21_spill] sm:$0xff] }
 0x29b   : > { %v3563_v23 = vpop.permute.xlu0 %3562  ;;  %v3452_v57 = vmul.f32 %v3443_v54, %v8506_v38  ;;  %v3451_v21 = vmul.f32 %v3442_v34, %v8508_v58 }
 0x29c   : > { %v3343_v49 = vsel %vm1746_vm10, %v3331_v3, 0 }
 0x29d   : > { %v3441_v27 = vpop.permute.xlu1 %3440  ;;  %v3458_v19 = vpack.c.bf16 %v3452_v57, %v3452_v57  ;;  %v3457_v22 = vpack.c.bf16 %v3451_v21, %v3451_v21  ;;  %v8510_v21 = vld [vmem:[#allocation26_spill] sm:$0xff] }
 0x29e   : > { %v3450_v25 = vsel %vm1376_vm8, %v3441_v27, %v3435_v61  ;;  %v3444_v11 = vsel %vm1376_vm8, %v3439_v13, %v3441_v27  ;;  %v6504_v61 = vld [vmem:[%s8395_s5 + $0xc] sm:$0x3] }
 0x29f   : > { %6503 = vmatmul.mubr.msk.bf16.vlgmr.msra.gmra.mxu1 %vm1742_vm11, %v6499_v31  ;;  %v3567_v40 = vpop.permute.xlu0 %3566  ;;  %6501 = vmatmul.mubr.msk.bf16.vlgmr.msra.gmra.mxu0 %vm1742_vm11, %v6499_v31  ;;  %v3454_v46 = vmul.f32 %v3450_v25, %v8507_v30  ;;  %v3453_v14 = vmul.f32 %v3444_v11, %v8509_v59  ;;  %v3465_v34 = vsel %vm1746_vm10, %v3457_v22, 0  ;;  %v8513_v22 = vld [vmem:[#allocation28_spill] sm:$0xff] }
 0x2a0   : > { %3276 = vmatpush1.bf16.msra.mxu1 %v3215_v50  ;;  %3235 = vmatpush1.bf16.msra.mxu0 %v3209_v6 }
 0x2a1   : > { %6510 = vmatprep.subr.msk.bf16.mxu0 %vm1746_vm10, %v3330_v52  ;;  %6512 = vmatprep.subr.msk.bf16.mxu1 %vm1746_vm10, %v3332_v51  ;;  %v3565_v36 = vpop.permute.xlu1 %3564  ;;  %v3460_v13 = vpack.c.bf16 %v3454_v46, %v3454_v46  ;;  %v3459_v31 = vpack.c.bf16 %v3453_v14, %v3453_v14  ;;  %v6509_v51 = vld [vmem:[%s8395_s5 + $0x1e] sm:$0x3] }
 0x2a2   : > { %3252 = vmatprep.mubr.bf16.mxu0 %v8499_v32  ;;  %3293 = vmatprep.mubr.bf16.mxu1 %v8499_v32  ;;  %v3571_v0 = vsel %vm1376_vm8, %v3565_v36, %v3567_v40  ;;  %v3570_v6 = vsel %vm1376_vm8, %v3563_v23, %v3565_v36 }
 0x2a3   : > { %v3691_v48 = vpop.permute.xlu0 %3690  ;;  %v3580_v50 = vmul.f32 %v3571_v0, %v8506_v38  ;;  %v3471_v25 = vsel %vm1746_vm10, %v3459_v31, 0  ;;  %v3579_v57 = vmul.f32 %v3570_v6, %v8508_v58 }
 0x2a5   : > { %v3569_v62 = vpop.permute.xlu1 %3568  ;;  %v3586_v11 = vpack.c.bf16 %v3580_v50, %v3580_v50  ;;  %v3585_v0 = vpack.c.bf16 %v3579_v57, %v3579_v57 }
 0x2a6   : > { %v3578_v9 = vsel %vm1376_vm8, %v3569_v62, %v3563_v23  ;;  %v3572_v24 = vsel %vm1376_vm8, %v3567_v40, %v3569_v62 }
 0x2a7   : > { %6508 = vmatmul.mubr.msk.bf16.vlgmr.msra.gmra.mxu1 %vm1742_vm11, %v6504_v61  ;;  %6506 = vmatmul.mubr.msk.bf16.vlgmr.msra.gmra.mxu0 %vm1742_vm11, %v6504_v61  ;;  %v3582_v52 = vmul.f32 %v3578_v9, %v8507_v30  ;;  %v3695_v8 = vpop.permute.xlu0 %3694  ;;  %v3581_v46 = vmul.f32 %v3572_v24, %v8509_v59 }
 0x2a8   : > { %3404 = vmatpush1.bf16.msra.mxu1 %v3343_v49  ;;  %3363 = vmatpush1.bf16.msra.mxu0 %v3337_v5  ;;  %v8512_v5 = vld [vmem:[#allocation25_spill] sm:$0xff] }
 0x2a9   : > { %v3693_v27 = vpop.permute.xlu1 %3692  ;;  %3380 = vmatprep.mubr.bf16.mxu0 %v8499_v32  ;;  %3421 = vmatprep.mubr.bf16.mxu1 %v8499_v32  ;;  %v3588_v23 = vpack.c.bf16 %v3582_v52, %v3582_v52  ;;  %v3587_v49 = vpack.c.bf16 %v3581_v46, %v3581_v46  ;;  %v3593_v52 = vsel %vm1746_vm10, %v3585_v0, 0 }
 0x2aa   : > { %6515 = vmatprep.subr.msk.bf16.mxu0 %vm1746_vm10, %v3458_v19  ;;  %6517 = vmatprep.subr.msk.bf16.mxu1 %vm1746_vm10, %v3460_v13  ;;  %v3699_v40 = vsel %vm1528_vm9, %v3693_v27, %v3695_v8  ;;  %v3698_v47 = vsel %vm1528_vm9, %v3691_v48, %v3693_v27  ;;  %v8511_v19 = vld [vmem:[#allocation27_spill] sm:$0xff] }
 0x2ab   : > { %v3819_v3 = vpop.permute.xlu0 %3818  ;;  %v3708_v14 = vmul.f32 %v3699_v40, %v8510_v21  ;;  %v3707_v9 = vmul.f32 %v3698_v47, %v8512_v5  ;;  %v6519_v40 = vld [vmem:[%s8395_s5 + $0x20] sm:$0x3] }
 0x2ad   : > { %v3697_v54 = vpop.permute.xlu1 %3696  ;;  %v3714_v50 = vpack.c.bf16 %v3708_v14, %v3708_v14 }
 0x2ae   : > { %v3706_v36 = vsel %vm1528_vm9, %v3697_v54, %v3691_v48  ;;  %v3700_v62 = vsel %vm1528_vm9, %v3695_v8, %v3697_v54  ;;  %v6514_v48 = vld [vmem:[%s8395_s5 + $0xe] sm:$0x3]  ;;  %v3599_v8 = vsel %vm1746_vm10, %v3587_v49, 0  ;;  %v6524_v49 = vld [vmem:[%s8395_s5 + $0x10] sm:$0x3] }
 0x2af   : > { %6513 = vmatmul.mubr.msk.bf16.vlgmr.msra.gmra.mxu1 %vm1742_vm11, %v6509_v51  ;;  %6511 = vmatmul.mubr.msk.bf16.vlgmr.msra.gmra.mxu0 %vm1742_vm11, %v6509_v51  ;;  %v3710_v13 = vmul.f32 %v3706_v36, %v8511_v19  ;;  %v3709_v31 = vmul.f32 %v3700_v62, %v8513_v22  ;;  %v3823_v24 = vpop.permute.xlu0 %3822 }
 0x2b0   : > { %3532 = vmatpush1.bf16.msra.mxu1 %v3471_v25  ;;  %3491 = vmatpush1.bf16.msra.mxu0 %v3465_v34  ;;  %v3713_v25 = vpack.c.bf16 %v3707_v9, %v3707_v9 }
 0x2b1   : > { %6520 = vmatprep.subr.msk.bf16.mxu0 %vm1746_vm10, %v3586_v11  ;;  %6522 = vmatprep.subr.msk.bf16.mxu1 %vm1746_vm10, %v3588_v23  ;;  %v3821_v61 = vpop.permute.xlu1 %3820  ;;  %v3716_v6 = vpack.c.bf16 %v3710_v13, %v3710_v13  ;;  %v3715_v34 = vpack.c.bf16 %v3709_v31, %v3709_v31  ;;  %v6529_v31 = vld [vmem:[%s8395_s5 + $0x22] sm:$0x3] }
 0x2b2   : > { %3508 = vmatprep.mubr.bf16.mxu0 %v8499_v32  ;;  %3549 = vmatprep.mubr.bf16.mxu1 %v8499_v32  ;;  %v3827_v51 = vsel %vm1528_vm9, %v3821_v61, %v3823_v24  ;;  %v3826_v57 = vsel %vm1528_vm9, %v3819_v3, %v3821_v61  ;;  %v3721_v36 = vsel %vm1746_vm10, %v3713_v25, 0 }
 0x2b3   : > { %v3836_v11 = vmul.f32 %v3827_v51, %v8510_v21  ;;  %v3727_v47 = vsel %vm1746_vm10, %v3715_v34, 0  ;;  %v3835_v14 = vmul.f32 %v3826_v57, %v8512_v5 }
 0x2b5   : > { %v3825_v27 = vpop.permute.xlu1 %3824  ;;  %v3842_v62 = vpack.c.bf16 %v3836_v11, %v3836_v11  ;;  %v3841_v61 = vpack.c.bf16 %v3835_v14, %v3835_v14 }
 0x2b6   : > { %v3834_v54 = vsel %vm1528_vm9, %v3825_v27, %v3819_v3  ;;  %v3828_v23 = vsel %vm1528_vm9, %v3823_v24, %v3825_v27 }
 0x2b7   : > { %6516 = vmatmul.mubr.msk.bf16.vlgmr.msra.gmra.mxu0 %vm1742_vm11, %v6514_v48  ;;  %6518 = vmatmul.mubr.msk.bf16.vlgmr.msra.gmra.mxu1 %vm1742_vm11, %v6514_v48  ;;  %v3838_v46 = vmul.f32 %v3834_v54, %v8511_v19  ;;  %v3837_v13 = vmul.f32 %v3828_v23, %v8513_v22  ;;  %v3849_v48 = vsel %vm1746_vm10, %v3841_v61, 0 }
 0x2b8   : > { %3619 = vmatpush1.bf16.msra.mxu0 %v3593_v52  ;;  %3660 = vmatpush1.bf16.msra.mxu1 %v3599_v8 }
 0x2b9   : > { %3636 = vmatprep.mubr.bf16.mxu0 %v8499_v32  ;;  %3677 = vmatprep.mubr.bf16.mxu1 %v8499_v32  ;;  %v3844_v3 = vpack.c.bf16 %v3838_v46, %v3838_v46  ;;  %v3843_v0 = vpack.c.bf16 %v3837_v13, %v3837_v13 }
 0x2ba   : > { %6525 = vmatprep.subr.msk.bf16.mxu0 %vm1746_vm10, %v3714_v50  ;;  %6527 = vmatprep.subr.msk.bf16.mxu1 %vm1746_vm10, %v3716_v6 }
 0x2bb   : > { %v3855_v9 = vsel %vm1746_vm10, %v3843_v0, 0 }
 0x2bf   : > { %6521 = vmatmul.mubr.msk.bf16.vlgmr.msra.gmra.mxu0 %vm1742_vm11, %v6519_v40  ;;  %6523 = vmatmul.mubr.msk.bf16.vlgmr.msra.gmra.mxu1 %vm1742_vm11, %v6519_v40 }
 0x2c0   : > { %3747 = vmatpush1.bf16.msra.mxu0 %v3721_v36  ;;  %3788 = vmatpush1.bf16.msra.mxu1 %v3727_v47 }
 0x2c1   : > { %6530 = vmatprep.subr.msk.bf16.mxu0 %vm1746_vm10, %v3842_v62  ;;  %6532 = vmatprep.subr.msk.bf16.mxu1 %vm1746_vm10, %v3844_v3 }
 0x2c2   : > { %3764 = vmatprep.mubr.bf16.mxu0 %v8499_v32  ;;  %3805 = vmatprep.mubr.bf16.mxu1 %v8499_v32 }
 0x2c7   : > { %6526 = vmatmul.mubr.msk.bf16.vlgmr.msra.gmra.mxu0 %vm1742_vm11, %v6524_v49  ;;  %6528 = vmatmul.mubr.msk.bf16.vlgmr.msra.gmra.mxu1 %vm1742_vm11, %v6524_v49 }
 0x2c8   : > { %3875 = vmatpush1.bf16.msra.mxu0 %v3849_v48  ;;  %3916 = vmatpush1.bf16.msra.mxu1 %v3855_v9 }
 0x2c9   : > { %3892 = vmatprep.mubr.bf16.mxu0 %v8499_v32  ;;  %3933 = vmatprep.mubr.bf16.mxu1 %v8499_v32 }
 0x2cf   : > { %6531 = vmatmul.mubr.msk.bf16.vlgmr.msra.gmra.mxu0 %vm1742_vm11, %v6529_v31  ;;  %6533 = vmatmul.mubr.msk.bf16.vlgmr.msra.gmra.mxu1 %vm1742_vm11, %v6529_v31 }
 0x2d0   : > { %4066 = vmatprep.mubr.bf16.mxu0 %v8499_v32  ;;  %4107 = vmatprep.mubr.bf16.mxu1 %v8499_v32 }
 0x307   : > { %v1793_v27 = vpop.f32.mrf.mxu0  ;;  %v1834_v50 = vpop.f32.mrf.mxu1 }
 0x309   : > { %v1795_v6 = vpop.f32.mrf.mxu0  ;;  %v1836_v24 = vpop.f32.mrf.mxu1 }
 0x30b   : > { %v1797_v52 = vpop.f32.mrf.mxu0  ;;  %v1838_v8 = vpop.f32.mrf.mxu1 }
 0x30d   : > { %v1798_v51 = vpop.f32.mrf.mxu0  ;;  %v1839_v54 = vpop.f32.mrf.mxu1 }
 0x30f   : > { %v1890_v25 = vpop.f32.mrf.mxu0  ;;  %v1931_v34 = vpop.f32.mrf.mxu1 }
 0x310   : > { %v1891_v57 = vadd.f32 %v1890_v25, %v1793_v27  ;;  %v1932_v11 = vadd.f32 %v1931_v34, %v1834_v50 }
 0x311   : > { %v1892_v46 = vpop.f32.mrf.mxu0  ;;  %v1933_v23 = vpop.f32.mrf.mxu1 }
 0x312   : > { %v1893_v40 = vadd.f32 %v1892_v46, %v1795_v6  ;;  %v1934_v36 = vadd.f32 %v1933_v23, %v1836_v24 }
 0x313   : > { %v1894_v47 = vpop.f32.mrf.mxu0  ;;  %v1935_v14 = vpop.f32.mrf.mxu1 }
 0x315   : > { %v1895_v62 = vpop.f32.mrf.mxu0  ;;  %v1936_v13 = vpop.f32.mrf.mxu1 }
 0x317   : > { %v2014_v3 = vpop.f32.mrf.mxu0  ;;  %v2055_v61 = vpop.f32.mrf.mxu1 }
 0x318   : > { %v2062_v0 = vadd.f32 %v2014_v3, %v1891_v57  ;;  %v2064_v49 = vadd.f32 %v2055_v61, %v1932_v11 }
 0x319   : > { %v2016_v48 = vpop.f32.mrf.mxu0  ;;  %v2057_v9 = vpop.f32.mrf.mxu1 }
 0x31a   : > { %v2063_v31 = vadd.f32 %v2016_v48, %v1893_v40  ;;  %v2065_v52 = vadd.f32 %v2057_v9, %v1934_v36 }
 0x31b   : > { %v2018_v8 = vpop.f32.mrf.mxu0  ;;  %v2059_v51 = vpop.f32.mrf.mxu1 }
 0x31d   : > { %v2019_v27 = vpop.f32.mrf.mxu0  ;;  %v2060_v50 = vpop.f32.mrf.mxu1 }
 0x31f   : > { %v2142_v54 = vpop.f32.mrf.mxu0  ;;  %v2183_v25 = vpop.f32.mrf.mxu1 }
 0x320   : > { %v2190_v6 = vadd.f32 %v2142_v54, %v2062_v0  ;;  %v2192_v24 = vadd.f32 %v2183_v25, %v2064_v49 }
 0x321   : > { %v2144_v34 = vpop.f32.mrf.mxu0  ;;  %v2185_v46 = vpop.f32.mrf.mxu1 }
 0x322   : > { %v2191_v23 = vadd.f32 %v2144_v34, %v2063_v31  ;;  %v2193_v47 = vadd.f32 %v2185_v46, %v2065_v52 }
 0x323   : > { %v2146_v14 = vpop.f32.mrf.mxu0  ;;  %v2187_v62 = vpop.f32.mrf.mxu1 }
 0x325   : > { %v2147_v57 = vpop.f32.mrf.mxu0  ;;  %v2188_v11 = vpop.f32.mrf.mxu1 }
 0x327   : > { %v2270_v13 = vpop.f32.mrf.mxu0  ;;  %v2311_v3 = vpop.f32.mrf.mxu1 }
 0x328   : > { %v2318_v40 = vadd.f32 %v2270_v13, %v2190_v6  ;;  %v2320_v36 = vadd.f32 %v2311_v3, %v2192_v24 }
 0x329   : > { %v2272_v61 = vpop.f32.mrf.mxu0  ;;  %v2313_v48 = vpop.f32.mrf.mxu1 }
 0x32a   : > { %v2319_v9 = vadd.f32 %v2272_v61, %v2191_v23  ;;  %v2321_v8 = vadd.f32 %v2313_v48, %v2193_v47 }
 0x32b   : > { %v2274_v51 = vpop.f32.mrf.mxu0  ;;  %v2315_v27 = vpop.f32.mrf.mxu1 }
 0x32d   : > { %v2275_v0 = vpop.f32.mrf.mxu0  ;;  %v2316_v49 = vpop.f32.mrf.mxu1 }
 0x32f   : > { %v2398_v50 = vpop.f32.mrf.mxu0  ;;  %v2439_v54 = vpop.f32.mrf.mxu1 }
 0x330   : > { %v2446_v31 = vadd.f32 %v2398_v50, %v2318_v40  ;;  %v2448_v52 = vadd.f32 %v2439_v54, %v2320_v36 }
 0x331   : > { %v2400_v25 = vpop.f32.mrf.mxu0  ;;  %v2441_v34 = vpop.f32.mrf.mxu1 }
 0x332   : > { %v2447_v46 = vadd.f32 %v2400_v25, %v2319_v9  ;;  %v2449_v14 = vadd.f32 %v2441_v34, %v2321_v8 }
 0x333   : > { %v2402_v62 = vpop.f32.mrf.mxu0  ;;  %v2443_v57 = vpop.f32.mrf.mxu1 }
 0x335   : > { %v2403_v6 = vpop.f32.mrf.mxu0  ;;  %v2444_v24 = vpop.f32.mrf.mxu1 }
 0x337   : > { %v2526_v11 = vpop.f32.mrf.mxu0  ;;  %v2567_v13 = vpop.f32.mrf.mxu1 }
 0x338   : > { %v7829_v23 = vadd.f32 %v2526_v11, %v2446_v31  ;;  %v2576_v47 = vadd.f32 %v2567_v13, %v2448_v52 }
 0x339   : > { %v2528_v3 = vpop.f32.mrf.mxu0  ;;  %v2569_v61 = vpop.f32.mrf.mxu1 }
 0x33a   : > { %v2575_v48 = vadd.f32 %v2528_v3, %v2447_v46  ;;  %v7831_v51 = vadd.f32 %v2569_v61, %v2449_v14 }
 0x33b   : > { %v2530_v40 = vpop.f32.mrf.mxu0  ;;  %v2571_v36 = vpop.f32.mrf.mxu1 }
 0x33d   : > { %v2531_v27 = vpop.f32.mrf.mxu0  ;;  %v2572_v0 = vpop.f32.mrf.mxu1 }
 0x33f   : > { %v7833_v9 = vpop.f32.mrf.mxu0  ;;  %v2695_v8 = vpop.f32.mrf.mxu1 }
 0x340   : > { %v7835_v49 = vadd.f32 %v2695_v8, %v2576_v47 }
 0x341   : > { %v2656_v50 = vpop.f32.mrf.mxu0  ;;  %v7837_v54 = vpop.f32.mrf.mxu1 }
 0x342   : > { %v7839_v31 = vadd.f32 %v2656_v50, %v2575_v48 }
 0x343   : > { %v2658_v52 = vpop.f32.mrf.mxu0  ;;  %v2699_v25 = vpop.f32.mrf.mxu1 }
 0x345   : > { %v2659_v34 = vpop.f32.mrf.mxu0  ;;  %v2700_v46 = vpop.f32.mrf.mxu1 }
 0x347   : > { %v2763_v14 = vpop.f32.mrf.mxu0  ;;  %v2804_v62 = vpop.f32.mrf.mxu1 }
 0x349   : > { %v2765_v57 = vpop.f32.mrf.mxu0  ;;  %v2806_v6 = vpop.f32.mrf.mxu1 }
 0x34b   : > { %v2767_v24 = vpop.f32.mrf.mxu0  ;;  %v2808_v11 = vpop.f32.mrf.mxu1 }
 0x34d   : > { %v2768_v13 = vpop.f32.mrf.mxu0  ;;  %v2809_v3 = vpop.f32.mrf.mxu1 }
 0x34f   : > { %v2870_v61 = vpop.f32.mrf.mxu0  ;;  %v2911_v47 = vpop.f32.mrf.mxu1 }
 0x351   : > { %v2872_v40 = vpop.f32.mrf.mxu0  ;;  %v2913_v36 = vpop.f32.mrf.mxu1 }
 0x353   : > { %v2874_v27 = vpop.f32.mrf.mxu0  ;;  %v2915_v0 = vpop.f32.mrf.mxu1 }
 0x355   : > { %v2875_v48 = vpop.f32.mrf.mxu0  ;;  %v2916_v8 = vpop.f32.mrf.mxu1 }
 0x357   : > { %v2998_v50 = vpop.f32.mrf.mxu0  ;;  %v3039_v52 = vpop.f32.mrf.mxu1 }
 0x359   : > { %v3000_v25 = vpop.f32.mrf.mxu0  ;;  %v3041_v34 = vpop.f32.mrf.mxu1 }
 0x35b   : > { %v3002_v46 = vpop.f32.mrf.mxu0  ;;  %v3043_v20 = vpop.f32.mrf.mxu1 }
 0x35d   : > { %v3003_v56 = vpop.f32.mrf.mxu0  ;;  %v3044_v33 = vpop.f32.mrf.mxu1 }
 0x35f   : > { %v3126_v24 = vpop.f32.mrf.mxu0  ;;  %v3167_v11 = vpop.f32.mrf.mxu1 }
 0x361   : > { %v3128_v13 = vpop.f32.mrf.mxu0  ;;  %v3169_v3 = vpop.f32.mrf.mxu1 }
 0x363   : > { %v3130_v2 = vpop.f32.mrf.mxu0  ;;  %v3171_v22 = vpop.f32.mrf.mxu1 }
 0x365   : > { %v3131_v21 = vpop.f32.mrf.mxu0  ;;  %v3172_v5 = vpop.f32.mrf.mxu1 }
 0x367   : > { %v3254_v27 = vpop.f32.mrf.mxu0  ;;  %v3295_v0 = vpop.f32.mrf.mxu1 }
 0x369   : > { %v3256_v48 = vpop.f32.mrf.mxu0  ;;  %v3297_v8 = vpop.f32.mrf.mxu1 }
 0x36b   : > { %v3258_v19 = vpop.f32.mrf.mxu0  ;;  %v3299_v59 = vpop.f32.mrf.mxu1 }
 0x36c   : > { %v2702_v19 = vadd.f32 %v7833_v9, %v7829_v23 }
 0x36d   : > { %v3259_v38 = vpop.f32.mrf.mxu0  ;;  %v3300_v58 = vpop.f32.mrf.mxu1 }
 0x36e   : > { %v2705_v58 = vadd.f32 %v7837_v54, %v7831_v51  ;;  %v2811_v1 = vadd.f32 %v2763_v14, %v2702_v19 }
 0x36f   : > { %v3382_v46 = vpop.f32.mrf.mxu0  ;;  %v3423_v20 = vpop.f32.mrf.mxu1 }
 0x370   : > { %v2814_v60 = vadd.f32 %v2806_v6, %v2705_v58  ;;  %v2918_v4 = vadd.f32 %v2870_v61, %v2811_v1 }
 0x371   : > { %v3384_v56 = vpop.f32.mrf.mxu0  ;;  %v3425_v33 = vpop.f32.mrf.mxu1 }
 0x372   : > { %v2921_v41 = vadd.f32 %v2913_v36, %v2814_v60  ;;  %v3046_v23 = vadd.f32 %v2998_v50, %v2918_v4 }
 0x373   : > { %v3386_v30 = vpop.f32.mrf.mxu0  ;;  %v3427_v45 = vpop.f32.mrf.mxu1 }
 0x374   : > { %v2813_v30 = vadd.f32 %v2804_v62, %v7835_v49  ;;  %v3049_v51 = vadd.f32 %v3041_v34, %v2921_v41  ;;  %v3174_v54 = vadd.f32 %v3126_v24, %v3046_v23 }
 0x375   : > { %v3387_v53 = vpop.f32.mrf.mxu0  ;;  %v3428_v12 = vpop.f32.mrf.mxu1 }
 0x376   : > { %v2812_v12 = vadd.f32 %v2765_v57, %v7839_v31  ;;  %v2920_v44 = vadd.f32 %v2911_v47, %v2813_v30  ;;  %v3177_v10 = vadd.f32 %v3169_v3, %v3049_v51  ;;  %v3302_v31 = vadd.f32 %v3254_v27, %v3174_v54 }
 0x377   : > { %v3510_v2 = vpop.f32.mrf.mxu0  ;;  %v3551_v22 = vpop.f32.mrf.mxu1 }
 0x378   : > { %v2919_v37 = vadd.f32 %v2872_v40, %v2812_v12  ;;  %v3048_v9 = vadd.f32 %v3039_v52, %v2920_v44  ;;  %v3305_v47 = vadd.f32 %v3297_v8, %v3177_v10  ;;  %v3430_v40 = vadd.f32 %v3382_v46, %v3302_v31 }
 0x379   : > { %v3512_v21 = vpop.f32.mrf.mxu0  ;;  %v3553_v5 = vpop.f32.mrf.mxu1 }
 0x37a   : > { %v3047_v29 = vadd.f32 %v3000_v25, %v2919_v37  ;;  %v3176_v14 = vadd.f32 %v3167_v11, %v3048_v9  ;;  %v3433_v50 = vadd.f32 %v3425_v33, %v3305_v47  ;;  %v3558_v37 = vadd.f32 %v3510_v2, %v3430_v40 }
 0x37b   : > { %v3514_v35 = vpop.f32.mrf.mxu0  ;;  %v3555_v26 = vpop.f32.mrf.mxu1 }
 0x37c   : > { %v3175_v19 = vadd.f32 %v3128_v13, %v3047_v29  ;;  %v3304_v57 = vadd.f32 %v3295_v0, %v3176_v14  ;;  %v3561_v24 = vadd.f32 %v3553_v5, %v3433_v50 }
 0x37d   : > { %v3515_v59 = vpop.f32.mrf.mxu0  ;;  %v3556_v38 = vpop.f32.mrf.mxu1 }
 0x37e   : > { %v3303_v61 = vadd.f32 %v3256_v48, %v3175_v19  ;;  %v3432_v60 = vadd.f32 %v3423_v20, %v3304_v57  ;;  %v3949_v20 = vpop.permute.xlu0 %3948 }
 0x37f   : > { %v3638_v45 = vpop.f32.mrf.mxu0  ;;  %v3679_v53 = vpop.f32.mrf.mxu1 }
 0x380   : > { %v3431_v36 = vadd.f32 %v3384_v56, %v3303_v61  ;;  %v3560_v41 = vadd.f32 %v3551_v22, %v3432_v60  ;;  %v3686_v29 = vadd.f32 %v3638_v45, %v3558_v37 }
 0x381   : > { %v3640_v35 = vpop.f32.mrf.mxu0  ;;  %v3681_v26 = vpop.f32.mrf.mxu1 }
 0x382   : > { %v3559_v34 = vadd.f32 %v3512_v21, %v3431_v36  ;;  %v3688_v11 = vadd.f32 %v3679_v53, %v3560_v41  ;;  %v3689_v0 = vadd.f32 %v3681_v26, %v3561_v24 }
 0x383   : > { %v3642_v59 = vpop.f32.mrf.mxu0  ;;  %v3683_v38 = vpop.f32.mrf.mxu1 }
 0x384   : > { %v3687_v27 = vadd.f32 %v3640_v35, %v3559_v34 }
 0x385   : > { %v3643_v49 = vpop.f32.mrf.mxu0  ;;  %v3684_v62 = vpop.f32.mrf.mxu1 }
 0x386   : > { %v6534_v49 = vld [vmem:[%s8396_s6 + $0x8] sm:$0xf] }
 0x387   : > { %v3766_v1 = vpop.f32.mrf.mxu0  ;;  %v3807_v6 = vpop.f32.mrf.mxu1 }
 0x388   : > { %v3814_v48 = vadd.f32 %v3766_v1, %v3686_v29  ;;  %v3816_v10 = vadd.f32 %v3807_v6, %v3688_v11 }
 0x389   : > { %v3768_v4 = vpop.f32.mrf.mxu0  ;;  %v3809_v44 = vpop.f32.mrf.mxu1 }
 0x38a   : > { %v3815_v58 = vadd.f32 %v3768_v4, %v3687_v27  ;;  %v3817_v56 = vadd.f32 %v3809_v44, %v3689_v0  ;;  %v6536_v27 = vld [vmem:[%s8395_s5 + $0x26] sm:$0x3] }
 0x38b   : > { %v3770_v52 = vpop.f32.mrf.mxu0  ;;  %v3811_v25 = vpop.f32.mrf.mxu1 }
 0x38d   : > { %v3771_v13 = vpop.f32.mrf.mxu0  ;;  %v3812_v3 = vpop.f32.mrf.mxu1 }
 0x38f   : > { %v3894_v8 = vpop.f32.mrf.mxu0  ;;  %v3935_v46 = vpop.f32.mrf.mxu1 }
 0x390   : > { %v3942_v33 = vadd.f32 %v3894_v8, %v3814_v48  ;;  %v3944_v2 = vadd.f32 %v3935_v46, %v3816_v10 }
 0x391   : > { %v3896_v22 = vpop.f32.mrf.mxu0  ;;  %v3937_v30 = vpop.f32.mrf.mxu1 }
 0x392   : > { %v3951_v12 = vadd.f32 %v3949_v20, %v3942_v33  ;;  %v3943_v21 = vadd.f32 %v3896_v22, %v3815_v58  ;;  %v3945_v5 = vadd.f32 %v3937_v30, %v3817_v56  ;;  %v3953_v35 = vadd.f32 %v3949_v20, %v3944_v2 }
 0x393   : > { %v3898_v45 = vpop.f32.mrf.mxu0  ;;  %v3939_v53 = vpop.f32.mrf.mxu1 }
 0x394   : > { %v7847_v23 = vmax.f32 %v3951_v12, 0.0  ;;  %v3954_v26 = vadd.f32 %v3949_v20, %v3945_v5  ;;  %v3952_v38 = vadd.f32 %v3949_v20, %v3943_v21  ;;  %v7853_v54 = vmax.f32 %v3953_v35, 0.0 }
 0x395   : > { %v3899_v9 = vpop.f32.mrf.mxu0  ;;  %v3940_v59 = vpop.f32.mrf.mxu1 }
 0x396   : > { %v7849_v51 = vmax.f32 %v3954_v26, 0.0  ;;  %3995 = vrot.lane.b32.xlu0 %v7847_v23, %s6787_s15  ;;  %v7857_v14 = vmax.f32 %v3952_v38, 0.0  ;;  %v6535_v26 = vld [vmem:[%s8395_s5 + $0x24] sm:$0x3] }
 0x398   : > { %3992 = vrot.lane.b32.xlu1 %v7849_v51, %s6787_s15 }
 0x39a   : > { %3999 = vrot.lane.b32.xlu0 %v7853_v54, %s6787_s15 }
 0x39c   : > { %3997 = vrot.lane.b32.xlu1 %v7857_v14, %s6787_s15 }
 0x39e   : > { %3968 = vrot.lane.b32.xlu0 %v7847_v23, %s6789_s12 }
 0x3a0   : > { %3962 = vrot.lane.b32.xlu1 %v7849_v51, %s6789_s12 }
 0x3a2   : > { %3972 = vrot.lane.b32.xlu0 %v7853_v54, %s6789_s12 }
 0x3a4   : > { %3970 = vrot.lane.b32.xlu1 %v7857_v14, %s6789_s12 }
 0x3a6   : > { %4216 = vrot.lane.b32.xlu0 %v7847_v23, %s6790_s19 }
 0x3a8   : > { %4213 = vrot.lane.b32.xlu1 %v7849_v51, %s6790_s19 }
 0x3aa   : > { %4220 = vrot.lane.b32.xlu0 %v7853_v54, %s6790_s19 }
 0x3ac   : > { %4218 = vrot.lane.b32.xlu1 %v7857_v14, %s6790_s19 }
 0x3ae   : > { %4344 = vrot.lane.b32.xlu0 %v7847_v23, %s6791_s21 }
 0x3b0   : > { %4341 = vrot.lane.b32.xlu1 %v7849_v51, %s6791_s21 }
 0x3b2   : > { %4348 = vrot.lane.b32.xlu0 %v7853_v54, %s6791_s21 }
 0x3b4   : > { %4346 = vrot.lane.b32.xlu1 %v7857_v14, %s6791_s21 }
 0x3b6   : > { %4578 = vrot.lane.b32.xlu0 %v7857_v14, %s6792_s9 }
 0x3b8   : > { %4576 = vrot.lane.b32.xlu1 %v7847_v23, %s6792_s9 }
 0x3ba   : > { %4582 = vrot.lane.b32.xlu0 %v7849_v51, %s6792_s9 }
 0x3bc   : > { %4580 = vrot.lane.b32.xlu1 %v7853_v54, %s6792_s9 }
 0x3be   : > { %4706 = vrot.lane.b32.xlu0 %v7857_v14, %s6793_s11 }
 0x3c0   : > { %4704 = vrot.lane.b32.xlu1 %v7847_v23, %s6793_s11 }
 0x3c2   : > { %4710 = vrot.lane.b32.xlu0 %v7849_v51, %s6793_s11 }
 0x3c4   : > { %4708 = vrot.lane.b32.xlu1 %v7853_v54, %s6793_s11 }
 0x3c6   : > { %4834 = vrot.lane.b32.xlu0 %v7857_v14, %s8498_s20 }
 0x3c8   : > { %4832 = vrot.lane.b32.xlu1 %v7847_v23, %s8498_s20 }
 0x3ca   : > { %4838 = vrot.lane.b32.xlu0 %v7849_v51, %s8498_s20 }
 0x3cc   : > { %4836 = vrot.lane.b32.xlu1 %v7853_v54, %s8498_s20 }
 0x3ce   : > { %4962 = vrot.lane.b32.xlu0 %v7857_v14, %s6795_s29 }
 0x3d0   : > { %4960 = vrot.lane.b32.xlu1 %v7847_v23, %s6795_s29 }
 0x3d2   : > { %4966 = vrot.lane.b32.xlu0 %v7849_v51, %s6795_s29 }
 0x3d4   : > { %4964 = vrot.lane.b32.xlu1 %v7853_v54, %s6795_s29 }
 0x3d8   : > { %5090 = vperm.xlu1 %6689, %v6534_v49  }
 0x408   : > { %v3996_v62 = vpop.permute.xlu0 %3995 }
 0x40a   : > { %v3993_v19 = vpop.permute.xlu1 %3992 }
 0x40b   : > { %v4008_v31 = vsel %vm415_vm0, %v3993_v19, %v3996_v62 }
 0x40c   : > { %v4009_v57 = vmul.f32 %v4008_v31, %v7048_v16  ;;  %v4000_v1 = vpop.permute.xlu0 %3999 }
 0x40d   : > { %v4003_v6 = vsel %vm415_vm0, %v4000_v1, %v3993_v19 }
 0x40e   : > { %v4012_v61 = vmul.f32 %v4003_v6, %v7051_v17  ;;  %v3998_v47 = vpop.permute.xlu1 %3997  ;;  %v4015_v4 = vpack.c.bf16 %v4009_v57, %v4009_v57  ;;  %v8514_v57 = vld [vmem:[#allocation8_spill] sm:$0xff] }
 0x40f   : > { %v4001_v40 = vsel %vm415_vm0, %v3996_v62, %v3998_v47  ;;  %v4002_v60 = vsel %vm415_vm0, %v3998_v47, %v4000_v1 }
 0x410   : > { %v4018_v44 = vpack.c.bf16 %v4012_v61, %v4012_v61  ;;  %v4010_v36 = vmul.f32 %v4001_v40, %v7045_v15  ;;  %v4011_v50 = vmul.f32 %v4002_v60, %v7054_v18  ;;  %v3969_v37 = vpop.permute.xlu0 %3968  ;;  %v4023_v11 = vsel %vm1746_vm10, %v4015_v4, 0  ;;  %v8515_v4 = vld [vmem:[#allocation9_spill] sm:$0xff] }
 0x412   : > { %v4016_v41 = vpack.c.bf16 %v4010_v36, %v4010_v36  ;;  %v4017_v52 = vpack.c.bf16 %v4011_v50, %v4011_v50  ;;  %6539 = vmatprep.subr.msk.bf16.mxu1 %vm1746_vm10, %v4018_v44  ;;  %v3963_v25 = vpop.permute.xlu1 %3962 }
 0x413   : > { %v3981_v34 = vsel %vm365_vm1, %v3963_v25, %v3969_v37 }
 0x414   : > { %v3982_v24 = vmul.f32 %v3981_v34, %v7066_v28  ;;  %v3973_v29 = vpop.permute.xlu0 %3972  ;;  %6537 = vmatprep.subr.msk.bf16.mxu0 %vm1746_vm10, %v4016_v41  ;;  %v4029_v13 = vsel %vm1746_vm10, %v4017_v52, 0  ;;  %v6545_v52 = vld [vmem:[%s8395_s5 + $0x28] sm:$0x3] }
 0x415   : > { %v3976_v3 = vsel %vm365_vm1, %v3973_v29, %v3963_v25  ;;  %4049 = vmatpush1.bf16.msra.mxu0 %v4023_v11  ;;  %4090 = vmatpush1.bf16.msra.mxu1 %v4029_v13  ;;  %v8516_v25 = vld [vmem:[#allocation11_spill] sm:$0xff] }
 0x416   : > { %v3985_v0 = vmul.f32 %v3976_v3, %v7080_v42  ;;  %v3971_v48 = vpop.permute.xlu1 %3970  ;;  %v3988_v10 = vpack.c.bf16 %v3982_v24, %v3982_v24 }
 0x417   : > { %v3974_v8 = vsel %vm365_vm1, %v3969_v37, %v3971_v48  ;;  %v3975_v46 = vsel %vm365_vm1, %v3971_v48, %v3973_v29  ;;  %v8518_v48 = vld [vmem:[#allocation12_spill] sm:$0xff] }
 0x418   : > { %v3991_v20 = vpack.c.bf16 %v3985_v0, %v3985_v0  ;;  %v3983_v58 = vmul.f32 %v3974_v8, %v7074_v39  ;;  %v3984_v56 = vmul.f32 %v3975_v46, %v7083_v43  ;;  %v4217_v33 = vpop.permute.xlu0 %4216  ;;  %6538 = vmatmul.mubr.msk.bf16.vlgmr.msra.gmra.mxu0 %vm1742_vm11, %v6536_v27  ;;  %6540 = vmatmul.mubr.msk.bf16.vlgmr.msra.gmra.mxu1 %vm1742_vm11, %v6536_v27  ;;  %v4120_v45 = vsel %vm1746_vm10, %v3988_v10, 0  ;;  %v8517_v27 = vld [vmem:[#allocation10_spill] sm:$0xff] }
 0x419   : > { %4163 = vmatprep.mubr.bf16.mxu0 %v8499_v32  ;;  %4204 = vmatprep.mubr.bf16.mxu1 %v8499_v32 }
 0x41a   : > { %v3989_v2 = vpack.c.bf16 %v3983_v58, %v3983_v58  ;;  %v3990_v22 = vpack.c.bf16 %v3984_v56, %v3984_v56  ;;  %6543 = vmatprep.subr.msk.bf16.mxu1 %vm1746_vm10, %v3991_v20  ;;  %v4214_v30 = vpop.permute.xlu1 %4213  ;;  %v4474_v56 = vpack.c.bf16 %v7849_v51, %v7849_v51 }
 0x41b   : > { %v4229_v12 = vsel %vm662_vm4, %v4214_v30, %v4217_v33 }
 0x41c   : > { %v4230_v21 = vmul.f32 %v4229_v12, %v7100_v55  ;;  %v4221_v5 = vpop.permute.xlu0 %4220  ;;  %6541 = vmatprep.subr.msk.bf16.mxu0 %vm1746_vm10, %v3989_v2  ;;  %v4126_v53 = vsel %vm1746_vm10, %v3990_v22, 0  ;;  %v4473_v2 = vpack.c.bf16 %v7853_v54, %v7853_v54  ;;  %v8519_v54 = vld [vmem:[#allocation15_spill] sm:$0xff] }
 0x41d   : > { %v4224_v35 = vsel %vm662_vm4, %v4221_v5, %v4214_v30  ;;  %4146 = vmatpush1.bf16.msra.mxu0 %v4120_v45  ;;  %4187 = vmatpush1.bf16.msra.mxu1 %v4126_v53 }
 0x41e   : > { %v4233_v9 = vmul.f32 %v4224_v35, %v7114_v7  ;;  %v4219_v59 = vpop.permute.xlu1 %4218  ;;  %v4236_v38 = vpack.c.bf16 %v4230_v21, %v4230_v21  ;;  %v8520_v35 = vld [vmem:[#allocation13_spill] sm:$0xff] }
 0x41f   : > { %v4222_v49 = vsel %vm662_vm4, %v4217_v33, %v4219_v59  ;;  %v4223_v62 = vsel %vm662_vm4, %v4219_v59, %v4221_v5  ;;  %v4471_v33 = vpack.c.bf16 %v7847_v23, %v7847_v23  ;;  %v4472_v5 = vpack.c.bf16 %v7857_v14, %v7857_v14  ;;  %v6550_v23 = vld [vmem:[%s8395_s5 + $0x2a] sm:$0x3] }
 0x420   : > { %v4239_v19 = vpack.c.bf16 %v4233_v9, %v4233_v9  ;;  %v4231_v31 = vmul.f32 %v4222_v49, %v7108_v63  ;;  %v4232_v1 = vmul.f32 %v4223_v62, %v8514_v57  ;;  %v4345_v6 = vpop.permute.xlu0 %4344  ;;  %6542 = vmatmul.mubr.msk.bf16.vlgmr.msra.gmra.mxu0 %vm1742_vm11, %v6535_v26  ;;  %6544 = vmatmul.mubr.msk.bf16.vlgmr.msra.gmra.mxu1 %vm1742_vm11, %v6535_v26  ;;  %v4244_v50 = vsel %vm1746_vm10, %v4236_v38, 0  ;;  %v8521_v49 = vld [vmem:[#allocation14_spill] sm:$0xff] }
 0x421   : > { %4287 = vmatprep.mubr.bf16.mxu0 %v8499_v32  ;;  %4328 = vmatprep.mubr.bf16.mxu1 %v8499_v32  ;;  %v4479_v59 = vsel %vm1746_vm10, %v4471_v33, 0 }
 0x422   : > { %v4237_v61 = vpack.c.bf16 %v4231_v31, %v4231_v31  ;;  %v4238_v47 = vpack.c.bf16 %v4232_v1, %v4232_v1  ;;  %6548 = vmatprep.subr.msk.bf16.mxu1 %vm1746_vm10, %v4239_v19  ;;  %v4342_v40 = vpop.permute.xlu1 %4341  ;;  %v8522_v19 = vld [vmem:[#allocation16_spill] sm:$0xff] }
 0x423   : > { %v4357_v60 = vsel %vm814_vm5, %v4342_v40, %v4345_v6 }
 0x424   : > { %v4358_v44 = vmul.f32 %v4357_v60, %v8515_v4  ;;  %v4349_v36 = vpop.permute.xlu0 %4348  ;;  %6546 = vmatprep.subr.msk.bf16.mxu0 %vm1746_vm10, %v4237_v61  ;;  %v4250_v37 = vsel %vm1746_vm10, %v4238_v47, 0 }
 0x425   : > { %v4352_v41 = vsel %vm814_vm5, %v4349_v36, %v4342_v40  ;;  %4270 = vmatpush1.bf16.msra.mxu0 %v4244_v50  ;;  %4311 = vmatpush1.bf16.msra.mxu1 %v4250_v37  ;;  %v6555_v37 = vld [vmem:[%s8395_s5 + $0x2c] sm:$0x3] }
 0x426   : > { %v4361_v34 = vmul.f32 %v4352_v41, %v8516_v25  ;;  %v4347_v24 = vpop.permute.xlu1 %4346  ;;  %v4364_v29 = vpack.c.bf16 %v4358_v44, %v4358_v44  ;;  %v8523_v41 = vld [vmem:[#allocation19_spill] sm:$0xff] }
 0x427   : > { %v4350_v11 = vsel %vm814_vm5, %v4345_v6, %v4347_v24  ;;  %v4351_v13 = vsel %vm814_vm5, %v4347_v24, %v4349_v36  ;;  %v4485_v6 = vsel %vm1746_vm10, %v4473_v2, 0  ;;  %v8524_v24 = vld [vmem:[#allocation17_spill] sm:$0xff] }
 0x428   : > { %v4367_v3 = vpack.c.bf16 %v4361_v34, %v4361_v34  ;;  %v4359_v0 = vmul.f32 %v4350_v11, %v8517_v27  ;;  %v4360_v10 = vmul.f32 %v4351_v13, %v8518_v48  ;;  %v4579_v8 = vpop.permute.xlu0 %4578  ;;  %6547 = vmatmul.mubr.msk.bf16.vlgmr.msra.gmra.mxu0 %vm1742_vm11, %v6545_v52  ;;  %6549 = vmatmul.mubr.msk.bf16.vlgmr.msra.gmra.mxu1 %vm1742_vm11, %v6545_v52  ;;  %v4372_v12 = vsel %vm1746_vm10, %v4364_v29, 0 }
 0x429   : > { %4415 = vmatprep.mubr.bf16.mxu0 %v8499_v32  ;;  %4456 = vmatprep.mubr.bf16.mxu1 %v8499_v32 }
 0x42a   : > { %v4365_v46 = vpack.c.bf16 %v4359_v0, %v4359_v0  ;;  %v4366_v20 = vpack.c.bf16 %v4360_v10, %v4360_v10  ;;  %6553 = vmatprep.subr.msk.bf16.mxu1 %vm1746_vm10, %v4367_v3  ;;  %v4577_v58 = vpop.permute.xlu1 %4576  ;;  %v8525_v10 = vld [vmem:[#allocation18_spill] sm:$0xff] }
 0x42b   : > { %v4584_v22 = vsel %vm1072_vm6, %v4577_v58, %v4579_v8 }
 0x42c   : > { %v4583_v30 = vpop.permute.xlu0 %4582  ;;  %6551 = vmatprep.subr.msk.bf16.mxu0 %vm1746_vm10, %v4365_v46  ;;  %v4378_v21 = vsel %vm1746_vm10, %v4366_v20, 0  ;;  %v4593_v26 = vmul.f32 %v4584_v22, %v8520_v35  ;;  %v8526_v46 = vld [vmem:[#allocation20_spill] sm:$0xff] }
 0x42d   : > { %v4592_v51 = vsel %vm1072_vm6, %v4583_v30, %v4577_v58  ;;  %4398 = vmatpush1.bf16.msra.mxu0 %v4372_v12  ;;  %4439 = vmatpush1.bf16.msra.mxu1 %v4378_v21 }
 0x42e   : > { %v4596_v45 = vmul.f32 %v4592_v51, %v8519_v54  ;;  %6558 = vmatprep.subr.msk.bf16.mxu1 %vm1746_vm10, %v4474_v56  ;;  %v4581_v53 = vpop.permute.xlu1 %4580  ;;  %6556 = vmatprep.subr.msk.bf16.mxu0 %vm1746_vm10, %v4472_v5  ;;  %v4599_v40 = vpack.c.bf16 %v4593_v26, %v4593_v26  ;;  %v6560_v51 = vld [vmem:[%s8395_s5 + $0x2e] sm:$0x3] }
 0x42f   : > { %v4585_v9 = vsel %vm1072_vm6, %v4579_v8, %v4581_v53  ;;  %v4586_v14 = vsel %vm1072_vm6, %v4581_v53, %v4583_v30  ;;  %v8528_v26 = vld [vmem:[#allocation21_spill] sm:$0xff] }
 0x430   : > { %v4602_v38 = vpack.c.bf16 %v4596_v45, %v4596_v45  ;;  %v4594_v62 = vmul.f32 %v4585_v9, %v8521_v49  ;;  %v4595_v31 = vmul.f32 %v4586_v14, %v8522_v19  ;;  %v4707_v1 = vpop.permute.xlu0 %4706  ;;  %6552 = vmatmul.mubr.msk.bf16.vlgmr.msra.gmra.mxu0 %vm1742_vm11, %v6550_v23  ;;  %6554 = vmatmul.mubr.msk.bf16.vlgmr.msra.gmra.mxu1 %vm1742_vm11, %v6550_v23  ;;  %v4607_v3 = vsel %vm1746_vm10, %v4599_v40, 0  ;;  %v8527_v23 = vld [vmem:[#allocation23_spill] sm:$0xff] }
 0x431   : > { %4505 = vmatpush1.bf16.msra.mxu0 %v4479_v59  ;;  %4546 = vmatpush1.bf16.msra.mxu1 %v4485_v6  ;;  %v8530_v6 = vld [vmem:[#allocation24_spill] sm:$0xff] }
 0x432   : > { %v4600_v61 = vpack.c.bf16 %v4594_v62, %v4594_v62  ;;  %6563 = vmatprep.subr.msk.bf16.mxu1 %vm1746_vm10, %v4602_v38  ;;  %v4705_v47 = vpop.permute.xlu1 %4704  ;;  %4522 = vmatprep.mubr.bf16.mxu0 %v8499_v32  ;;  %v4601_v60 = vpack.c.bf16 %v4595_v31, %v4595_v31  ;;  %v8529_v31 = vld [vmem:[#allocation22_spill] sm:$0xff] }
 0x433   : > { %4563 = vmatprep.mubr.bf16.mxu1 %v8499_v32  ;;  %v4712_v44 = vsel %vm1224_vm7, %v4705_v47, %v4707_v1 }
 0x434   : > { %v4711_v36 = vpop.permute.xlu0 %4710  ;;  %6561 = vmatprep.subr.msk.bf16.mxu0 %vm1746_vm10, %v4600_v61  ;;  %v4721_v29 = vmul.f32 %v4712_v44, %v8524_v24  ;;  %v4613_v56 = vsel %vm1746_vm10, %v4601_v60, 0 }
 0x435   : > { %v4720_v50 = vsel %vm1224_vm7, %v4711_v36, %v4705_v47 }
 0x436   : > { %v4724_v52 = vmul.f32 %v4720_v50, %v8523_v41  ;;  %v4709_v34 = vpop.permute.xlu1 %4708  ;;  %v4727_v22 = vpack.c.bf16 %v4721_v29, %v4721_v29  ;;  %v6565_v29 = vld [vmem:[%s8395_s5 + $0x30] sm:$0x3] }
 0x437   : > { %v4713_v11 = vsel %vm1224_vm7, %v4707_v1, %v4709_v34  ;;  %v4714_v13 = vsel %vm1224_vm7, %v4709_v34, %v4711_v36 }
 0x438   : > { %v4730_v0 = vpack.c.bf16 %v4724_v52, %v4724_v52  ;;  %v4722_v8 = vmul.f32 %v4713_v11, %v8525_v10  ;;  %v4723_v20 = vmul.f32 %v4714_v13, %v8526_v46  ;;  %v4835_v58 = vpop.permute.xlu0 %4834  ;;  %6557 = vmatmul.mubr.msk.bf16.vlgmr.msra.gmra.mxu0 %vm1742_vm11, %v6555_v37  ;;  %6559 = vmatmul.mubr.msk.bf16.vlgmr.msra.gmra.mxu1 %vm1742_vm11, %v6555_v37  ;;  %v4735_v38 = vsel %vm1746_vm10, %v4727_v22, 0  ;;  %v8531_v11 = vld [vmem:[#allocation27_spill] sm:$0xff] }
 0x439   : > { %4633 = vmatpush1.bf16.msra.mxu0 %v4607_v3  ;;  %4674 = vmatpush1.bf16.msra.mxu1 %v4613_v56 }
 0x43a   : > { %v4728_v33 = vpack.c.bf16 %v4722_v8, %v4722_v8  ;;  %6568 = vmatprep.subr.msk.bf16.mxu1 %vm1746_vm10, %v4730_v0  ;;  %v4833_v2 = vpop.permute.xlu1 %4832  ;;  %4650 = vmatprep.mubr.bf16.mxu0 %v8499_v32  ;;  %v4729_v30 = vpack.c.bf16 %v4723_v20, %v4723_v20  ;;  %v8532_v0 = vld [vmem:[#allocation25_spill] sm:$0xff] }
 0x43b   : > { %4691 = vmatprep.mubr.bf16.mxu1 %v8499_v32  ;;  %v4840_v12 = vsel %vm1376_vm8, %v4833_v2, %v4835_v58 }
 0x43c   : > { %v4839_v21 = vpop.permute.xlu0 %4838  ;;  %6566 = vmatprep.subr.msk.bf16.mxu0 %vm1746_vm10, %v4728_v33  ;;  %v4849_v9 = vmul.f32 %v4840_v12, %v8528_v26  ;;  %v4741_v40 = vsel %vm1746_vm10, %v4729_v30, 0  ;;  %v8534_v30 = vld [vmem:[#allocation28_spill] sm:$0xff] }
 0x43d   : > { %v4848_v5 = vsel %vm1376_vm8, %v4839_v21, %v4833_v2  ;;  %v8533_v2 = vld [vmem:[#allocation26_spill] sm:$0xff] }
 0x43e   : > { %v4852_v45 = vmul.f32 %v4848_v5, %v8527_v23  ;;  %v4837_v53 = vpop.permute.xlu1 %4836  ;;  %v4855_v36 = vpack.c.bf16 %v4849_v9, %v4849_v9 }
 0x43f   : > { %v4841_v14 = vsel %vm1376_vm8, %v4835_v58, %v4837_v53  ;;  %v4842_v59 = vsel %vm1376_vm8, %v4837_v53, %v4839_v21  ;;  %v6570_v53 = vld [vmem:[%s8395_s5 + $0x32] sm:$0x3] }
 0x440   : > { %v4858_v62 = vpack.c.bf16 %v4852_v45, %v4852_v45  ;;  %v4850_v1 = vmul.f32 %v4841_v14, %v8529_v31  ;;  %v4851_v61 = vmul.f32 %v4842_v59, %v8530_v6  ;;  %v4963_v47 = vpop.permute.xlu0 %4962  ;;  %6562 = vmatmul.mubr.msk.bf16.vlgmr.msra.gmra.mxu0 %vm1742_vm11, %v6560_v51  ;;  %6564 = vmatmul.mubr.msk.bf16.vlgmr.msra.gmra.mxu1 %vm1742_vm11, %v6560_v51  ;;  %v4863_v56 = vsel %vm1746_vm10, %v4855_v36, 0  ;;  %v6575_v59 = vld [vmem:[%s8395_s5 + $0x34] sm:$0x3] }
 0x441   : > { %4761 = vmatpush1.bf16.msra.mxu0 %v4735_v38  ;;  %4802 = vmatpush1.bf16.msra.mxu1 %v4741_v40 }
 0x442   : > { %v4856_v60 = vpack.c.bf16 %v4850_v1, %v4850_v1  ;;  %6573 = vmatprep.subr.msk.bf16.mxu1 %vm1746_vm10, %v4858_v62  ;;  %v4961_v44 = vpop.permute.xlu1 %4960  ;;  %4778 = vmatprep.mubr.bf16.mxu0 %v8499_v32  ;;  %v4857_v50 = vpack.c.bf16 %v4851_v61, %v4851_v61 }
 0x443   : > { %4819 = vmatprep.mubr.bf16.mxu1 %v8499_v32  ;;  %v4968_v37 = vsel %vm1528_vm9, %v4961_v44, %v4963_v47 }
 0x444   : > { %v4967_v52 = vpop.permute.xlu0 %4966  ;;  %6571 = vmatprep.subr.msk.bf16.mxu0 %vm1746_vm10, %v4856_v60  ;;  %v4977_v8 = vmul.f32 %v4968_v37, %v8532_v0  ;;  %v4869_v21 = vsel %vm1746_vm10, %v4857_v50, 0 }
 0x445   : > { %v4976_v34 = vsel %vm1528_vm9, %v4967_v52, %v4961_v44 }
 0x446   : > { %v4980_v13 = vmul.f32 %v4976_v34, %v8531_v11  ;;  %v4965_v3 = vpop.permute.xlu1 %4964  ;;  %v4983_v51 = vpack.c.bf16 %v4977_v8, %v4977_v8 }
 0x447   : > { %v4969_v20 = vsel %vm1528_vm9, %v4963_v47, %v4965_v3  ;;  %v4970_v58 = vsel %vm1528_vm9, %v4965_v3, %v4967_v52 }
 0x448   : > { %v4986_v33 = vpack.c.bf16 %v4980_v13, %v4980_v13  ;;  %v4978_v22 = vmul.f32 %v4969_v20, %v8533_v2  ;;  %v4979_v12 = vmul.f32 %v4970_v58, %v8534_v30  ;;  %6567 = vmatmul.mubr.msk.bf16.vlgmr.msra.gmra.mxu0 %vm1742_vm11, %v6565_v29  ;;  %6569 = vmatmul.mubr.msk.bf16.vlgmr.msra.gmra.mxu1 %vm1742_vm11, %v6565_v29  ;;  %v4991_v9 = vsel %vm1746_vm10, %v4983_v51, 0 }
 0x449   : > { %4889 = vmatpush1.bf16.msra.mxu0 %v4863_v56  ;;  %4930 = vmatpush1.bf16.msra.mxu1 %v4869_v21 }
 0x44a   : > { %v4984_v5 = vpack.c.bf16 %v4978_v22, %v4978_v22  ;;  %6578 = vmatprep.subr.msk.bf16.mxu1 %vm1746_vm10, %v4986_v33  ;;  %4906 = vmatprep.mubr.bf16.mxu0 %v8499_v32  ;;  %v4985_v45 = vpack.c.bf16 %v4979_v12, %v4979_v12 }
 0x44b   : > { %4947 = vmatprep.mubr.bf16.mxu1 %v8499_v32 }
 0x44c   : > { %6576 = vmatprep.subr.msk.bf16.mxu0 %vm1746_vm10, %v4984_v5  ;;  %v4997_v14 = vsel %vm1746_vm10, %v4985_v45, 0 }
 0x450   : > { %6572 = vmatmul.mubr.msk.bf16.vlgmr.msra.gmra.mxu0 %vm1742_vm11, %v6570_v53  ;;  %6574 = vmatmul.mubr.msk.bf16.vlgmr.msra.gmra.mxu1 %vm1742_vm11, %v6570_v53 }
 0x451   : > { %5017 = vmatpush1.bf16.msra.mxu0 %v4991_v9  ;;  %5058 = vmatpush1.bf16.msra.mxu1 %v4997_v14 }
 0x452   : > { %5034 = vmatprep.mubr.bf16.mxu0 %v8499_v32  ;;  %5075 = vmatprep.mubr.bf16.mxu1 %v8499_v32 }
 0x458   : > { %6577 = vmatmul.mubr.msk.bf16.vlgmr.msra.gmra.mxu0 %vm1742_vm11, %v6575_v59  ;;  %6579 = vmatmul.mubr.msk.bf16.vlgmr.msra.gmra.mxu1 %vm1742_vm11, %v6575_v59 }
 0x459   : > { %5224 = vmatprep.mubr.bf16.mxu0 %v8499_v32  ;;  %5265 = vmatprep.mubr.bf16.mxu1 %v8499_v32 }
 0x4d8   : > { %v4068_v38 = vpop.f32.mrf.mxu0  ;;  %v4109_v62 = vpop.f32.mrf.mxu1 }
 0x4da   : > { %v4070_v1 = vpop.f32.mrf.mxu0  ;;  %v4111_v61 = vpop.f32.mrf.mxu1 }
 0x4dc   : > { %v4072_v47 = vpop.f32.mrf.mxu0  ;;  %v4113_v40 = vpop.f32.mrf.mxu1 }
 0x4de   : > { %v4073_v60 = vpop.f32.mrf.mxu0  ;;  %v4114_v44 = vpop.f32.mrf.mxu1 }
 0x4e0   : > { %v4165_v36 = vpop.f32.mrf.mxu0  ;;  %v4206_v50 = vpop.f32.mrf.mxu1 }
 0x4e1   : > { %v4166_v31 = vadd.f32 %v4165_v36, %v4068_v38  ;;  %v4207_v26 = vadd.f32 %v4206_v50, %v4109_v62 }
 0x4e2   : > { %v4167_v37 = vpop.f32.mrf.mxu0  ;;  %v4208_v52 = vpop.f32.mrf.mxu1 }
 0x4e4   : > { %v4169_v34 = vpop.f32.mrf.mxu0  ;;  %v4210_v29 = vpop.f32.mrf.mxu1 }
 0x4e6   : > { %v4170_v13 = vpop.f32.mrf.mxu0  ;;  %v4211_v3 = vpop.f32.mrf.mxu1 }
 0x4e8   : > { %v4289_v8 = vpop.f32.mrf.mxu0  ;;  %v4330_v20 = vpop.f32.mrf.mxu1 }
 0x4ea   : > { %v4291_v58 = vpop.f32.mrf.mxu0  ;;  %v4332_v56 = vpop.f32.mrf.mxu1 }
 0x4ec   : > { %v4293_v33 = vpop.f32.mrf.mxu0  ;;  %v4334_v22 = vpop.f32.mrf.mxu1 }
 0x4ee   : > { %v4294_v12 = vpop.f32.mrf.mxu0  ;;  %v4335_v21 = vpop.f32.mrf.mxu1 }
 0x4f0   : > { %v4417_v5 = vpop.f32.mrf.mxu0  ;;  %v4458_v51 = vpop.f32.mrf.mxu1 }
 0x4f2   : > { %v4419_v45 = vpop.f32.mrf.mxu0  ;;  %v4460_v53 = vpop.f32.mrf.mxu1 }
 0x4f4   : > { %v4421_v9 = vpop.f32.mrf.mxu0  ;;  %v4462_v14 = vpop.f32.mrf.mxu1 }
 0x4f6   : > { %v4422_v59 = vpop.f32.mrf.mxu0  ;;  %v4463_v47 = vpop.f32.mrf.mxu1 }
 0x4f8   : > { %v4524_v40 = vpop.f32.mrf.mxu0  ;;  %v4565_v60 = vpop.f32.mrf.mxu1 }
 0x4fa   : > { %v4526_v44 = vpop.f32.mrf.mxu0  ;;  %v4567_v34 = vpop.f32.mrf.mxu1 }
 0x4fc   : > { %v4528_v29 = vpop.f32.mrf.mxu0  ;;  %v4569_v13 = vpop.f32.mrf.mxu1 }
 0x4fd   : > { %v4168_v29 = vadd.f32 %v4167_v37, %v4070_v1  ;;  %v4209_v13 = vadd.f32 %v4208_v52, %v4111_v61 }
 0x4fe   : > { %v4529_v3 = vpop.f32.mrf.mxu0  ;;  %v4570_v30 = vpop.f32.mrf.mxu1 }
 0x4ff   : > { %v4337_v3 = vadd.f32 %v4289_v8, %v4166_v31  ;;  %v4339_v30 = vadd.f32 %v4330_v20, %v4207_v26  ;;  %v4338_v41 = vadd.f32 %v4291_v58, %v4168_v29  ;;  %v4340_v19 = vadd.f32 %v4332_v56, %v4209_v13  ;;  %v5091_v58 = vpop.permute.xlu1 %5090  ;;  %v345_v13 = vld [vmem:[%s6941_s23 + $0x8] sm:$0xff] }
 0x500   : > { %v4652_v33 = vpop.f32.mrf.mxu0  ;;  %v4693_v22 = vpop.f32.mrf.mxu1 }
 0x501   : > { %v4466_v49 = vadd.f32 %v4419_v45, %v4338_v41  ;;  %v4468_v35 = vadd.f32 %v4460_v53, %v4340_v19 }
 0x502   : > { %v4654_v12 = vpop.f32.mrf.mxu0  ;;  %v4695_v21 = vpop.f32.mrf.mxu1 }
 0x504   : > { %v4656_v2 = vpop.f32.mrf.mxu0  ;;  %v4697_v0 = vpop.f32.mrf.mxu1 }
 0x505   : > { %v4465_v2 = vadd.f32 %v4417_v5, %v4337_v3  ;;  %v4467_v0 = vadd.f32 %v4458_v51, %v4339_v30  ;;  %v344_v3 = vld [vmem:[%s6941_s23] sm:$0xff] }
 0x506   : > { %v4657_v11 = vpop.f32.mrf.mxu0  ;;  %v4698_v6 = vpop.f32.mrf.mxu1 }
 0x507   : > { %v4572_v54 = vadd.f32 %v4524_v40, %v4465_v2  ;;  %v4574_v48 = vadd.f32 %v4565_v60, %v4467_v0  ;;  %v8535_v0 = vld [vmem:[#allocation32_spill] sm:$0xff] }
 0x508   : > { %v4780_v9 = vpop.f32.mrf.mxu0  ;;  %v4821_v14 = vpop.f32.mrf.mxu1 }
 0x509   : > { %v4700_v1 = vadd.f32 %v4652_v33, %v4572_v54  ;;  %v4702_v61 = vadd.f32 %v4693_v22, %v4574_v48 }
 0x50a   : > { %v4782_v59 = vpop.f32.mrf.mxu0  ;;  %v4823_v47 = vpop.f32.mrf.mxu1 }
 0x50b   : > { %v4828_v36 = vadd.f32 %v4780_v9, %v4700_v1  ;;  %v4830_v50 = vadd.f32 %v4821_v14, %v4702_v61 }
 0x50c   : > { %v4784_v23 = vpop.f32.mrf.mxu0  ;;  %v4825_v46 = vpop.f32.mrf.mxu1 }
 0x50d   : > { %v4573_v23 = vadd.f32 %v4526_v44, %v4466_v49  ;;  %v4575_v46 = vadd.f32 %v4567_v34, %v4468_v35 }
 0x50e   : > { %v4785_v10 = vpop.f32.mrf.mxu0  ;;  %v4826_v24 = vpop.f32.mrf.mxu1 }
 0x50f   : > { %v4701_v10 = vadd.f32 %v4654_v12, %v4573_v23  ;;  %v4703_v24 = vadd.f32 %v4695_v21, %v4575_v46  ;;  %v8537_v23 = vld [vmem:[#allocation30_spill] sm:$0xff]  ;;  %v8538_v46 = vld [vmem:[#allocation29_spill] sm:$0xff] }
 0x510   : > { %v4908_v11 = vpop.f32.mrf.mxu0  ;;  %v4949_v6 = vpop.f32.mrf.mxu1  ;;  %v5111_v1 = vcombine.low %v8538_v46, %v8537_v23 }
 0x511   : > { %v4829_v8 = vadd.f32 %v4782_v59, %v4701_v10  ;;  %v4831_v20 = vadd.f32 %v4823_v47, %v4703_v24  ;;  %v4956_v41 = vadd.f32 %v4908_v11, %v4828_v36  ;;  %v4958_v19 = vadd.f32 %v4949_v6, %v4830_v50  ;;  %v8536_v11 = vld [vmem:[#allocation31_spill] sm:$0xff]  ;;  %v6580_v24 = vld [vmem:[%s8396_s6 + $0xc] sm:$0xf] }
 0x512   : > { %v4910_v38 = vpop.f32.mrf.mxu0  ;;  %v4951_v62 = vpop.f32.mrf.mxu1  ;;  %v5112_v6 = vcombine.low %v8536_v11, %v8535_v0  ;;  %v6581_v0 = vld [vmem:[%s8395_s5 + $0x36] sm:$0x3] }
 0x513   : > { %v4957_v51 = vadd.f32 %v4910_v38, %v4829_v8  ;;  %v4959_v49 = vadd.f32 %v4951_v62, %v4831_v20 }
 0x514   : > { %v4912_v31 = vpop.f32.mrf.mxu0  ;;  %v4953_v26 = vpop.f32.mrf.mxu1 }
 0x516   : > { %v4913_v37 = vpop.f32.mrf.mxu0  ;;  %v4954_v52 = vpop.f32.mrf.mxu1 }
 0x518   : > { %v5036_v56 = vpop.f32.mrf.mxu0  ;;  %v5077_v5 = vpop.f32.mrf.mxu1 }
 0x519   : > { %v5084_v35 = vadd.f32 %v5036_v56, %v4956_v41  ;;  %v5086_v54 = vadd.f32 %v5077_v5, %v4958_v19 }
 0x51a   : > { %v5079_v48 = vpop.f32.mrf.mxu1  ;;  %v5038_v45 = vpop.f32.mrf.mxu0 }
 0x51b   : > { %v5087_v53 = vadd.f32 %v5079_v48, %v4959_v49  ;;  %v5093_v40 = vadd.f32 %v5091_v58, %v5084_v35  ;;  %v5095_v60 = vadd.f32 %v5091_v58, %v5086_v54  ;;  %v5085_v44 = vadd.f32 %v5038_v45, %v4957_v51 }
 0x51c   : > { %v5040_v34 = vpop.f32.mrf.mxu0  ;;  %v5081_v33 = vpop.f32.mrf.mxu1 }
 0x51d   : > { %v5096_v22 = vadd.f32 %v5091_v58, %v5087_v53  ;;  %v5094_v12 = vadd.f32 %v5091_v58, %v5085_v44  ;;  %v5097_v14 = vmax.f32 %v5093_v40, 0.0  ;;  %v5099_v59 = vmax.f32 %v5095_v60, 0.0 }
 0x51e   : > { %v5041_v21 = vpop.f32.mrf.mxu0  ;;  %v5082_v9 = vpop.f32.mrf.mxu1 }
 0x51f   : > { %v5100_v47 = vmax.f32 %v5096_v22, 0.0  ;;  %v5098_v29 = vmax.f32 %v5094_v12, 0.0 }
 0x521   : > { %v5106_v30 = vcombine.low %v5099_v59, %v5100_v47  ;;  %v5105_v2 = vcombine.low %v5097_v14, %v5098_v29 }
 0x523   : > { %v5110_v38 = vadd.f32 %v5106_v30, %v345_v13  ;;  %v5109_v62 = vadd.f32 %v5105_v2, %v344_v3 }
 0x525   : > { %v8099_v61 = vadd.f32 %v5112_v6, %v5110_v38  ;;  %v8101_v31 = vadd.f32 %v5111_v1, %v5109_v62 }
 0x527   : > { %5153 = vrot.lane.b32.xlu1 %v8101_v31, %s6787_s15  ;;  %v8107_v26 = vcombine.high %v8099_v61, %v8099_v61  ;;  %v8115_v10 = vcombine.high %v8101_v31, %v8101_v31 }
 0x529   : > { %5150 = vrot.lane.b32.xlu0 %v8107_v26, %s6787_s15 }
 0x52b   : > { %5157 = vrot.lane.b32.xlu1 %v8099_v61, %s6787_s15 }
 0x52d   : > { %5155 = vrot.lane.b32.xlu0 %v8115_v10, %s6787_s15  ;;  %s6272_s15 = scalar_lea.sflag [#allocation4], %s6935_s8 }
 0x52f   : > { %5126 = vrot.lane.b32.xlu1 %v8101_v31, %s6789_s12 }
 0x531   : > { %5121 = vrot.lane.b32.xlu0 %v8107_v26, %s6789_s12 }
 0x533   : > { %5130 = vrot.lane.b32.xlu1 %v8099_v61, %s6789_s12 }
 0x535   : > { %5128 = vrot.lane.b32.xlu0 %v8115_v10, %s6789_s12  ;;  %s6796_s12 = smov [#allocation5]  }
 0x537   : > { %5374 = vrot.lane.b32.xlu1 %v8101_v31, %s6790_s19 }
 0x539   : > { %5371 = vrot.lane.b32.xlu0 %v8107_v26, %s6790_s19 }
 0x53b   : > { %5378 = vrot.lane.b32.xlu1 %v8099_v61, %s6790_s19 }
 0x53d   : > { %5376 = vrot.lane.b32.xlu0 %v8115_v10, %s6790_s19  ;;  %s6724_s19 = sshll.u32 %s6796_s12, 4  ;;  %s6725_s19 = int_to_ptr.vmem [resolvable:$false] %s6724_s19 }
 0x53f   : > { %5502 = vrot.lane.b32.xlu1 %v8101_v31, %s6791_s21 }
 0x541   : > { %5499 = vrot.lane.b32.xlu0 %v8107_v26, %s6791_s21 }
 0x543   : > { %5506 = vrot.lane.b32.xlu1 %v8099_v61, %s6791_s21 }
 0x545   : > { %5504 = vrot.lane.b32.xlu0 %v8115_v10, %s6791_s21  ;;  %s6726_s21 = scalar_lea.vmem %s6725_s19, 512 }
 0x547   : > { %5738 = vrot.lane.b32.xlu1 %v8115_v10, %s6792_s9 }
 0x549   : > { %5736 = vrot.lane.b32.xlu0 %v8101_v31, %s6792_s9 }
 0x54b   : > { %5742 = vrot.lane.b32.xlu1 %v8107_v26, %s6792_s9 }
 0x54d   : > { %5740 = vrot.lane.b32.xlu0 %v8099_v61, %s6792_s9 }
 0x54f   : > { %5866 = vrot.lane.b32.xlu1 %v8115_v10, %s6793_s11 }
 0x551   : > { %5864 = vrot.lane.b32.xlu0 %v8101_v31, %s6793_s11 }
 0x553   : > { %5870 = vrot.lane.b32.xlu1 %v8107_v26, %s6793_s11 }
 0x555   : > { %5868 = vrot.lane.b32.xlu0 %v8099_v61, %s6793_s11 }
 0x557   : > { %5994 = vrot.lane.b32.xlu1 %v8115_v10, %s8498_s20 }
 0x559   : > { %5992 = vrot.lane.b32.xlu0 %v8101_v31, %s8498_s20 }
 0x55b   : > { %5998 = vrot.lane.b32.xlu1 %v8107_v26, %s8498_s20 }
 0x55d   : > { %5996 = vrot.lane.b32.xlu0 %v8099_v61, %s8498_s20  ;;  %s8556_s20 = sshll.u32 %s6935_s8, 4 }
 0x55e   : > { %s326_s17 = scalar_lea.vmem [#allocation5], %s8556_s20 }
 0x55f   : > { %6122 = vrot.lane.b32.xlu1 %v8115_v10, %s6795_s29  ;;  %s6286_s18 = sshll.u32 %s326_s17, 4  ;;  %s6287_s18 = int_to_ptr.vmem [resolvable:$true] %s6286_s18 }
 0x560   : > { %p6727_p5 = scmp.lt.s32.totalorder %s6287_s18, %s6725_s19 }
 0x561   : > { %6120 = vrot.lane.b32.xlu0 %v8101_v31, %s6795_s29 }
 0x563   : > { %6126 = vrot.lane.b32.xlu1 %v8107_v26, %s6795_s29 }
 0x565   : > { %6124 = vrot.lane.b32.xlu0 %v8099_v61, %s6795_s29  ;;  %s6632_s29 = sshll.u32 %s6858_s28, 8  ;;  %s6720_s28 = scalar_lea.vmem %s6287_s18, 256 }
 0x566   : > { %s8353_s23 = scalar_lea.hbm %s8397_s7, %s6632_s29  ;;  %p6721_p12 = scmp.ne.s32.totalorder %s6287_s18, %s6720_s28 }
 0x567   : > { %p6728_p8 = scmp.lt.s32.totalorder %s6726_s21, %s6720_s28 }
 0x568   : > { %p6722_p1 = pnand %p6721_p12, %p8557_p13 }
 0x569   : > { %6250 = vperm.xlu0 %6688, %v6580_v24   ;;  %p6729_p10 = por %p6728_p8, %p6727_p5 }
 0x56a   : > { %p6723_p3 = pneg %p6722_p1 }
 0x56c   : > { %p6730_p2 = pnand %p6729_p10, %p6723_p3 }
 0x599   : > { %v5154_v36 = vpop.permute.xlu1 %5153 }
 0x59b   : > { %v5151_v50 = vpop.permute.xlu0 %5150 }
 0x59c   : > { %v5166_v37 = vsel %vm415_vm0, %v5151_v50, %v5154_v36 }
 0x59d   : > { %v5167_v52 = vmul.f32 %v5166_v37, %v7048_v16  ;;  %v5158_v8 = vpop.permute.xlu1 %5157 }
 0x59e   : > { %v5161_v20 = vsel %vm415_vm0, %v5158_v8, %v5151_v50 }
 0x59f   : > { %v5170_v41 = vmul.f32 %v5161_v20, %v7051_v17  ;;  %v5156_v19 = vpop.permute.xlu0 %5155  ;;  %v5173_v5 = vpack.c.bf16 %v5167_v52, %v5167_v52 }
 0x5a0   : > { %v5159_v58 = vsel %vm415_vm0, %v5154_v36, %v5156_v19  ;;  %v5160_v56 = vsel %vm415_vm0, %v5156_v19, %v5158_v8 }
 0x5a1   : > { %v5176_v51 = vpack.c.bf16 %v5170_v41, %v5170_v41  ;;  %v5168_v49 = vmul.f32 %v5159_v58, %v7045_v15  ;;  %v5169_v35 = vmul.f32 %v5160_v56, %v7054_v18  ;;  %v5127_v54 = vpop.permute.xlu1 %5126  ;;  %v5181_v60 = vsel %vm1746_vm10, %v5173_v5, 0  ;;  %v6582_v18 = vld [vmem:[%s8395_s5 + $0x38] sm:$0x3]  ;;  %v6591_v41 = vld [vmem:[%s8395_s5 + $0x3a] sm:$0x3] }
 0x5a3   : > { %v5174_v48 = vpack.c.bf16 %v5168_v49, %v5168_v49  ;;  %v5175_v45 = vpack.c.bf16 %v5169_v35, %v5169_v35  ;;  %6585 = vmatprep.subr.msk.bf16.mxu1 %vm1746_vm10, %v5176_v51  ;;  %v5122_v16 = vpop.permute.xlu0 %5121  ;;  %v8539_v35 = vld [vmem:[#allocation12_spill] sm:$0xff] }
 0x5a4   : > { %v5139_v53 = vsel %vm365_vm1, %v5122_v16, %v5127_v54 }
 0x5a5   : > { %v5140_v17 = vmul.f32 %v5139_v53, %v7066_v28  ;;  %v5131_v40 = vpop.permute.xlu1 %5130  ;;  %6583 = vmatprep.subr.msk.bf16.mxu0 %vm1746_vm10, %v5174_v48  ;;  %v5187_v44 = vsel %vm1746_vm10, %v5175_v45, 0  ;;  %v5634_v53 = vpack.c.bf16 %v8107_v26, %v8107_v26 }
 0x5a6   : > { %v5134_v15 = vsel %vm365_vm1, %v5131_v40, %v5122_v16  ;;  %5207 = vmatpush1.bf16.msra.mxu0 %v5181_v60  ;;  %5248 = vmatpush1.bf16.msra.mxu1 %v5187_v44 }
 0x5a7   : > { %v5143_v34 = vmul.f32 %v5134_v15, %v7080_v42  ;;  %v5129_v33 = vpop.permute.xlu0 %5128  ;;  %v5146_v22 = vpack.c.bf16 %v5140_v17, %v5140_v17  ;;  %v5633_v17 = vpack.c.bf16 %v8099_v61, %v8099_v61  ;;  %v6596_v61 = vld [vmem:[%s8395_s5 + $0x3c] sm:$0x3] }
 0x5a8   : > { %v5132_v28 = vsel %vm365_vm1, %v5127_v54, %v5129_v33  ;;  %v5133_v12 = vsel %vm365_vm1, %v5129_v33, %v5131_v40 }
 0x5a9   : > { %v5149_v21 = vpack.c.bf16 %v5143_v34, %v5143_v34  ;;  %v5141_v9 = vmul.f32 %v5132_v28, %v7074_v39  ;;  %v5142_v14 = vmul.f32 %v5133_v12, %v7083_v43  ;;  %v5375_v59 = vpop.permute.xlu1 %5374  ;;  %6584 = vmatmul.mubr.msk.bf16.vlgmr.msra.gmra.mxu0 %vm1742_vm11, %v6582_v18  ;;  %6586 = vmatmul.mubr.msk.bf16.vlgmr.msra.gmra.mxu1 %vm1742_vm11, %v6582_v18  ;;  %v5278_v43 = vsel %vm1746_vm10, %v5146_v22, 0  ;;  %v8541_v22 = vld [vmem:[#allocation13_spill] sm:$0xff] }
 0x5aa   : > { %5321 = vmatprep.mubr.bf16.mxu0 %v8499_v32  ;;  %5362 = vmatprep.mubr.bf16.mxu1 %v8499_v32  ;;  %v5632_v18 = vpack.c.bf16 %v8115_v10, %v8115_v10 }
 0x5ab   : > { %v5147_v42 = vpack.c.bf16 %v5141_v9, %v5141_v9  ;;  %v5148_v47 = vpack.c.bf16 %v5142_v14, %v5142_v14  ;;  %6589 = vmatprep.subr.msk.bf16.mxu1 %vm1746_vm10, %v5149_v21  ;;  %v5372_v29 = vpop.permute.xlu0 %5371  ;;  %v8542_v14 = vld [vmem:[#allocation14_spill] sm:$0xff] }
 0x5ac   : > { %v5387_v13 = vsel %vm662_vm4, %v5372_v29, %v5375_v59 }
 0x5ad   : > { %v5388_v39 = vmul.f32 %v5387_v13, %v7100_v55  ;;  %v5379_v3 = vpop.permute.xlu1 %5378  ;;  %6587 = vmatprep.subr.msk.bf16.mxu0 %vm1746_vm10, %v5147_v42  ;;  %v5284_v30 = vsel %vm1746_vm10, %v5148_v47, 0  ;;  %v8543_v42 = vld [vmem:[#allocation16_spill] sm:$0xff]  ;;  %v5645_v13 = vsel %vm1746_vm10, %v5633_v17, 0  ;;  %v8550_v17 = vld [vmem:[#allocation22_spill] sm:$0xff] }
 0x5ae   : > { %v5382_v2 = vsel %vm662_vm4, %v5379_v3, %v5372_v29  ;;  %5304 = vmatpush1.bf16.msra.mxu0 %v5278_v43  ;;  %5345 = vmatpush1.bf16.msra.mxu1 %v5284_v30 }
 0x5af   : > { %v5391_v11 = vmul.f32 %v5382_v2, %v7114_v7  ;;  %v5377_v6 = vpop.permute.xlu0 %5376  ;;  %v5394_v38 = vpack.c.bf16 %v5388_v39, %v5388_v39 }
 0x5b0   : > { %v5380_v55 = vsel %vm662_vm4, %v5375_v59, %v5377_v6  ;;  %v5381_v62 = vsel %vm662_vm4, %v5377_v6, %v5379_v3  ;;  %v6601_v6 = vld [vmem:[%s8395_s5 + $0x3e] sm:$0x3] }
 0x5b1   : > { %v5397_v23 = vpack.c.bf16 %v5391_v11, %v5391_v11  ;;  %v5389_v46 = vmul.f32 %v5380_v55, %v7108_v63  ;;  %v5390_v1 = vmul.f32 %v5381_v62, %v8514_v57  ;;  %v5503_v24 = vpop.permute.xlu1 %5502  ;;  %6588 = vmatmul.mubr.msk.bf16.vlgmr.msra.gmra.mxu0 %vm1742_vm11, %v6581_v0  ;;  %6590 = vmatmul.mubr.msk.bf16.vlgmr.msra.gmra.mxu1 %vm1742_vm11, %v6581_v0  ;;  %v5402_v57 = vsel %vm1746_vm10, %v5394_v38, 0  ;;  %v8544_v38 = vld [vmem:[#allocation19_spill] sm:$0xff] }
 0x5b2   : > { %5445 = vmatprep.mubr.bf16.mxu0 %v8499_v32  ;;  %5486 = vmatprep.mubr.bf16.mxu1 %v8499_v32 }
 0x5b3   : > { %v5395_v7 = vpack.c.bf16 %v5389_v46, %v5389_v46  ;;  %v5396_v36 = vpack.c.bf16 %v5390_v1, %v5390_v1  ;;  %6594 = vmatprep.subr.msk.bf16.mxu1 %vm1746_vm10, %v5397_v23  ;;  %v5500_v50 = vpop.permute.xlu0 %5499  ;;  %v8545_v23 = vld [vmem:[#allocation17_spill] sm:$0xff] }
 0x5b4   : > { %v5515_v37 = vsel %vm814_vm5, %v5500_v50, %v5503_v24 }
 0x5b5   : > { %v5516_v63 = vmul.f32 %v5515_v37, %v8515_v4  ;;  %v5507_v52 = vpop.permute.xlu1 %5506  ;;  %6592 = vmatprep.subr.msk.bf16.mxu0 %vm1746_vm10, %v5395_v7  ;;  %v5408_v8 = vsel %vm1746_vm10, %v5396_v36, 0 }
 0x5b6   : > { %v5510_v20 = vsel %vm814_vm5, %v5507_v52, %v5500_v50  ;;  %5428 = vmatpush1.bf16.msra.mxu0 %v5402_v57  ;;  %5469 = vmatpush1.bf16.msra.mxu1 %v5408_v8  ;;  %v8546_v50 = vld [vmem:[#allocation18_spill] sm:$0xff] }
 0x5b7   : > { %v5519_v19 = vmul.f32 %v5510_v20, %v8516_v25  ;;  %v5505_v58 = vpop.permute.xlu0 %5504  ;;  %v5522_v56 = vpack.c.bf16 %v5516_v63, %v5516_v63  ;;  %v8547_v63 = vld [vmem:[#allocation20_spill] sm:$0xff] }
 0x5b8   : > { %v5508_v4 = vsel %vm814_vm5, %v5503_v24, %v5505_v58  ;;  %v5509_v5 = vsel %vm814_vm5, %v5505_v58, %v5507_v52 }
 0x5b9   : > { %v5525_v51 = vpack.c.bf16 %v5519_v19, %v5519_v19  ;;  %v5517_v49 = vmul.f32 %v5508_v4, %v8517_v27  ;;  %v5518_v54 = vmul.f32 %v5509_v5, %v8539_v35  ;;  %v5739_v48 = vpop.permute.xlu1 %5738  ;;  %6593 = vmatmul.mubr.msk.bf16.vlgmr.msra.gmra.mxu0 %vm1742_vm11, %v6591_v41  ;;  %6595 = vmatmul.mubr.msk.bf16.vlgmr.msra.gmra.mxu1 %vm1742_vm11, %v6591_v41  ;;  %v5530_v44 = vsel %vm1746_vm10, %v5522_v56, 0 }
 0x5ba   : > { %5573 = vmatprep.mubr.bf16.mxu0 %v8499_v32  ;;  %5614 = vmatprep.mubr.bf16.mxu1 %v8499_v32  ;;  %v5631_v27 = vpack.c.bf16 %v8101_v31, %v8101_v31  ;;  %v8540_v31 = vld [vmem:[#allocation15_spill] sm:$0xff] }
 0x5bb   : > { %v5523_v25 = vpack.c.bf16 %v5517_v49, %v5517_v49  ;;  %v5524_v45 = vpack.c.bf16 %v5518_v54, %v5518_v54  ;;  %6599 = vmatprep.subr.msk.bf16.mxu1 %vm1746_vm10, %v5525_v51  ;;  %v5737_v16 = vpop.permute.xlu0 %5736  ;;  %v6606_v51 = vld [vmem:[%s8395_s5 + $0x40] sm:$0x3]  ;;  %v8548_v49 = vld [vmem:[#allocation23_spill] sm:$0xff] }
 0x5bc   : > { %v5744_v40 = vsel %vm1072_vm6, %v5737_v16, %v5739_v48  ;;  %v5639_v21 = vsel %vm1746_vm10, %v5631_v27, 0 }
 0x5bd   : > { %v5743_v60 = vpop.permute.xlu1 %5742  ;;  %6597 = vmatprep.subr.msk.bf16.mxu0 %vm1746_vm10, %v5523_v25  ;;  %v5536_v15 = vsel %vm1746_vm10, %v5524_v45, 0  ;;  %v5753_v28 = vmul.f32 %v5744_v40, %v8541_v22 }
 0x5be   : > { %v5752_v26 = vsel %vm1072_vm6, %v5743_v60, %v5737_v16  ;;  %5556 = vmatpush1.bf16.msra.mxu0 %v5530_v44  ;;  %5597 = vmatpush1.bf16.msra.mxu1 %v5536_v15 }
 0x5bf   : > { %v5756_v34 = vmul.f32 %v5752_v26, %v8540_v31  ;;  %6604 = vmatprep.subr.msk.bf16.mxu1 %vm1746_vm10, %v5634_v53  ;;  %v5741_v33 = vpop.permute.xlu0 %5740  ;;  %6602 = vmatprep.subr.msk.bf16.mxu0 %vm1746_vm10, %v5632_v18  ;;  %v5759_v43 = vpack.c.bf16 %v5753_v28, %v5753_v28 }
 0x5c0   : > { %v5745_v12 = vsel %vm1072_vm6, %v5739_v48, %v5741_v33  ;;  %v5746_v10 = vsel %vm1072_vm6, %v5741_v33, %v5743_v60  ;;  %v8549_v48 = vld [vmem:[#allocation21_spill] sm:$0xff]  ;;  %v8551_v60 = vld [vmem:[#allocation24_spill] sm:$0xff] }
 0x5c1   : > { %v5762_v9 = vpack.c.bf16 %v5756_v34, %v5756_v34  ;;  %v5754_v59 = vmul.f32 %v5745_v12, %v8542_v14  ;;  %v5755_v47 = vmul.f32 %v5746_v10, %v8543_v42  ;;  %v5867_v29 = vpop.permute.xlu1 %5866  ;;  %6598 = vmatmul.mubr.msk.bf16.vlgmr.msra.gmra.mxu0 %vm1742_vm11, %v6596_v61  ;;  %6600 = vmatmul.mubr.msk.bf16.vlgmr.msra.gmra.mxu1 %vm1742_vm11, %v6596_v61  ;;  %v5767_v7 = vsel %vm1746_vm10, %v5759_v43, 0  ;;  %v6611_v12 = vld [vmem:[%s8395_s5 + $0x42] sm:$0x3]  ;;  %v8552_v10 = vld [vmem:[#allocation27_spill] sm:$0xff]  ;;  %v8553_v14 = vld [vmem:[#allocation25_spill] sm:$0xff] }
 0x5c2   : > { %5665 = vmatpush1.bf16.msra.mxu0 %v5639_v21  ;;  %5706 = vmatpush1.bf16.msra.mxu1 %v5645_v13  ;;  %v8555_v43 = vld [vmem:[#allocation28_spill] sm:$0xff] }
 0x5c3   : > { %v5760_v39 = vpack.c.bf16 %v5754_v59, %v5754_v59  ;;  %6609 = vmatprep.subr.msk.bf16.mxu1 %vm1746_vm10, %v5762_v9  ;;  %v5865_v3 = vpop.permute.xlu0 %5864  ;;  %5682 = vmatprep.mubr.bf16.mxu0 %v8499_v32  ;;  %v5761_v30 = vpack.c.bf16 %v5755_v47, %v5755_v47 }
 0x5c4   : > { %5723 = vmatprep.mubr.bf16.mxu1 %v8499_v32  ;;  %v5872_v2 = vsel %vm1224_vm7, %v5865_v3, %v5867_v29 }
 0x5c5   : > { %v5871_v0 = vpop.permute.xlu1 %5870  ;;  %6607 = vmatprep.subr.msk.bf16.mxu0 %vm1746_vm10, %v5760_v39  ;;  %v5881_v46 = vmul.f32 %v5872_v2, %v8545_v23  ;;  %v5773_v8 = vsel %vm1746_vm10, %v5761_v30, 0  ;;  %v8554_v39 = vld [vmem:[#allocation26_spill] sm:$0xff]  ;;  %v6621_v23 = vld [vmem:[%s8395_s5 + $0x46] sm:$0x3] }
 0x5c6   : > { %v5880_v11 = vsel %vm1224_vm7, %v5871_v0, %v5865_v3 }
 0x5c7   : > { %v5884_v55 = vmul.f32 %v5880_v11, %v8544_v38  ;;  %v5869_v62 = vpop.permute.xlu0 %5868  ;;  %v5887_v19 = vpack.c.bf16 %v5881_v46, %v5881_v46  ;;  %v6616_v38 = vld [vmem:[%s8395_s5 + $0x44] sm:$0x3] }
 0x5c8   : > { %v5873_v1 = vsel %vm1224_vm7, %v5867_v29, %v5869_v62  ;;  %v5874_v24 = vsel %vm1224_vm7, %v5869_v62, %v5871_v0 }
 0x5c9   : > { %v5890_v36 = vpack.c.bf16 %v5884_v55, %v5884_v55  ;;  %v5882_v37 = vmul.f32 %v5873_v1, %v8546_v50  ;;  %v5883_v52 = vmul.f32 %v5874_v24, %v8547_v63  ;;  %v5995_v57 = vpop.permute.xlu1 %5994  ;;  %6603 = vmatmul.mubr.msk.bf16.vlgmr.msra.gmra.mxu0 %vm1742_vm11, %v6601_v6  ;;  %6605 = vmatmul.mubr.msk.bf16.vlgmr.msra.gmra.mxu1 %vm1742_vm11, %v6601_v6  ;;  %v5895_v53 = vsel %vm1746_vm10, %v5887_v19, 0 }
 0x5ca   : > { %5793 = vmatpush1.bf16.msra.mxu0 %v5767_v7  ;;  %5834 = vmatpush1.bf16.msra.mxu1 %v5773_v8 }
 0x5cb   : > { %v5888_v20 = vpack.c.bf16 %v5882_v37, %v5882_v37  ;;  %6614 = vmatprep.subr.msk.bf16.mxu1 %vm1746_vm10, %v5890_v36  ;;  %v5993_v41 = vpop.permute.xlu0 %5992  ;;  %5810 = vmatprep.mubr.bf16.mxu0 %v8499_v32  ;;  %v5889_v58 = vpack.c.bf16 %v5883_v52, %v5883_v52 }
 0x5cc   : > { %5851 = vmatprep.mubr.bf16.mxu1 %v8499_v32  ;;  %v6000_v56 = vsel %vm1376_vm8, %v5993_v41, %v5995_v57 }
 0x5cd   : > { %v5999_v4 = vpop.permute.xlu1 %5998  ;;  %6612 = vmatprep.subr.msk.bf16.mxu0 %vm1746_vm10, %v5888_v20  ;;  %v6009_v25 = vmul.f32 %v6000_v56, %v8549_v48  ;;  %v5901_v18 = vsel %vm1746_vm10, %v5889_v58, 0 }
 0x5ce   : > { %v6008_v5 = vsel %vm1376_vm8, %v5999_v4, %v5993_v41 }
 0x5cf   : > { %v6012_v35 = vmul.f32 %v6008_v5, %v8548_v49  ;;  %v5997_v54 = vpop.permute.xlu0 %5996  ;;  %v6015_v31 = vpack.c.bf16 %v6009_v25, %v6009_v25 }
 0x5d0   : > { %v6001_v45 = vsel %vm1376_vm8, %v5995_v57, %v5997_v54  ;;  %v6002_v16 = vsel %vm1376_vm8, %v5997_v54, %v5999_v4 }
 0x5d1   : > { %v6018_v27 = vpack.c.bf16 %v6012_v35, %v6012_v35  ;;  %v6010_v40 = vmul.f32 %v6001_v45, %v8550_v17  ;;  %v6011_v44 = vmul.f32 %v6002_v16, %v8551_v60  ;;  %v6123_v15 = vpop.permute.xlu1 %6122  ;;  %6608 = vmatmul.mubr.msk.bf16.vlgmr.msra.gmra.mxu0 %vm1742_vm11, %v6606_v51  ;;  %6610 = vmatmul.mubr.msk.bf16.vlgmr.msra.gmra.mxu1 %vm1742_vm11, %v6606_v51  ;;  %v6023_v29 = vsel %vm1746_vm10, %v6015_v31, 0 }
 0x5d2   : > { %5921 = vmatpush1.bf16.msra.mxu0 %v5895_v53  ;;  %5962 = vmatpush1.bf16.msra.mxu1 %v5901_v18 }
 0x5d3   : > { %v6016_v26 = vpack.c.bf16 %v6010_v40, %v6010_v40  ;;  %6619 = vmatprep.subr.msk.bf16.mxu1 %vm1746_vm10, %v6018_v27  ;;  %v6121_v61 = vpop.permute.xlu0 %6120  ;;  %5938 = vmatprep.mubr.bf16.mxu0 %v8499_v32  ;;  %v6017_v34 = vpack.c.bf16 %v6011_v44, %v6011_v44 }
 0x5d4   : > { %5979 = vmatprep.mubr.bf16.mxu1 %v8499_v32  ;;  %v6128_v33 = vsel %vm1528_vm9, %v6121_v61, %v6123_v15 }
 0x5d5   : > { %v6127_v22 = vpop.permute.xlu1 %6126  ;;  %6617 = vmatprep.subr.msk.bf16.mxu0 %vm1746_vm10, %v6016_v26  ;;  %v6137_v59 = vmul.f32 %v6128_v33, %v8553_v14  ;;  %v6029_v2 = vsel %vm1746_vm10, %v6017_v34, 0 }
 0x5d6   : > { %v6136_v28 = vsel %vm1528_vm9, %v6127_v22, %v6121_v61 }
 0x5d7   : > { %v6140_v21 = vmul.f32 %v6136_v28, %v8552_v10  ;;  %v6125_v9 = vpop.permute.xlu0 %6124  ;;  %v6143_v11 = vpack.c.bf16 %v6137_v59, %v6137_v59 }
 0x5d8   : > { %v6129_v42 = vsel %vm1528_vm9, %v6123_v15, %v6125_v9  ;;  %v6130_v47 = vsel %vm1528_vm9, %v6125_v9, %v6127_v22 }
 0x5d9   : > { %v6146_v13 = vpack.c.bf16 %v6140_v21, %v6140_v21  ;;  %v6138_v3 = vmul.f32 %v6129_v42, %v8554_v39  ;;  %v6139_v30 = vmul.f32 %v6130_v47, %v8555_v43  ;;  %6613 = vmatmul.mubr.msk.bf16.vlgmr.msra.gmra.mxu0 %vm1742_vm11, %v6611_v12  ;;  %6615 = vmatmul.mubr.msk.bf16.vlgmr.msra.gmra.mxu1 %vm1742_vm11, %v6611_v12  ;;  %v6151_v55 = vsel %vm1746_vm10, %v6143_v11, 0 }
 0x5da   : > { %6049 = vmatpush1.bf16.msra.mxu0 %v6023_v29  ;;  %6090 = vmatpush1.bf16.msra.mxu1 %v6029_v2 }
 0x5db   : > { %v6144_v0 = vpack.c.bf16 %v6138_v3, %v6138_v3  ;;  %6624 = vmatprep.subr.msk.bf16.mxu1 %vm1746_vm10, %v6146_v13  ;;  %6066 = vmatprep.mubr.bf16.mxu0 %v8499_v32  ;;  %v6145_v6 = vpack.c.bf16 %v6139_v30, %v6139_v30 }
 0x5dc   : > { %6107 = vmatprep.mubr.bf16.mxu1 %v8499_v32 }
 0x5dd   : > { %6622 = vmatprep.subr.msk.bf16.mxu0 %vm1746_vm10, %v6144_v0  ;;  %v6157_v62 = vsel %vm1746_vm10, %v6145_v6, 0 }
 0x5e1   : > { %6618 = vmatmul.mubr.msk.bf16.vlgmr.msra.gmra.mxu0 %vm1742_vm11, %v6616_v38  ;;  %6620 = vmatmul.mubr.msk.bf16.vlgmr.msra.gmra.mxu1 %vm1742_vm11, %v6616_v38 }
 0x5e2   : > { %6177 = vmatpush1.bf16.msra.mxu0 %v6151_v55  ;;  %6218 = vmatpush1.bf16.msra.mxu1 %v6157_v62 }
 0x5e3   : > { %6194 = vmatprep.mubr.bf16.mxu0 %v8499_v32  ;;  %6235 = vmatprep.mubr.bf16.mxu1 %v8499_v32 }
 0x5e9   : > { %6623 = vmatmul.mubr.msk.bf16.vlgmr.msra.gmra.mxu0 %vm1742_vm11, %v6621_v23  ;;  %6625 = vmatmul.mubr.msk.bf16.vlgmr.msra.gmra.mxu1 %vm1742_vm11, %v6621_v23 }
 0x669   : > { %v5226_v46 = vpop.f32.mrf.mxu0  ;;  %v5267_v1 = vpop.f32.mrf.mxu1 }
 0x66b   : > { %v5228_v24 = vpop.f32.mrf.mxu0  ;;  %v5269_v7 = vpop.f32.mrf.mxu1 }
 0x66d   : > { %v5230_v36 = vpop.f32.mrf.mxu0  ;;  %v5271_v50 = vpop.f32.mrf.mxu1 }
 0x66f   : > { %v5231_v37 = vpop.f32.mrf.mxu0  ;;  %v5272_v63 = vpop.f32.mrf.mxu1 }
 0x671   : > { %v5323_v52 = vpop.f32.mrf.mxu0  ;;  %v5364_v57 = vpop.f32.mrf.mxu1 }
 0x672   : > { %v5324_v39 = vadd.f32 %v5323_v52, %v5226_v46  ;;  %v5365_v3 = vadd.f32 %v5364_v57, %v5267_v1 }
 0x673   : > { %v5325_v8 = vpop.f32.mrf.mxu0  ;;  %v5366_v32 = vpop.f32.mrf.mxu1 }
 0x674   : > { %v5326_v2 = vadd.f32 %v5325_v8, %v5228_v24  ;;  %v5367_v0 = vadd.f32 %v5366_v32, %v5269_v7 }
 0x675   : > { %v5327_v20 = vpop.f32.mrf.mxu0  ;;  %v5368_v41 = vpop.f32.mrf.mxu1 }
 0x677   : > { %v5328_v19 = vpop.f32.mrf.mxu0  ;;  %v5369_v58 = vpop.f32.mrf.mxu1 }
 0x679   : > { %v5447_v56 = vpop.f32.mrf.mxu0  ;;  %v5488_v4 = vpop.f32.mrf.mxu1 }
 0x67a   : > { %v5495_v11 = vadd.f32 %v5447_v56, %v5324_v39  ;;  %v5497_v6 = vadd.f32 %v5488_v4, %v5365_v3 }
 0x67b   : > { %v5449_v5 = vpop.f32.mrf.mxu0  ;;  %v5490_v51 = vpop.f32.mrf.mxu1 }
 0x67c   : > { %v5496_v62 = vadd.f32 %v5449_v5, %v5326_v2  ;;  %v5498_v23 = vadd.f32 %v5490_v51, %v5367_v0 }
 0x67d   : > { %v5451_v49 = vpop.f32.mrf.mxu0  ;;  %v5492_v35 = vpop.f32.mrf.mxu1 }
 0x67f   : > { %v5452_v54 = vpop.f32.mrf.mxu0  ;;  %v5493_v48 = vpop.f32.mrf.mxu1 }
 0x681   : > { %v5575_v25 = vpop.f32.mrf.mxu0  ;;  %v5616_v45 = vpop.f32.mrf.mxu1 }
 0x682   : > { %v5623_v36 = vadd.f32 %v5575_v25, %v5495_v11  ;;  %v5625_v50 = vadd.f32 %v5616_v45, %v5497_v6 }
 0x683   : > { %v5577_v16 = vpop.f32.mrf.mxu0  ;;  %v5618_v53 = vpop.f32.mrf.mxu1 }
 0x684   : > { %v5624_v20 = vadd.f32 %v5577_v16, %v5496_v62  ;;  %v5626_v41 = vadd.f32 %v5618_v53, %v5498_v23 }
 0x685   : > { %v5579_v27 = vpop.f32.mrf.mxu0  ;;  %v5620_v17 = vpop.f32.mrf.mxu1 }
 0x686   : > { %v6251_v27 = vpop.permute.xlu0 %6250 }
 0x687   : > { %v5580_v40 = vpop.f32.mrf.mxu0  ;;  %v5621_v60 = vpop.f32.mrf.mxu1 }
 0x689   : > { %v5684_v44 = vpop.f32.mrf.mxu0  ;;  %v5725_v15 = vpop.f32.mrf.mxu1 }
 0x68a   : > { %v5732_v19 = vadd.f32 %v5684_v44, %v5623_v36  ;;  %v5734_v58 = vadd.f32 %v5725_v15, %v5625_v50 }
 0x68b   : > { %v5686_v18 = vpop.f32.mrf.mxu0  ;;  %v5727_v26 = vpop.f32.mrf.mxu1 }
 0x68c   : > { %v5733_v52 = vadd.f32 %v5686_v18, %v5624_v20  ;;  %v5735_v57 = vadd.f32 %v5727_v26, %v5626_v41 }
 0x68d   : > { %v5688_v61 = vpop.f32.mrf.mxu0  ;;  %v5729_v31 = vpop.f32.mrf.mxu1 }
 0x68f   : > { %v5689_v34 = vpop.f32.mrf.mxu0  ;;  %v5730_v33 = vpop.f32.mrf.mxu1 }
 0x691   : > { %v5812_v22 = vpop.f32.mrf.mxu0  ;;  %v5853_v28 = vpop.f32.mrf.mxu1 }
 0x692   : > { %v5860_v24 = vadd.f32 %v5812_v22, %v5732_v19  ;;  %v5862_v7 = vadd.f32 %v5853_v28, %v5734_v58 }
 0x693   : > { %v5814_v12 = vpop.f32.mrf.mxu0  ;;  %v5855_v10 = vpop.f32.mrf.mxu1 }
 0x694   : > { %v5861_v56 = vadd.f32 %v5814_v12, %v5733_v52  ;;  %v5863_v4 = vadd.f32 %v5855_v10, %v5735_v57 }
 0x695   : > { %v5816_v21 = vpop.f32.mrf.mxu0  ;;  %v5857_v9 = vpop.f32.mrf.mxu1 }
 0x697   : > { %v5817_v14 = vpop.f32.mrf.mxu0  ;;  %v5858_v59 = vpop.f32.mrf.mxu1 }
 0x699   : > { %v5940_v42 = vpop.f32.mrf.mxu0  ;;  %v5981_v47 = vpop.f32.mrf.mxu1 }
 0x69a   : > { %v5988_v5 = vadd.f32 %v5940_v42, %v5860_v24  ;;  %v5990_v51 = vadd.f32 %v5981_v47, %v5862_v7 }
 0x69b   : > { %v5942_v29 = vpop.f32.mrf.mxu0  ;;  %v5983_v13 = vpop.f32.mrf.mxu1 }
 0x69c   : > { %v5989_v54 = vadd.f32 %v5942_v29, %v5861_v56  ;;  %v5991_v48 = vadd.f32 %v5983_v13, %v5863_v4 }
 0x69d   : > { %v5944_v43 = vpop.f32.mrf.mxu0  ;;  %v5985_v30 = vpop.f32.mrf.mxu1 }
 0x69f   : > { %v5945_v38 = vpop.f32.mrf.mxu0  ;;  %v5986_v55 = vpop.f32.mrf.mxu1 }
 0x6a1   : > { %v6068_v37 = vpop.f32.mrf.mxu0  ;;  %v6109_v63 = vpop.f32.mrf.mxu1 }
 0x6a2   : > { %v6116_v25 = vadd.f32 %v6068_v37, %v5988_v5  ;;  %v6118_v45 = vadd.f32 %v6109_v63, %v5990_v51 }
 0x6a3   : > { %v6070_v46 = vpop.f32.mrf.mxu0  ;;  %v6111_v1 = vpop.f32.mrf.mxu1 }
 0x6a4   : > { %v6117_v17 = vadd.f32 %v6070_v46, %v5989_v54  ;;  %v6119_v40 = vadd.f32 %v6111_v1, %v5991_v48 }
 0x6a5   : > { %v6072_v8 = vpop.f32.mrf.mxu0  ;;  %v6113_v32 = vpop.f32.mrf.mxu1 }
 0x6a7   : > { %v6073_v49 = vpop.f32.mrf.mxu0  ;;  %v6114_v35 = vpop.f32.mrf.mxu1 }
 0x6a9   : > { %v6196_v16 = vpop.f32.mrf.mxu0  ;;  %v6237_v53 = vpop.f32.mrf.mxu1 }
 0x6aa   : > { %v6244_v60 = vadd.f32 %v6196_v16, %v6116_v25  ;;  %v6246_v44 = vadd.f32 %v6237_v53, %v6118_v45 }
 0x6ab   : > { %v6198_v15 = vpop.f32.mrf.mxu0  ;;  %v6239_v18 = vpop.f32.mrf.mxu1 }
 0x6ac   : > { %v6253_v26 = vadd.f32 %v6251_v27, %v6244_v60  ;;  %v6255_v61 = vadd.f32 %v6251_v27, %v6246_v44  ;;  %v6245_v31 = vadd.f32 %v6198_v15, %v6117_v17  ;;  %v6247_v34 = vadd.f32 %v6239_v18, %v6119_v40 }
 0x6ad   : > { %v6200_v33 = vpop.f32.mrf.mxu0  ;;  %v6241_v22 = vpop.f32.mrf.mxu1 }
 0x6ae   : > { %v6254_v28 = vadd.f32 %v6251_v27, %v6245_v31  ;;  %v6256_v12 = vadd.f32 %v6251_v27, %v6247_v34  ;;  %v6257_v9 = vmax.f32 %v6253_v26, 0.0  ;;  %v6259_v14 = vmax.f32 %v6255_v61, 0.0 }
 0x6af   : > { %v6201_v10 = vpop.f32.mrf.mxu0  ;;  %v6242_v21 = vpop.f32.mrf.mxu1 }
 0x6b0   : > { %v6258_v59 = vmax.f32 %v6254_v28, 0.0  ;;  %v6260_v42 = vmax.f32 %v6256_v12, 0.0 }
 0x6b2   : > { %v6265_v47 = vcombine.low %v6257_v9, %v6258_v59  ;;  %v6266_v29 = vcombine.low %v6259_v14, %v6260_v42 }
 0x6b4   : > { %6269 = vst [vmem:[%s326_s17] sm:$0xff] %v6265_v47  ;;  %6270 = vst [vmem:[%s326_s17 + $0x8] sm:$0xff] %v6266_v29 }
 0x6b5   : > { %6733 = shalt.err (!%p6730_p2)
}
 0x6b6   : > { %s6734_s9 = scalar_lea.hbm %s8353_s23, 256  ;;  %s6738_s29 = scalar_lea.hbm %s8397_s7, 512 }
 0x6b7   : > { %p6735_p4 = scmp.ne.s32.totalorder %s8353_s23, %s6734_s9  ;;  %p6739_p0 = scmp.lt.s32.totalorder %s8353_s23, %s8397_s7 }
 0x6b8   : > { %p6740_p6 = scmp.lt.s32.totalorder %s6738_s29, %s6734_s9 }
 0x6b9   : > { %p6736_p9 = pnand %p6735_p4, %p8557_p13 }
 0x6ba   : > { %p6741_p11 = por %p6740_p6, %p6739_p0 }
 0x6bb   : > { %p6737_p7 = pneg %p6736_p9 }
 0x6bd   : > { %p6742_p12 = pnand %p6741_p11, %p6737_p7 }
 0x6bf   : > { %6745 = shalt.err (!%p6742_p12)
}
 0x6c0   : > { %6635 = dma.vmem_to_hbm [thread:$0]  (%p8557_p13), %s6287_s18, 256, %s8353_s23, %s6272_s15  }
 0x6c1 PF: > { %s6298_s16 = sand.u32 1, %s6772_s24   ;;  %p8558_p1 = scmp.ne.s32.totalorder %s8468_s14, 0 }
 0x6c2   : > { %p8559_p3 = scmp.ge.s32.totalorder %s6784_s27, 2  ;;  %s6299_s22 = scalar_lea.sflag [#allocation4], %s6298_s16 }
 0x6c4   : > { %p6642_p5 = pnand %p8559_p3, %p8558_p1 }
 0x6c6   : > { %p6643_p8 = pneg %p6642_p5 }
 0x6c8   : > { %6767 = dma.done.wait (%p6643_p8), %s6299_s22, 256  }
 0x6c9   : > { %6769 = vsyncadd (%p6643_p8), %s6299_s22, 4294967040  ;;  %p20_p10 = scmp.ge.s32.totalorder %s6862_s30, 4   ;;  %s8560_s24 = smov %s6776_s25 }
 0x6ca   : > { %s8561_s25 = smov %s6780_s26  ;;  %s8562_s26 = smov %s6874_s10 }
 0x6cb   : > { %s8563_s27 = smov %s6862_s30  ;;  %22 = sbr.rel (!%p20_p10) target bundleno = 5 (0x5), region = 152 }
 0x6d0   :  { %6304 = vsyncpa [#allocation3], 1 }
 0x6d1   :  { %6306 = vsyncpa [#allocation3 + $0x1], 1 }
 0x6d2   :  { %6307 = vsyncpa [#allocation4], 1 }
 0x6d3   :  { %6309 = vsyncpa [#allocation4 + $0x1], 1 }

</bundles_post_ra>
